<compile_context>
chip_gen: v5e
topology: v5e:2x2
jax: 0.10.0
libtpu: 0.0.40
codegen_flags: <defaults>
</compile_context>

<pallas_src>
import functools

import jax
import jax.numpy as jnp
import numpy as np
from jax import lax
from jax.experimental import pallas as pl
from jax.experimental.pallas import tpu as pltpu


def _make_bottleneck_kernel(H, W, Cpp, dilation, padding):
    """Returns a Pallas kernel body with static shape/dilation baked in.

    Cpp is the (lane-padded) bottleneck width used for all internal matmuls.
    """
    Hp, Wp = H + 2 * padding, W + 2 * padding

    def kernel(x_ref, w1_ref, w2_ref, w3_ref, b1_ref, b2_ref, b3_ref,
               out_ref, pad_ref):
        x = x_ref[0]                                        # (H*W, Cin) f32

        # ---- conv1 (1x1) ; BN1 folded into w1 ; bias + ReLU (MXU, bf16) ----
        y1 = jnp.dot(x.astype(jnp.bfloat16), w1_ref[...],
                     preferred_element_type=jnp.float32)    # (H*W, Cpp) f32
        y1 = jnp.maximum(y1 + b1_ref[...], 0.0)

        # ---- conv2 (3x3, dilation, padding) as one K-fused matmul ----------
        # Zero-padded activation lives in a VMEM scratch.  Only the halo
        # border is re-zeroed each step; the interior is fully overwritten.
        zrow = jnp.zeros((padding, Wp, Cpp), jnp.float32)
        pad_ref[0:padding, :, :] = zrow
        pad_ref[padding + H:Hp, :, :] = zrow
        zcol = jnp.zeros((H, padding, Cpp), jnp.float32)
        pad_ref[padding:padding + H, 0:padding, :] = zcol
        pad_ref[padding:padding + H, padding + W:Wp, :] = zcol
        pad_ref[padding:padding + H, padding:padding + W, :] = y1.reshape(H, W, Cpp)

        # im2col: 9 shifted views concatenated along K (each piece is a
        # lane-aligned multiple of 128 thanks to the Cpp padding).
        patches = []
        for kh in range(3):
            for kw in range(3):
                patches.append(
                    pad_ref[kh * dilation:kh * dilation + H,
                            kw * dilation:kw * dilation + W, :]
                    .astype(jnp.bfloat16))
        col = jnp.concatenate(patches, axis=-1).reshape(H * W, 9 * Cpp)
        y2 = jnp.dot(col, w2_ref[...],
                     preferred_element_type=jnp.float32)    # (H*W, Cpp) f32
        y2 = jnp.maximum(y2 + b2_ref[...], 0.0)

        # ---- conv3 (1x1) ; BN3 folded ; residual add + ReLU ----------------
        y3 = jnp.dot(y2.astype(jnp.bfloat16), w3_ref[...],
                     preferred_element_type=jnp.float32)    # (H*W, Cout) f32
        y3 = y3 + b3_ref[...]
        # downsample=None -> residual is the input block (read again here so
        # an f32 copy is not kept live across the three convs).
        out_ref[0] = jnp.maximum(y3 + x_ref[0], 0.0).astype(out_ref.dtype)

    return kernel


def bottleneck_pallas(x_nchw, params, *, dilation=1):
    """Bottleneck forward. x_nchw: (N, Cin, H, W) float32."""
    padding = dilation if dilation > 1 else 1
    (w1, w2, w3, b1, b2, b3) = params
    N, Cin, H, W = x_nchw.shape
    Cpp = w1.shape[1]            # lane-padded planes
    Cout = w3.shape[1]
    assert Cin == Cout, "downsample=None requires inplanes == planes * 4"

    # NCHW -> channels-last, spatially flattened (lane-dense 2-D blocks).
    # In a full network this layout change would be hoisted so the whole
    # network stays channels-last end-to-end.
    x_flat = jnp.transpose(x_nchw, (0, 2, 3, 1)).reshape(N, H * W, Cin)

    kernel = _make_bottleneck_kernel(H, W, Cpp, dilation, padding)

    out_flat = pl.pallas_call(
        kernel,
        out_shape=jax.ShapeDtypeStruct((N, H * W, Cout), x_nchw.dtype),
        grid=(N,),
        in_specs=[
            pl.BlockSpec((1, H * W, Cin), lambda n: (n, 0, 0)),
            pl.BlockSpec((Cin, Cpp), lambda n: (0, 0)),
            pl.BlockSpec((9 * Cpp, Cpp), lambda n: (0, 0)),
            pl.BlockSpec((Cpp, Cout), lambda n: (0, 0)),
            pl.BlockSpec((1, Cpp), lambda n: (0, 0)),
            pl.BlockSpec((1, Cpp), lambda n: (0, 0)),
            pl.BlockSpec((1, Cout), lambda n: (0, 0)),
        ],
        out_specs=pl.BlockSpec((1, H * W, Cout), lambda n: (n, 0, 0)),
        scratch_shapes=[
            pltpu.VMEM((H + 2 * padding, W + 2 * padding, Cpp), jnp.float32),
        ],
        compiler_params=pltpu.CompilerParams(
            dimension_semantics=("parallel",),
            vmem_limit_bytes=48 * 1024 * 1024),
    )(x_flat, w1, w2, w3, b1, b2, b3)

    out = out_flat.reshape(N, H, W, Cout)
    return jnp.transpose(out, (0, 3, 1, 2))   # back to NCHW


# ---------------------------------------------------------------------------
# Parameter construction (deterministic, mirrors the PyTorch module shapes)
# ---------------------------------------------------------------------------
def make_params(key, inplanes, planes, eps=1e-5):
    ks = jax.random.split(key, 15)
    # PyTorch conv weights are (out, in, kh, kw).
    w1_t = 0.05 * jax.random.normal(ks[0], (planes, inplanes, 1, 1), jnp.float32)
    w2_t = 0.05 * jax.random.normal(ks[1], (planes, planes, 3, 3), jnp.float32)
    w3_t = 0.05 * jax.random.normal(ks[2], (planes * 4, planes, 1, 1), jnp.float32)

    def bn_fold(kg, kb, km, kv, c):
        gamma = 1.0 + 0.1 * jax.random.normal(kg, (c,), jnp.float32)
        beta = 0.1 * jax.random.normal(kb, (c,), jnp.float32)
        mean = 0.1 * jax.random.normal(km, (c,), jnp.float32)
        var = 1.0 + 0.1 * jnp.abs(jax.random.normal(kv, (c,), jnp.float32))
        scale = gamma / jnp.sqrt(var + eps)
        bias = beta - mean * scale
        return (gamma, beta, mean, var), scale, bias

    bn1_raw, s1, b1 = bn_fold(ks[3], ks[4], ks[5], ks[6], planes)
    bn2_raw, s2, b2 = bn_fold(ks[7], ks[8], ks[9], ks[10], planes)
    bn3_raw, s3, b3 = bn_fold(ks[11], ks[12], ks[13], ks[14], planes * 4)

    Cin, Cp, Cout = inplanes, planes, planes * 4
    Cpp = ((Cp + 127) // 128) * 128        # pad planes dim to a lane multiple

    # Fold BN scales into the conv weights (per output channel); pad with
    # exact zeros; store bf16 for the MXU.  Biases stay f32.
    w1f = jnp.transpose(w1_t[:, :, 0, 0], (1, 0)) * s1[None, :]          # (Cin, Cp)
    w2f = jnp.transpose(w2_t, (2, 3, 1, 0)) * s2[None, None, None, :]    # (3,3,Cp,Cp)
    w3f = jnp.transpose(w3_t[:, :, 0, 0], (1, 0)) * s3[None, :]          # (Cp, Cout)

    w1k = jnp.zeros((Cin, Cpp), jnp.float32).at[:, :Cp].set(w1f).astype(jnp.bfloat16)
    w2k = (jnp.zeros((3, 3, Cpp, Cpp), jnp.float32)
           .at[:, :, :Cp, :Cp].set(w2f)
           .reshape(9 * Cpp, Cpp).astype(jnp.bfloat16))
    w3k = jnp.zeros((Cpp, Cout), jnp.float32).at[:Cp, :].set(w3f).astype(jnp.bfloat16)

    b1k = jnp.zeros((1, Cpp), jnp.float32).at[0, :Cp].set(b1)
    b2k = jnp.zeros((1, Cpp), jnp.float32).at[0, :Cp].set(b2)
    b3k = b3[None, :]

    kernel_params = (w1k, w2k, w3k, b1k, b2k, b3k)
    torch_params = (w1_t, w2_t, w3_t, bn1_raw, bn2_raw, bn3_raw)
    return kernel_params, torch_params


# ---------------------------------------------------------------------------
# Pure-JAX reference (NCHW, identical to the PyTorch eval-mode forward)
# ---------------------------------------------------------------------------
def bottleneck_ref(x, torch_params, *, dilation=1, eps=1e-5):
    padding = dilation if dilation > 1 else 1
    w1_t, w2_t, w3_t, bn1, bn2, bn3 = torch_params

    def conv(x, w, pad, dil):
        return lax.conv_general_dilated(
            x, w, window_strides=(1, 1),
            padding=[(pad, pad), (pad, pad)],
            rhs_dilation=(dil, dil),
            dimension_numbers=('NCHW', 'OIHW', 'NCHW'),
            precision=lax.Precision.HIGHEST)

    def bn(x, p):
        gamma, beta, mean, var = p
        inv = gamma / jnp.sqrt(var + eps)
        return x * inv[None, :, None, None] + (beta - mean * inv)[None, :, None, None]

    residual = x
    out = jax.nn.relu(bn(conv(x, w1_t, 0, 1), bn1))
    out = jax.nn.relu(bn(conv(out, w2_t, padding, dilation), bn2))
    out = bn(conv(out, w3_t, 0, 1), bn3)
    return jax.nn.relu(out + residual)


if __name__ == "__main__":
    # Small shapes: batch=2, inplanes=32, planes=8 (expansion 4 -> out=32),
    # spatial 16x16, dilation_=2 (deeplab-style dilated bottleneck).
    N, inplanes, planes, H, W = 2, 32, 8, 16, 16
    dilation = 2

    key = jax.random.PRNGKey(0)
    kx, kp = jax.random.split(key)
    x = jax.random.normal(kx, (N, inplanes, H, W), jnp.float32)

    kernel_params, torch_params = make_params(kp, inplanes, planes)

    run = jax.jit(functools.partial(bottleneck_pallas, dilation=dilation))
    out = run(x, kernel_params)
    out = jax.block_until_ready(out)

    ref = bottleneck_ref(x, torch_params, dilation=dilation)
    np.testing.assert_allclose(np.asarray(out), np.asarray(ref),
                               rtol=3e-2, atol=3e-2)
    print("KERNEL_OK")
</pallas_src>

<mosaic_0001>
module attributes {stable_mosaic.version = 11 : i64} {
  func.func @kernel(%arg0: i32, %arg1: memref<1x256x32xf32, #tpu.memory_space<vmem>>, %arg2: memref<32x128xbf16, #tpu.memory_space<vmem>>, %arg3: memref<1152x128xbf16, #tpu.memory_space<vmem>>, %arg4: memref<128x32xbf16, #tpu.memory_space<vmem>>, %arg5: memref<1x128xf32, #tpu.memory_space<vmem>>, %arg6: memref<1x128xf32, #tpu.memory_space<vmem>>, %arg7: memref<1x32xf32, #tpu.memory_space<vmem>>, %arg8: memref<1x256x32xf32, #tpu.memory_space<vmem>>, %arg9: memref<20x20x128xf32, #tpu.memory_space<vmem>>) attributes {dimension_semantics = [#tpu.dimension_semantics<parallel>], iteration_bounds = array<i64: 2>, scalar_prefetch = 0 : i64, scratch_operands = 1 : i64, tpu.core_type = #tpu.core_type<tc>, window_params = [{transform_indices = @transform_0, window_bounds = array<i64: 1, 256, 32>}, {pipeline_mode = #tpu.pipeline_mode<synchronous>, transform_indices = @transform_1, window_bounds = array<i64: 32, 128>}, {pipeline_mode = #tpu.pipeline_mode<synchronous>, transform_indices = @transform_2, window_bounds = array<i64: 1152, 128>}, {pipeline_mode = #tpu.pipeline_mode<synchronous>, transform_indices = @transform_3, window_bounds = array<i64: 128, 32>}, {pipeline_mode = #tpu.pipeline_mode<synchronous>, transform_indices = @transform_4, window_bounds = array<i64: 1, 128>}, {pipeline_mode = #tpu.pipeline_mode<synchronous>, transform_indices = @transform_5, window_bounds = array<i64: 1, 128>}, {pipeline_mode = #tpu.pipeline_mode<synchronous>, transform_indices = @transform_6, window_bounds = array<i64: 1, 32>}, {transform_indices = @transform_7, window_bounds = array<i64: 1, 256, 32>}]} {
    %c0 = arith.constant 0 : index
    %c0_0 = arith.constant 0 : index
    %c0_1 = arith.constant 0 : index
    %0 = vector.load %arg1[%c0, %c0_0, %c0_1] : memref<1x256x32xf32, #tpu.memory_space<vmem>>, vector<1x256x32xf32>
    %1 = vector.shape_cast %0 : vector<1x256x32xf32> to vector<256x32xf32>
    %2 = arith.truncf %1 : vector<256x32xf32> to vector<256x32xbf16>
    %c0_2 = arith.constant 0 : index
    %c0_3 = arith.constant 0 : index
    %3 = vector.load %arg2[%c0_2, %c0_3] : memref<32x128xbf16, #tpu.memory_space<vmem>>, vector<32x128xbf16>
    %cst = arith.constant dense<0.000000e+00> : vector<256x128xf32>
    %4 = tpu.matmul %2, %3, %cst {dimension_numbers = #tpu.dot_dimension_numbers<[1], [0], [0], [1], [0, 0, 1, 1], [], []>} : vector<256x32xbf16>, vector<32x128xbf16>, vector<256x128xf32> -> vector<256x128xf32>
    %c0_4 = arith.constant 0 : index
    %c0_5 = arith.constant 0 : index
    %5 = vector.load %arg5[%c0_4, %c0_5] : memref<1x128xf32, #tpu.memory_space<vmem>>, vector<1x128xf32>
    %6 = vector.broadcast %5 : vector<1x128xf32> to vector<256x128xf32>
    %7 = arith.addf %4, %6 : vector<256x128xf32>
    %cst_6 = arith.constant 0.000000e+00 : f32
    %8 = vector.broadcast %cst_6 : f32 to vector<256x128xf32>
    %9 = arith.maximumf %7, %8 : vector<256x128xf32>
    %cst_7 = arith.constant 0.000000e+00 : f32
    %10 = vector.broadcast %cst_7 : f32 to vector<2x20x128xf32>
    %c0_8 = arith.constant 0 : index
    %c0_9 = arith.constant 0 : index
    %c0_10 = arith.constant 0 : index
    %11 = vector.load %arg9[%c0_8, %c0_9, %c0_10] : memref<20x20x128xf32, #tpu.memory_space<vmem>>, vector<2x20x128xf32>
    tpu.vector_store %arg9[%c0_8, %c0_9, %c0_10], %10 {strides = array<i32>} : memref<20x20x128xf32, #tpu.memory_space<vmem>>, vector<2x20x128xf32>,
    %c18 = arith.constant 18 : index
    %c0_11 = arith.constant 0 : index
    %c0_12 = arith.constant 0 : index
    %12 = vector.load %arg9[%c18, %c0_11, %c0_12] : memref<20x20x128xf32, #tpu.memory_space<vmem>>, vector<2x20x128xf32>
    tpu.vector_store %arg9[%c18, %c0_11, %c0_12], %10 {strides = array<i32>} : memref<20x20x128xf32, #tpu.memory_space<vmem>>, vector<2x20x128xf32>,
    %cst_13 = arith.constant 0.000000e+00 : f32
    %13 = vector.broadcast %cst_13 : f32 to vector<16x2x128xf32>
    %c2 = arith.constant 2 : index
    %c0_14 = arith.constant 0 : index
    %c0_15 = arith.constant 0 : index
    %14 = vector.load %arg9[%c2, %c0_14, %c0_15] : memref<20x20x128xf32, #tpu.memory_space<vmem>>, vector<16x2x128xf32>
    tpu.vector_store %arg9[%c2, %c0_14, %c0_15], %13 {strides = array<i32>} : memref<20x20x128xf32, #tpu.memory_space<vmem>>, vector<16x2x128xf32>,
    %c2_16 = arith.constant 2 : index
    %c18_17 = arith.constant 18 : index
    %c0_18 = arith.constant 0 : index
    %15 = vector.load %arg9[%c2_16, %c18_17, %c0_18] : memref<20x20x128xf32, #tpu.memory_space<vmem>>, vector<16x2x128xf32>
    tpu.vector_store %arg9[%c2_16, %c18_17, %c0_18], %13 {strides = array<i32>} : memref<20x20x128xf32, #tpu.memory_space<vmem>>, vector<16x2x128xf32>,
    %16 = vector.shape_cast %9 : vector<256x128xf32> to vector<16x16x128xf32>
    %c2_19 = arith.constant 2 : index
    %c2_20 = arith.constant 2 : index
    %c0_21 = arith.constant 0 : index
    %17 = vector.load %arg9[%c2_19, %c2_20, %c0_21] : memref<20x20x128xf32, #tpu.memory_space<vmem>>, vector<16x16x128xf32>
    tpu.vector_store %arg9[%c2_19, %c2_20, %c0_21], %16 {strides = array<i32>} : memref<20x20x128xf32, #tpu.memory_space<vmem>>, vector<16x16x128xf32>,
    %c0_22 = arith.constant 0 : index
    %c0_23 = arith.constant 0 : index
    %c0_24 = arith.constant 0 : index
    %18 = vector.load %arg9[%c0_22, %c0_23, %c0_24] : memref<20x20x128xf32, #tpu.memory_space<vmem>>, vector<16x16x128xf32>
    %19 = arith.truncf %18 : vector<16x16x128xf32> to vector<16x16x128xbf16>
    %c0_25 = arith.constant 0 : index
    %c2_26 = arith.constant 2 : index
    %c0_27 = arith.constant 0 : index
    %20 = vector.load %arg9[%c0_25, %c2_26, %c0_27] : memref<20x20x128xf32, #tpu.memory_space<vmem>>, vector<16x16x128xf32>
    %21 = arith.truncf %20 : vector<16x16x128xf32> to vector<16x16x128xbf16>
    %c0_28 = arith.constant 0 : index
    %c4 = arith.constant 4 : index
    %c0_29 = arith.constant 0 : index
    %22 = vector.load %arg9[%c0_28, %c4, %c0_29] : memref<20x20x128xf32, #tpu.memory_space<vmem>>, vector<16x16x128xf32>
    %23 = arith.truncf %22 : vector<16x16x128xf32> to vector<16x16x128xbf16>
    %c2_30 = arith.constant 2 : index
    %c0_31 = arith.constant 0 : index
    %c0_32 = arith.constant 0 : index
    %24 = vector.load %arg9[%c2_30, %c0_31, %c0_32] : memref<20x20x128xf32, #tpu.memory_space<vmem>>, vector<16x16x128xf32>
    %25 = arith.truncf %24 : vector<16x16x128xf32> to vector<16x16x128xbf16>
    %c2_33 = arith.constant 2 : index
    %c2_34 = arith.constant 2 : index
    %c0_35 = arith.constant 0 : index
    %26 = vector.load %arg9[%c2_33, %c2_34, %c0_35] : memref<20x20x128xf32, #tpu.memory_space<vmem>>, vector<16x16x128xf32>
    %27 = arith.truncf %26 : vector<16x16x128xf32> to vector<16x16x128xbf16>
    %c2_36 = arith.constant 2 : index
    %c4_37 = arith.constant 4 : index
    %c0_38 = arith.constant 0 : index
    %28 = vector.load %arg9[%c2_36, %c4_37, %c0_38] : memref<20x20x128xf32, #tpu.memory_space<vmem>>, vector<16x16x128xf32>
    %29 = arith.truncf %28 : vector<16x16x128xf32> to vector<16x16x128xbf16>
    %c4_39 = arith.constant 4 : index
    %c0_40 = arith.constant 0 : index
    %c0_41 = arith.constant 0 : index
    %30 = vector.load %arg9[%c4_39, %c0_40, %c0_41] : memref<20x20x128xf32, #tpu.memory_space<vmem>>, vector<16x16x128xf32>
    %31 = arith.truncf %30 : vector<16x16x128xf32> to vector<16x16x128xbf16>
    %c4_42 = arith.constant 4 : index
    %c2_43 = arith.constant 2 : index
    %c0_44 = arith.constant 0 : index
    %32 = vector.load %arg9[%c4_42, %c2_43, %c0_44] : memref<20x20x128xf32, #tpu.memory_space<vmem>>, vector<16x16x128xf32>
    %33 = arith.truncf %32 : vector<16x16x128xf32> to vector<16x16x128xbf16>
    %c4_45 = arith.constant 4 : index
    %c4_46 = arith.constant 4 : index
    %c0_47 = arith.constant 0 : index
    %34 = vector.load %arg9[%c4_45, %c4_46, %c0_47] : memref<20x20x128xf32, #tpu.memory_space<vmem>>, vector<16x16x128xf32>
    %35 = arith.truncf %34 : vector<16x16x128xf32> to vector<16x16x128xbf16>
    %36 = tpu.concatenate %19, %21, %23, %25, %27, %29, %31, %33, %35 in 2 : vector<16x16x128xbf16>, vector<16x16x128xbf16>, vector<16x16x128xbf16>, vector<16x16x128xbf16>, vector<16x16x128xbf16>, vector<16x16x128xbf16>, vector<16x16x128xbf16>, vector<16x16x128xbf16>, vector<16x16x128xbf16> -> vector<16x16x1152xbf16>
    %37 = vector.shape_cast %36 : vector<16x16x1152xbf16> to vector<256x1152xbf16>
    %c0_48 = arith.constant 0 : index
    %c0_49 = arith.constant 0 : index
    %38 = vector.load %arg3[%c0_48, %c0_49] : memref<1152x128xbf16, #tpu.memory_space<vmem>>, vector<1152x128xbf16>
    %cst_50 = arith.constant dense<0.000000e+00> : vector<256x128xf32>
    %39 = tpu.matmul %37, %38, %cst_50 {dimension_numbers = #tpu.dot_dimension_numbers<[1], [0], [0], [1], [0, 0, 1, 1], [], []>} : vector<256x1152xbf16>, vector<1152x128xbf16>, vector<256x128xf32> -> vector<256x128xf32>
    %c0_51 = arith.constant 0 : index
    %c0_52 = arith.constant 0 : index
    %40 = vector.load %arg6[%c0_51, %c0_52] : memref<1x128xf32, #tpu.memory_space<vmem>>, vector<1x128xf32>
    %41 = vector.broadcast %40 : vector<1x128xf32> to vector<256x128xf32>
    %42 = arith.addf %39, %41 : vector<256x128xf32>
    %cst_53 = arith.constant 0.000000e+00 : f32
    %43 = vector.broadcast %cst_53 : f32 to vector<256x128xf32>
    %44 = arith.maximumf %42, %43 : vector<256x128xf32>
    %45 = arith.truncf %44 : vector<256x128xf32> to vector<256x128xbf16>
    %c0_54 = arith.constant 0 : index
    %c0_55 = arith.constant 0 : index
    %46 = vector.load %arg4[%c0_54, %c0_55] : memref<128x32xbf16, #tpu.memory_space<vmem>>, vector<128x32xbf16>
    %cst_56 = arith.constant dense<0.000000e+00> : vector<256x32xf32>
    %47 = tpu.matmul %45, %46, %cst_56 {dimension_numbers = #tpu.dot_dimension_numbers<[1], [0], [0], [1], [0, 0, 1, 1], [], []>} : vector<256x128xbf16>, vector<128x32xbf16>, vector<256x32xf32> -> vector<256x32xf32>
    %c0_57 = arith.constant 0 : index
    %c0_58 = arith.constant 0 : index
    %48 = vector.load %arg7[%c0_57, %c0_58] : memref<1x32xf32, #tpu.memory_space<vmem>>, vector<1x32xf32>
    %49 = vector.broadcast %48 : vector<1x32xf32> to vector<256x32xf32>
    %50 = arith.addf %47, %49 : vector<256x32xf32>
    %c0_59 = arith.constant 0 : index
    %c0_60 = arith.constant 0 : index
    %c0_61 = arith.constant 0 : index
    %51 = vector.load %arg1[%c0_59, %c0_60, %c0_61] : memref<1x256x32xf32, #tpu.memory_space<vmem>>, vector<1x256x32xf32>
    %52 = vector.shape_cast %51 : vector<1x256x32xf32> to vector<256x32xf32>
    %53 = arith.addf %50, %52 : vector<256x32xf32>
    %cst_62 = arith.constant 0.000000e+00 : f32
    %54 = vector.broadcast %cst_62 : f32 to vector<256x32xf32>
    %55 = arith.maximumf %53, %54 : vector<256x32xf32>
    %c0_63 = arith.constant 0 : index
    %c0_64 = arith.constant 0 : index
    %c0_65 = arith.constant 0 : index
    %56 = vector.load %arg8[%c0_63, %c0_64, %c0_65] : memref<1x256x32xf32, #tpu.memory_space<vmem>>, vector<1x256x32xf32>
    %57 = vector.shape_cast %56 : vector<1x256x32xf32> to vector<256x32xf32>
    %58 = vector.shape_cast %55 : vector<256x32xf32> to vector<1x256x32xf32>
    tpu.vector_store %arg8[%c0_63, %c0_64, %c0_65], %58 {strides = array<i32>} : memref<1x256x32xf32, #tpu.memory_space<vmem>>, vector<1x256x32xf32>,
    return
  }
  func.func @transform_0(%arg0: i32) -> (i32, i32, i32) {
    %c0_i32 = arith.constant 0 : i32
    %c0_i32_0 = arith.constant 0 : i32
    %c0_i32_1 = arith.constant 0 : i32
    return %arg0, %c0_i32, %c0_i32_0 : i32, i32, i32
  }
  func.func @transform_1(%arg0: i32) -> (i32, i32) {
    %c0_i32 = arith.constant 0 : i32
    %c0_i32_0 = arith.constant 0 : i32
    %c0_i32_1 = arith.constant 0 : i32
    return %c0_i32, %c0_i32_0 : i32, i32
  }
  func.func @transform_2(%arg0: i32) -> (i32, i32) {
    %c0_i32 = arith.constant 0 : i32
    %c0_i32_0 = arith.constant 0 : i32
    %c0_i32_1 = arith.constant 0 : i32
    return %c0_i32, %c0_i32_0 : i32, i32
  }
  func.func @transform_3(%arg0: i32) -> (i32, i32) {
    %c0_i32 = arith.constant 0 : i32
    %c0_i32_0 = arith.constant 0 : i32
    %c0_i32_1 = arith.constant 0 : i32
    return %c0_i32, %c0_i32_0 : i32, i32
  }
  func.func @transform_4(%arg0: i32) -> (i32, i32) {
    %c0_i32 = arith.constant 0 : i32
    %c0_i32_0 = arith.constant 0 : i32
    %c0_i32_1 = arith.constant 0 : i32
    return %c0_i32, %c0_i32_0 : i32, i32
  }
  func.func @transform_5(%arg0: i32) -> (i32, i32) {
    %c0_i32 = arith.constant 0 : i32
    %c0_i32_0 = arith.constant 0 : i32
    %c0_i32_1 = arith.constant 0 : i32
    return %c0_i32, %c0_i32_0 : i32, i32
  }
  func.func @transform_6(%arg0: i32) -> (i32, i32) {
    %c0_i32 = arith.constant 0 : i32
    %c0_i32_0 = arith.constant 0 : i32
    %c0_i32_1 = arith.constant 0 : i32
    return %c0_i32, %c0_i32_0 : i32, i32
  }
  func.func @transform_7(%arg0: i32) -> (i32, i32, i32) {
    %c0_i32 = arith.constant 0 : i32
    %c0_i32_0 = arith.constant 0 : i32
    %c0_i32_1 = arith.constant 0 : i32
    return %arg0, %c0_i32, %c0_i32_0 : i32, i32, i32
  }
}

</mosaic_0001>

<bundles_post_ra>
// kernel: bottleneck_pallas.1
= control target key start
LH: loop header
LB: loop body
LE: loop exit
PB: predicated region body
PF: predicated region fallthrough
CT: control target
= control target key end

     0   :  { %s5938_s0 = inlined_call_operand.hbm [shape: f32[2,256,32], index: 0, kind: input, shape index: {}]   ;;  %s5939_s1 = inlined_call_operand.vmem [shape: bf16[32,128], index: 1, kind: input, shape index: {}]   ;;  %s5940_s2 = inlined_call_operand.hbm [shape: bf16[1152,128], index: 2, kind: input, shape index: {}]   ;;  %s5941_s3 = inlined_call_operand.vmem [shape: bf16[128,32], index: 3, kind: input, shape index: {}]   ;;  %s5942_s4 = inlined_call_operand.vmem [shape: f32[1,128], index: 4, kind: input, shape index: {}]   ;;  %s5943_s5 = inlined_call_operand.vmem [shape: f32[1,128], index: 5, kind: input, shape index: {}]   ;;  %s5944_s6 = inlined_call_operand.vmem [shape: f32[1,32], index: 6, kind: input, shape index: {}]   ;;  %s5945_s7 = inlined_call_operand.hbm [shape: f32[2,256,32], index: 7, kind: output, shape index: {}]  }
   0x1   :  { %5946 = sst [smem:[#allocation97_spill]] %s5940_s2 }
   0x2   :  { %12 = vsyncpa [#allocation4], 0 }
   0x3   :  { %14 = vsyncpa [#allocation4 + $0x1], 0 }
   0x4   :  { %15 = vsyncpa [#allocation7], 0 }
   0x5   :  { %16 = vsyncpa [#allocation5], 0 }
   0x6   :  { %18 = vsyncpa [#allocation5 + $0x1], 0  ;;  %s4601_s24 = smov 0   ;;  %s4603_s25 = smov 0  }
   0x7   :  { %s4605_s26 = smov 0   ;;  %s4607_s27 = smov 0  }
   0x8 LB: > { %s4622_s28 = sadd.s32 4294967295, %s4550_s27   ;;  %s3887_s29 = sadd.s32 4294967294, %s4550_s27   ;;  %s4550_s27 = sphi %s4607_s27, %s6146_s27   ;;  %s4546_s26 = sphi %s4605_s26, %s6145_s26   ;;  %s4542_s25 = sphi %s4603_s25, %s6144_s25   ;;  %s4538_s24 = sphi %s4601_s24, %s6143_s24  }
   0x9   : > { %p44_p0 = scmp.ne.s32.totalorder %s4542_s25, %s4538_s24  ;;  %p45_p1 = scmp.eq.s32.totalorder %s4622_s28, 0 }
   0xa   : > { %p194_p2 = scmp.eq.s32.totalorder %s4622_s28, 1  ;;  %p200_p3 = scmp.eq.s32.totalorder %s3887_s29, 1 }
   0xb   : > { %p4631_p4 = por %p45_p1, %p44_p0  ;;  %p3888_p5 = scmp.ge.s32.totalorder %s4550_s27, 1 }
   0xc   : > { %p4636_p6 = por %p200_p3, %p44_p0  ;;  %p207_p7 = scmp.lt.s32.totalorder %s4550_s27, 3 }
   0xd   : > { %s5949_s2 = sld [smem:[#allocation97_spill]]  ;;  %s4552_s13 = smov [#allocation6]  }
   0xe   : > { %p4644_p8 = pnand %p3888_p5, %p207_p7  ;;  %s223_s14 = sshll.u32 %s4552_s13, 4  ;;  %s224_s14 = int_to_ptr.vmem [resolvable:$true] %s223_s14 }
   0xf   : > { %s4654_s15 = sadd.s32 1, %s4550_s27   ;;  %s4553_s16 = smov 64  }
  0x10   : > { %p4357_p9 = pneg %p4644_p8  ;;  %s4554_s17 = smov 4  }
  0x11   : > { %s28_s18 = ssub.s32 %s4550_s27, %s4654_s15  ;;  %s31_s19 = sadd.s32 1, %s4546_s26 }
  0x12   : > { %p4358_p10 = pnand %p4357_p9, %p45_p1  ;;  %p29_p12 = scmp.eq.s32.totalorder %s28_s18, 0 }
  0x13   : > { %s221_s11 = sshll.u32 %s5949_s2, 4  ;;  %p38_p13 = scmp.ne.s32.totalorder %s4546_s26, %s4542_s25  ;;  %s222_s11 = int_to_ptr.hbm [resolvable:$true] %s221_s11 }
  0x14   : > { %4360 = dma.hbm_to_vmem [thread:$0]  (!%p4358_p10), %s222_s11, 9216, %s224_s14, [#allocation7], %s4553_s16, %s4553_s16, %s4554_s17  }
  0x15   : > { %p39_p0 = scmp.eq.s32.totalorder %s4550_s27, 0  ;;  %p4370_p3 = scmp.lt.s32.totalorder %s4550_s27, 2 }
  0x16   : > { %s4664_s20 = scalar_select %p29_p12, %s4546_s26, %s31_s19  }
  0x17   : > { %p40_p5 = por %p39_p0, %p38_p13  ;;  %p4668_p7 = por %p194_p2, %p38_p13 }
  0x18   : > { %s249_s22 = sand.u32 1, %s4546_s26   ;;  %s4247_s23 = sshll.u32 %s4550_s27, 8 }
  0x19   : > { %s3891_s29 = sshll.u32 %s249_s22, 8  ;;  %s258_s11 = scalar_lea.hbm %s5938_s0, %s4247_s23 }
  0x1a   : > { %s259_s13 = sshll.u32 %s258_s11, 4  ;;  %s253_s14 = scalar_lea.vmem [#allocation3], %s3891_s29  ;;  %s260_s13 = int_to_ptr.hbm [resolvable:$true] %s259_s13 }
  0x1b   : > { %s261_s16 = sshll.u32 %s253_s14, 4  ;;  %p4679_p9 = pnand %p4370_p3, %p40_p5  ;;  %s262_s16 = int_to_ptr.vmem [resolvable:$true] %s261_s16 }
  0x1c   : > { %s250_s18 = scalar_lea.sflag [#allocation4], %s249_s22  ;;  %s4450_s19 = sshra.s32 %s260_s13, 4  ;;  %s4451_s19 = int_to_ptr.hbm [resolvable:$true] %s4450_s19 }
  0x1d   : > { %s4452_s2 = scalar_lea.hbm %s4451_s19, 256  ;;  %p4454_p10 = pneg %p4679_p9 }
  0x1e   : > { %p4453_p2 = scmp.ne.s32.totalorder %s4451_s19, %s4452_s2  ;;  %s4457_s9 = scalar_lea.hbm %s5938_s0, 512 }
  0x1f   : > { %p4458_p0 = scmp.lt.s32.totalorder %s4451_s19, %s5938_s0  ;;  %p4459_p3 = scmp.lt.s32.totalorder %s4457_s9, %s4452_s2 }
  0x20   : > { %p4455_p12 = pnand %p4454_p10, %p4453_p2 }
  0x21   : > { %p4460_p5 = por %p4459_p3, %p4458_p0 }
  0x22   : > { %p4456_p13 = pneg %p4455_p12 }
  0x24   : > { %p4461_p11 = pnand %p4460_p5, %p4456_p13 }
  0x26   : > { %4464 = shalt.err (!%p4461_p11)
}
  0x27   : > { %s4555_s22 = smov 128   ;;  %s4556_s14 = smov 8  }
  0x28   : > { %4364 = dma.hbm_to_vmem [thread:$0]  (!%p4679_p9), %s260_s13, 4096, %s262_s16, %s250_s18, %s4555_s22, %s4555_s22, %s4556_s14  }
  0x29   : > { %273 = sbr.rel (%p4644_p8) target bundleno = 1296 (0x510), region = 48 }
  0x2e   : > { %s4696_s23 = sand.u32 1, %s4542_s25  }
  0x2f   : > { %s3895_s19 = sshll.u32 %s4696_s23, 8  ;;  %s276_s2 = scalar_lea.sflag [#allocation4], %s4696_s23 }
  0x30   : > { %s4702_s29 = scalar_lea.vmem [#allocation3], %s3895_s19 }
  0x31   : > { %4525 = dma.done.wait (%p4631_p4), %s276_s2, 4096  }
  0x32   : > { %4527 = vsyncadd (%p4631_p4), %s276_s2, 4294963200 }
  0x33   : > { %4529 = dma.done.wait (%p45_p1), [#allocation7], 9216  }
  0x34   : > { %4531 = vsyncadd (%p45_p1), [#allocation7], 4294958080  ;;  %v4249_v0 = vld [vmem:[%s5939_s1 + $0x8] sm:$0xff]  ;;  %v4248_v1 = vld [vmem:[%s5939_s1] sm:$0xff]  ;;  %vm385_vm0 = vcmask 261120   ;;  %v4557_v27 = vmov 0.0  }
  0x35   : > { %440 = vmatpush.bf16.msra.mxu0 %v4249_v0  ;;  %v317_v2 = vld [vmem:[%s4702_s29] sm:$0xff]  ;;  %v318_v3 = vld [vmem:[%s4702_s29 + $0x8] sm:$0xff]  ;;  %4331 = vmatpush.bf16.msra.mxu3 %v4249_v0  ;;  %v319_v5 = vld [vmem:[%s4702_s29 + $0x10] sm:$0xff]  ;;  %555 = vst [vmem:[#allocation2] sm:$0xff] %v4557_v27  ;;  %v4558_v44 = vmov 0.0|0.0   ;;  %s5730_s11 = scalar_lea.vmem [#allocation8], %s3895_s19 }
  0x36   : > { %v349_v4 = vpack.c.bf16 %v318_v3, %v317_v2  ;;  %v320_v6 = vld [vmem:[%s4702_s29 + $0x18] sm:$0xff]  ;;  %v321_v8 = vld [vmem:[%s4702_s29 + $0x20] sm:$0xff]  ;;  %v322_v9 = vld [vmem:[%s4702_s29 + $0x28] sm:$0xff]  ;;  %556 = vst [vmem:[#allocation2 + $0x8] sm:$0xff] %v4557_v27  ;;  %v1242_v45 = vunpack.c.l.b16 %v4558_v44  ;;  %s4330_s19 = sshll.u32 %s4622_s28, 8  ;;  %s3801_s12 = sshll.u32 %s5730_s11, 4  ;;  %s3802_s12 = int_to_ptr.vmem [resolvable:$true] %s3801_s12 }
  0x37   : > { %v350_v7 = vpack.c.bf16 %v320_v6, %v319_v5  ;;  %v351_v10 = vpack.c.bf16 %v322_v9, %v321_v8  ;;  %v323_v11 = vld [vmem:[%s4702_s29 + $0x30] sm:$0xff]  ;;  %v324_v12 = vld [vmem:[%s4702_s29 + $0x38] sm:$0xff]  ;;  %v4736_v18 = vld [vmem:[#allocation6 + $0x68] sm:$0xff]  ;;  %557 = vst [vmem:[#allocation2 + $0x10] sm:$0xf] %v4557_v27  ;;  %s3800_s2 = scalar_lea.hbm %s5945_s7, %s4330_s19  ;;  %s3789_s28 = scalar_lea.sflag [#allocation5], %s4696_s23 }
  0x38   : > { %v352_v13 = vpack.c.bf16 %v324_v12, %v323_v11  ;;  %v4729_v14 = vld [vmem:[#allocation6 + $0x78] sm:$0xff]  ;;  %v4733_v16 = vld [vmem:[#allocation6 + $0x70] sm:$0xff]  ;;  %v325_v19 = vld [vmem:[%s4702_s29 + $0x40] sm:$0xff]  ;;  %558 = vst [vmem:[#allocation2 + $0x18] sm:$0xff] %v4557_v27  ;;  %v1274_v46 = vpack.c.b16 %v1242_v45, %v1242_v45  ;;  %s3803_s13 = sshll.u32 %s3800_s2, 4  ;;  %s4500_s18 = scalar_lea.hbm %s5945_s7, 512  ;;  %s3804_s13 = int_to_ptr.hbm [resolvable:$true] %s3803_s13 }
  0x39   : > { %441 = vmatpush.bf16.msra.mxu0 %v4248_v1  ;;  %4332 = vmatpush.bf16.msra.mxu3 %v4248_v1  ;;  %v4257_v15 = vld [vmem:[#allocation6 + $0x38] sm:$0xff]  ;;  %v4256_v17 = vld [vmem:[#allocation6 + $0x30] sm:$0xff]  ;;  %v326_v20 = vld [vmem:[%s4702_s29 + $0x48] sm:$0xff]  ;;  %559 = vst [vmem:[#allocation2 + $0x20] sm:$0xff] %v4557_v27  ;;  %s4494_s16 = sshra.s32 %s3804_s13, 4  ;;  %s4495_s16 = int_to_ptr.hbm [resolvable:$true] %s4494_s16 }
  0x3a   : > { %2743 = vmatpush.bf16.msra.mxu2 %v4729_v14  ;;  %2654 = vmatpush.bf16.msra.mxu1 %v4257_v15  ;;  %v4741_v21 = vld [vmem:[#allocation6 + $0x60] sm:$0xff]  ;;  %v353_v22 = vpack.c.bf16 %v326_v20, %v325_v19  ;;  %v4255_v23 = vld [vmem:[#allocation6 + $0x28] sm:$0xff]  ;;  %v4744_v24 = vld [vmem:[#allocation6 + $0x58] sm:$0xff]  ;;  %560 = vst [vmem:[#allocation2 + $0x28] sm:$0xf] %v4557_v27  ;;  %s4496_s17 = scalar_lea.hbm %s4495_s16, 256  ;;  %p4501_p11 = scmp.lt.s32.totalorder %s4495_s16, %s5945_s7 }
  0x3b   : > { %v4254_v25 = vld [vmem:[#allocation6 + $0x20] sm:$0xff]  ;;  %v4748_v26 = vld [vmem:[#allocation6 + $0x50] sm:$0xff]  ;;  %v4253_v28 = vld [vmem:[#allocation6 + $0x18] sm:$0xff]  ;;  %562 = vst [vmem:[#allocation2 + $0x1b0] sm:$0xff] %v4557_v27  ;;  %p4497_p1 = scmp.ne.s32.totalorder %s4495_s16, %s4496_s17  ;;  %p4502_p9 = scmp.lt.s32.totalorder %s4500_s18, %s4496_s17 }
  0x3c   : > { %3906 = vmatmul.msk.bf16.vlgmr.msra.gmra.mxu0 %vm385_vm0, %v349_v4  ;;  %v4756_v29 = vld [vmem:[#allocation6 + $0x48] sm:$0xff]  ;;  %v327_v30 = vld [vmem:[%s4702_s29 + $0x50] sm:$0xff]  ;;  %v328_v31 = vld [vmem:[%s4702_s29 + $0x58] sm:$0xff]  ;;  %563 = vst [vmem:[#allocation2 + $0x1b8] sm:$0xff] %v4557_v27 }
  0x3d   : > { %4333 = vmatpush.bf16.msrb.mxu3 %v4257_v15  ;;  %v4252_v32 = vld [vmem:[#allocation6 + $0x10] sm:$0xff]  ;;  %564 = vst [vmem:[#allocation2 + $0x1c0] sm:$0xf] %v4557_v27  ;;  %v697_v33 = vld [vmem:[#allocation2 + $0x2] sm:$0xff]  ;;  %v354_v37 = vpack.c.bf16 %v328_v31, %v327_v30  ;;  %v332_v58 = vld [vmem:[%s4702_s29 + $0x78] sm:$0xff]  ;;  %p4498_p4 = pnand %p4497_p1, %p4668_p7  ;;  %p4503_p2 = por %p4502_p9, %p4501_p11 }
  0x3e   : > { %2744 = vmatpush.bf16.msra.mxu2 %v4733_v16  ;;  %2655 = vmatpush.bf16.msra.mxu1 %v4256_v17  ;;  %v4765_v34 = vld [vmem:[#allocation6 + $0x40] sm:$0xff]  ;;  %565 = vst [vmem:[#allocation2 + $0x1c8] sm:$0xff] %v4557_v27  ;;  %v698_v35 = vld [vmem:[#allocation2 + $0xa] sm:$0xff]  ;;  %v729_v36 = vpack.c.bf16 %v697_v33, %v697_v33  ;;  %v336_v8 = vld [vmem:[%s4702_s29 + $0x98] sm:$0xff] }
  0x3f   : > { %566 = vst [vmem:[#allocation2 + $0x1d0] sm:$0xff] %v4557_v27  ;;  %v730_v38 = vpack.c.bf16 %v698_v35, %v698_v35  ;;  %v4251_v41 = vld [vmem:[#allocation6 + $0x8] sm:$0xff]  ;;  %v4250_v43 = vld [vmem:[#allocation6] sm:$0xff]  ;;  %v331_v57 = vld [vmem:[%s4702_s29 + $0x70] sm:$0xff]  ;;  %p4499_p8 = pneg %p4498_p4 }
  0x40   : > { %567 = vst [vmem:[#allocation2 + $0x1d8] sm:$0xf] %v4557_v27  ;;  %v1338_v39 = vunpack.c.l.b16 %v729_v36  ;;  %v329_v47 = vld [vmem:[%s4702_s29 + $0x60] sm:$0xff]  ;;  %v330_v48 = vld [vmem:[%s4702_s29 + $0x68] sm:$0xff]  ;;  %v356_v59 = vpack.c.bf16 %v332_v58, %v331_v57  ;;  %v4281_v20 = vld [vmem:[#allocation6 + $0xf8] sm:$0xff] }
  0x41   : > { %4334 = vmatpush.bf16.msrb.mxu3 %v4256_v17  ;;  %569 = vst [vmem:[#allocation2 + $0x30] sm:$0x3] %v4557_v27  ;;  %v1339_v40 = vunpack.c.l.b16 %v730_v38  ;;  %v699_v49 = vld [vmem:[#allocation2 + $0x1a] sm:$0xff]  ;;  %v700_v50 = vld [vmem:[#allocation2 + $0x22] sm:$0xff]  ;;  %v355_v53 = vpack.c.bf16 %v330_v48, %v329_v47  ;;  %2921 = vmatpush.bf16.msrb.mxu0 %v4281_v20  ;;  %v4276_v58 = vld [vmem:[#allocation6 + $0xd0] sm:$0xff]  ;;  %p4504_p10 = pnand %p4503_p2, %p4499_p8 }
  0x42   : > { %2745 = vmatpush.bf16.msra.mxu2 %v4736_v18  ;;  %2656 = vmatpush.bf16.msra.mxu1 %v4255_v23  ;;  %570 = vst [vmem:[#allocation2 + $0x48] sm:$0x3] %v4557_v27  ;;  %v731_v51 = vpack.c.bf16 %v699_v49, %v699_v49  ;;  %v732_v52 = vpack.c.bf16 %v700_v50, %v700_v50  ;;  %v333_v60 = vld [vmem:[%s4702_s29 + $0x80] sm:$0xff]  ;;  %v334_v61 = vld [vmem:[%s4702_s29 + $0x88] sm:$0xff]  ;;  %v4277_v50 = vld [vmem:[#allocation6 + $0xd8] sm:$0xff] }
  0x43   : > { %571 = vst [vmem:[#allocation2 + $0x60] sm:$0x3] %v4557_v27  ;;  %v1370_v42 = vpack.c.b16 %v1339_v40, %v1338_v39  ;;  %v4815_v62 = vld [vmem:[%s5942_s4] ss:$0 sm:$0xff]  ;;  %v357_v63 = vpack.c.bf16 %v334_v61, %v333_v60  ;;  %v4279_v36 = vld [vmem:[#allocation6 + $0xe8] sm:$0xff] }
  0x44   : > { %572 = vst [vmem:[#allocation2 + $0x78] sm:$0x3] %v4557_v27  ;;  %v1340_v54 = vunpack.c.l.b16 %v731_v51  ;;  %v1341_v55 = vunpack.c.l.b16 %v732_v52  ;;  %v337_v39 = vld [vmem:[%s4702_s29 + $0xa0] sm:$0xff]  ;;  %v338_v40 = vld [vmem:[%s4702_s29 + $0xa8] sm:$0xff]  ;;  %v343_v51 = vld [vmem:[%s4702_s29 + $0xd0] sm:$0xff] }
  0x45   : > { %4335 = vmatpush.bf16.msrb.mxu3 %v4255_v23  ;;  %573 = vst [vmem:[#allocation2 + $0x90] sm:$0x3] %v4557_v27  ;;  %v344_v52 = vld [vmem:[%s4702_s29 + $0xd8] sm:$0xff] }
  0x46   : > { %2746 = vmatpush.bf16.msra.mxu2 %v4741_v21  ;;  %2657 = vmatpush.bf16.msra.mxu1 %v4254_v25  ;;  %574 = vst [vmem:[#allocation2 + $0xa8] sm:$0x3] %v4557_v27  ;;  %v1371_v56 = vpack.c.b16 %v1341_v55, %v1340_v54  ;;  %v362_v55 = vpack.c.bf16 %v344_v52, %v343_v51 }
  0x47   : > { %575 = vst [vmem:[#allocation2 + $0xc0] sm:$0x3] %v4557_v27 }
  0x48   : > { %576 = vst [vmem:[#allocation2 + $0xd8] sm:$0x3] %v4557_v27  ;;  %3919 = vmatmul.msk.bf16.vlgmr.msra.gmra.mxu3 %vm385_vm0, %v362_v55 }
  0x49   : > { %4336 = vmatpush.bf16.msrb.mxu3 %v4254_v25  ;;  %577 = vst [vmem:[#allocation2 + $0xf0] sm:$0x3] %v4557_v27 }
  0x4a   : > { %2747 = vmatpush.bf16.msra.mxu2 %v4744_v24  ;;  %2658 = vmatpush.bf16.msra.mxu1 %v4253_v28  ;;  %578 = vst [vmem:[#allocation2 + $0x108] sm:$0x3] %v4557_v27 }
  0x4b   : > { %579 = vst [vmem:[#allocation2 + $0x120] sm:$0x3] %v4557_v27 }
  0x4c   : > { %3907 = vmatmul.msk.bf16.gmra.mxu0 %vm385_vm0, %v350_v7  ;;  %580 = vst [vmem:[#allocation2 + $0x138] sm:$0x3] %v4557_v27  ;;  %v335_v7 = vld [vmem:[%s4702_s29 + $0x90] sm:$0xff] }
  0x4d   : > { %4337 = vmatpush.bf16.msrb.mxu3 %v4253_v28  ;;  %581 = vst [vmem:[#allocation2 + $0x150] sm:$0x3] %v4557_v27  ;;  %v4280_v28 = vld [vmem:[#allocation6 + $0xf0] sm:$0xff] }
  0x4e   : > { %2748 = vmatpush.bf16.msra.mxu2 %v4748_v26  ;;  %2659 = vmatpush.bf16.msra.mxu1 %v4252_v32  ;;  %582 = vst [vmem:[#allocation2 + $0x168] sm:$0x3] %v4557_v27 }
  0x4f   : > { %583 = vst [vmem:[#allocation2 + $0x180] sm:$0x3] %v4557_v27  ;;  %2922 = vmatpush.bf16.msrb.mxu0 %v4280_v28 }
  0x50   : > { %584 = vst [vmem:[#allocation2 + $0x198] sm:$0x3] %v4557_v27 }
  0x51   : > { %4338 = vmatpush.bf16.msrb.mxu3 %v4252_v32  ;;  %585 = vst [vmem:[#allocation2 + $0x42] sm:$0x3] %v4557_v27 }
  0x52   : > { %2749 = vmatpush.bf16.msra.mxu2 %v4756_v29  ;;  %2660 = vmatpush.bf16.msra.mxu1 %v4251_v41  ;;  %586 = vst [vmem:[#allocation2 + $0x5a] sm:$0x3] %v4557_v27 }
  0x53   : > { %587 = vst [vmem:[#allocation2 + $0x72] sm:$0x3] %v4557_v27  ;;  %2923 = vmatpush.bf16.msrb.mxu0 %v4279_v36 }
  0x54   : > { %588 = vst [vmem:[#allocation2 + $0x8a] sm:$0x3] %v4557_v27 }
  0x55   : > { %4339 = vmatpush.bf16.msrb.mxu3 %v4251_v41  ;;  %589 = vst [vmem:[#allocation2 + $0xa2] sm:$0x3] %v4557_v27 }
  0x56   : > { %2750 = vmatpush.bf16.msra.mxu2 %v4765_v34  ;;  %2661 = vmatpush.bf16.msra.mxu1 %v4250_v43  ;;  %590 = vst [vmem:[#allocation2 + $0xba] sm:$0x3] %v4557_v27 }
  0x57   : > { %591 = vst [vmem:[#allocation2 + $0xd2] sm:$0x3] %v4557_v27 }
  0x58   : > { %592 = vst [vmem:[#allocation2 + $0xea] sm:$0x3] %v4557_v27 }
  0x59   : > { %2751 = vmatmul.bf16.vlgmr.msra.gmra.mxu2 %v1370_v42  ;;  %4340 = vmatpush.bf16.msrb.mxu3 %v4250_v43  ;;  %593 = vst [vmem:[#allocation2 + $0x102] sm:$0x3] %v4557_v27  ;;  %v4278_v42 = vld [vmem:[#allocation6 + $0xe0] sm:$0xff]  ;;  %v359_v43 = vpack.c.bf16 %v338_v40, %v337_v39 }
  0x5a   : > { %2662 = vmatmul.bf16.vlgmr.msra.gmra.mxu1 %v1274_v46  ;;  %594 = vst [vmem:[#allocation2 + $0x11a] sm:$0x3] %v4557_v27  ;;  %2924 = vmatpush.bf16.msrb.mxu0 %v4278_v42 }
  0x5b   : > { %595 = vst [vmem:[#allocation2 + $0x132] sm:$0x3] %v4557_v27 }
  0x5c   : > { %3908 = vmatmul.msk.bf16.gmra.mxu0 %vm385_vm0, %v351_v10  ;;  %596 = vst [vmem:[#allocation2 + $0x14a] sm:$0x3] %v4557_v27  ;;  %v358_v10 = vpack.c.bf16 %v336_v8, %v335_v7 }
  0x5d   : > { %597 = vst [vmem:[#allocation2 + $0x162] sm:$0x3] %v4557_v27  ;;  %4341 = vmatpush.bf16.msra.mxu3 %v4729_v14 }
  0x5e   : > { %598 = vst [vmem:[#allocation2 + $0x17a] sm:$0x3] %v4557_v27  ;;  %2925 = vmatpush.bf16.msrb.mxu0 %v4277_v50 }
  0x5f   : > { %599 = vst [vmem:[#allocation2 + $0x192] sm:$0x3] %v4557_v27 }
  0x60   : > { %600 = vst [vmem:[#allocation2 + $0x1aa] sm:$0x3] %v4557_v27 }
  0x61   : > { %4342 = vmatpush.bf16.msra.mxu3 %v4733_v16 }
  0x62   : > { %2926 = vmatpush.bf16.msrb.mxu0 %v4276_v58 }
  0x65   : > { %4343 = vmatpush.bf16.msra.mxu3 %v4736_v18 }
  0x69   : > { %2756 = vmatmul.bf16.gmra.mxu2 %v1371_v56  ;;  %4344 = vmatpush.bf16.msra.mxu3 %v4741_v21 }
  0x6a   : > { %2667 = vmatmul.bf16.gmra.mxu1 %v1274_v46 }
  0x6c   : > { %3909 = vmatmul.msk.bf16.gmra.mxu0 %vm385_vm0, %v352_v13 }
  0x6d   : > { %4345 = vmatpush.bf16.msra.mxu3 %v4744_v24 }
  0x71   : > { %4346 = vmatpush.bf16.msra.mxu3 %v4748_v26 }
  0x75   : > { %4347 = vmatpush.bf16.msra.mxu3 %v4756_v29 }
  0x79   : > { %4348 = vmatpush.bf16.msra.mxu3 %v4765_v34 }
  0x7c   : > { %3910 = vmatmul.msk.bf16.gmra.mxu0 %vm385_vm0, %v353_v22 }
  0x8c   : > { %3911 = vmatmul.msk.bf16.gmra.mxu0 %vm385_vm0, %v354_v37 }
  0x9c   : > { %3912 = vmatmul.msk.bf16.gmra.mxu0 %vm385_vm0, %v355_v53 }
  0xac   : > { %3913 = vmatmul.msk.bf16.gmra.mxu0 %vm385_vm0, %v356_v59 }
  0xb9   : > { %v443_v0 = vpop.f32.mrf.mxu0 }
  0xba   : > { %v444_v1 = vadd.f32 %v4815_v62, %v443_v0 }
  0xbc   : > { %v523_v2 = vmax.f32 %v444_v1, 0.0  ;;  %3914 = vmatmul.msk.bf16.gmra.mxu0 %vm385_vm0, %v357_v63  ;;  %v4275_v1 = vld [vmem:[#allocation6 + $0xc8] sm:$0xff] }
  0xbd   : > { %2927 = vmatpush.bf16.msrb.mxu0 %v4275_v1 }
  0xbe   : > { %601 = vst [vmem:[#allocation2 + $0x32] sm:$0xff] %v523_v2  ;;  %v733_v6 = vpack.c.bf16 %v523_v2, %v523_v2 }
  0xc0   : > { %v1342_v11 = vunpack.c.l.b16 %v733_v6  ;;  %v4274_v6 = vld [vmem:[#allocation6 + $0xc0] sm:$0xff] }
  0xc1   : > { %v445_v3 = vpop.f32.mrf.mxu0  ;;  %2928 = vmatpush.bf16.msrb.mxu0 %v4274_v6  ;;  %v4875_v6 = vld [vmem:[%s5943_s5] ss:$0 sm:$0xff] }
  0xc2   : > { %v446_v4 = vadd.f32 %v4815_v62, %v445_v3 }
  0xc4   : > { %v524_v5 = vmax.f32 %v446_v4, 0.0  ;;  %v339_v4 = vld [vmem:[%s4702_s29 + $0xb0] sm:$0xff] }
  0xc5   : > { %v637_v15 = vld [vmem:[#allocation2 + $0x30] sm:$0xff] }
  0xc6   : > { %602 = vst [vmem:[#allocation2 + $0x3a] sm:$0xff] %v524_v5  ;;  %v734_v9 = vpack.c.bf16 %v524_v5, %v524_v5  ;;  %v669_v23 = vpack.c.bf16 %v637_v15, %v637_v15  ;;  %v340_v5 = vld [vmem:[%s4702_s29 + $0xb8] sm:$0xff] }
  0xc7   : > { %v360_v7 = vpack.c.bf16 %v340_v5, %v339_v4 }
  0xc8   : > { %v1343_v12 = vunpack.c.l.b16 %v734_v9  ;;  %v1246_v30 = vunpack.c.l.b16 %v669_v23 }
  0xc9   : > { %v448_v13 = vpop.f32.mrf.mxu0 }
  0xca   : > { %v449_v17 = vadd.f32 %v4815_v62, %v448_v13  ;;  %v4823_v19 = vpack.c.b16 %v1343_v12, %v1342_v11 }
  0xcc   : > { %v525_v22 = vmax.f32 %v449_v17, 0.0  ;;  %3915 = vmatmul.msk.bf16.gmra.mxu0 %vm385_vm0, %v358_v10  ;;  %2761 = vmatmul.bf16.gmra.mxu2 %v4823_v19 }
  0xcd   : > { %v638_v25 = vld [vmem:[#allocation2 + $0x38] sm:$0xff] }
  0xce   : > { %603 = vst [vmem:[#allocation2 + $0x4a] sm:$0xff] %v525_v22  ;;  %v670_v27 = vpack.c.bf16 %v638_v25, %v638_v25  ;;  %v735_v38 = vpack.c.bf16 %v525_v22, %v525_v22 }
  0xd0   : > { %v1247_v31 = vunpack.c.l.b16 %v670_v27  ;;  %v1344_v44 = vunpack.c.l.b16 %v735_v38 }
  0xd1   : > { %v450_v32 = vpop.f32.mrf.mxu0 }
  0xd2   : > { %v451_v33 = vadd.f32 %v4815_v62, %v450_v32  ;;  %v4828_v35 = vpack.c.b16 %v1247_v31, %v1246_v30  ;;  %v341_v30 = vld [vmem:[%s4702_s29 + $0xc0] sm:$0xff]  ;;  %v342_v31 = vld [vmem:[%s4702_s29 + $0xc8] sm:$0xff] }
  0xd3   : > { %v361_v24 = vpack.c.bf16 %v342_v31, %v341_v30 }
  0xd4   : > { %v526_v37 = vmax.f32 %v451_v33, 0.0  ;;  %2672 = vmatmul.bf16.gmra.mxu1 %v4828_v35 }
  0xd5   : > { %v639_v47 = vld [vmem:[#allocation2 + $0x48] sm:$0xff] }
  0xd6   : > { %604 = vst [vmem:[#allocation2 + $0x52] sm:$0xff] %v526_v37  ;;  %v736_v41 = vpack.c.bf16 %v526_v37, %v526_v37  ;;  %v671_v54 = vpack.c.bf16 %v639_v47, %v639_v47 }
  0xd7   : > { %v2663_v1 = vpop.f32.mrf.mxu1 }
  0xd8   : > { %v1345_v45 = vunpack.c.l.b16 %v736_v41  ;;  %v1248_v59 = vunpack.c.l.b16 %v671_v54 }
  0xd9   : > { %v453_v46 = vpop.f32.mrf.mxu0 }
  0xda   : > { %v454_v48 = vadd.f32 %v4815_v62, %v453_v46  ;;  %v1373_v49 = vpack.c.b16 %v1345_v45, %v1344_v44 }
  0xdc   : > { %v527_v53 = vmax.f32 %v454_v48, 0.0  ;;  %3916 = vmatmul.msk.bf16.gmra.mxu0 %vm385_vm0, %v359_v43  ;;  %2766 = vmatmul.bf16.gmra.mxu2 %v1373_v49  ;;  %v2752_v4 = vpop.f32.mrf.mxu2 }
  0xdd   : > { %v640_v56 = vld [vmem:[#allocation2 + $0x50] sm:$0xff] }
  0xde   : > { %605 = vst [vmem:[#allocation2 + $0x62] sm:$0xff] %v527_v53  ;;  %v672_v57 = vpack.c.bf16 %v640_v56, %v640_v56  ;;  %v737_v3 = vpack.c.bf16 %v527_v53, %v527_v53 }
  0xe0   : > { %v1249_v60 = vunpack.c.l.b16 %v672_v57  ;;  %v1346_v8 = vunpack.c.l.b16 %v737_v3 }
  0xe1   : > { %v455_v61 = vpop.f32.mrf.mxu0 }
  0xe2   : > { %v456_v63 = vadd.f32 %v4815_v62, %v455_v61  ;;  %v4840_v0 = vpack.c.b16 %v1249_v60, %v1248_v59 }
  0xe4   : > { %v528_v2 = vmax.f32 %v456_v63, 0.0  ;;  %2677 = vmatmul.bf16.gmra.mxu1 %v4840_v0 }
  0xe5   : > { %v641_v11 = vld [vmem:[#allocation2 + $0x60] sm:$0xff] }
  0xe6   : > { %606 = vst [vmem:[#allocation2 + $0x6a] sm:$0xff] %v528_v2  ;;  %v738_v14 = vpack.c.bf16 %v528_v2, %v528_v2  ;;  %v673_v15 = vpack.c.bf16 %v641_v11, %v641_v11 }
  0xe8   : > { %v1347_v9 = vunpack.c.l.b16 %v738_v14  ;;  %v1250_v20 = vunpack.c.l.b16 %v673_v15  ;;  %v4881_v15 = vpop.f32.mrf.mxu1 }
  0xe9   : > { %v458_v10 = vpop.f32.mrf.mxu0  ;;  %5953 = vst [vmem:[#allocation12_spill] sm:$0xff] %v4881_v15 }
  0xea   : > { %v459_v16 = vadd.f32 %v4815_v62, %v458_v10  ;;  %v1374_v12 = vpack.c.b16 %v1347_v9, %v1346_v8  ;;  %v2664_v9 = vadd.f32 %v4875_v6, %v2663_v1 }
  0xec   : > { %v529_v13 = vmax.f32 %v459_v16, 0.0  ;;  %3917 = vmatmul.msk.bf16.gmra.mxu0 %vm385_vm0, %v360_v7  ;;  %2771 = vmatmul.bf16.gmra.mxu2 %v1374_v12 }
  0xed   : > { %v642_v17 = vld [vmem:[#allocation2 + $0x68] sm:$0xff] }
  0xee   : > { %607 = vst [vmem:[#allocation2 + $0x7a] sm:$0xff] %v529_v13  ;;  %v674_v18 = vpack.c.bf16 %v642_v17, %v642_v17  ;;  %v739_v28 = vpack.c.bf16 %v529_v13, %v529_v13  ;;  %v4879_v13 = vadd.f32 %v2752_v4, %v2664_v9 }
  0xf0   : > { %v1251_v22 = vunpack.c.l.b16 %v674_v18  ;;  %v1348_v33 = vunpack.c.l.b16 %v739_v28 }
  0xf1   : > { %v460_v23 = vpop.f32.mrf.mxu0 }
  0xf2   : > { %v461_v25 = vadd.f32 %v4815_v62, %v460_v23  ;;  %v4852_v27 = vpack.c.b16 %v1251_v22, %v1250_v20  ;;  %v4884_v22 = vpop.f32.mrf.mxu2 }
  0xf3   : > { %5954 = vst [vmem:[#allocation13_spill] sm:$0xff] %v4884_v22 }
  0xf4   : > { %v530_v21 = vmax.f32 %v461_v25, 0.0  ;;  %2682 = vmatmul.bf16.gmra.mxu1 %v4852_v27  ;;  %v4289_v25 = vld [vmem:[#allocation6 + $0x138] sm:$0xff] }
  0xf5   : > { %v643_v38 = vld [vmem:[#allocation2 + $0x78] sm:$0xff]  ;;  %3010 = vmatpush.bf16.msrb.mxu1 %v4289_v25 }
  0xf6   : > { %608 = vst [vmem:[#allocation2 + $0x82] sm:$0xff] %v530_v21  ;;  %v740_v32 = vpack.c.bf16 %v530_v21, %v530_v21  ;;  %v675_v41 = vpack.c.bf16 %v643_v38, %v643_v38 }
  0xf8   : > { %v1349_v36 = vunpack.c.l.b16 %v740_v32  ;;  %v1252_v44 = vunpack.c.l.b16 %v675_v41 }
  0xf9   : > { %v463_v37 = vpop.f32.mrf.mxu0 }
  0xfa   : > { %v464_v39 = vadd.f32 %v4815_v62, %v463_v37  ;;  %v1375_v40 = vpack.c.b16 %v1349_v36, %v1348_v33  ;;  %v2668_v33 = vpop.f32.mrf.mxu1  ;;  %v2757_v38 = vpop.f32.mrf.mxu2 }
  0xfb   : > { %v2669_v37 = vadd.f32 %v4875_v6, %v2668_v33 }
  0xfc   : > { %v531_v26 = vmax.f32 %v464_v39, 0.0  ;;  %3918 = vmatmul.msk.bf16.gmra.mxu0 %vm385_vm0, %v361_v24  ;;  %2776 = vmatmul.bf16.gmra.mxu2 %v1375_v40 }
  0xfd   : > { %v644_v42 = vld [vmem:[#allocation2 + $0x80] sm:$0xff] }
  0xfe   : > { %609 = vst [vmem:[#allocation2 + $0x92] sm:$0xff] %v531_v26  ;;  %v676_v43 = vpack.c.bf16 %v644_v42, %v644_v42  ;;  %v741_v49 = vpack.c.bf16 %v531_v26, %v531_v26  ;;  %v4891_v26 = vadd.f32 %v2757_v38, %v2669_v37 }
 0x100   : > { %v1253_v29 = vunpack.c.l.b16 %v676_v43  ;;  %v1350_v50 = vunpack.c.l.b16 %v741_v49  ;;  %v345_v43 = vld [vmem:[%s4702_s29 + $0xe0] sm:$0xff] }
 0x101   : > { %v465_v45 = vpop.f32.mrf.mxu0 }
 0x102   : > { %v466_v46 = vadd.f32 %v4815_v62, %v465_v45  ;;  %v4863_v47 = vpack.c.b16 %v1253_v29, %v1252_v44  ;;  %v346_v44 = vld [vmem:[%s4702_s29 + $0xe8] sm:$0xff]  ;;  %v4913_v38 = vpop.f32.mrf.mxu1 }
 0x103   : > { %5956 = vst [vmem:[#allocation15_spill] sm:$0xff] %v4913_v38 }
 0x104   : > { %v532_v48 = vmax.f32 %v466_v46, 0.0  ;;  %2687 = vmatmul.bf16.gmra.mxu1 %v4863_v47  ;;  %v363_v46 = vpack.c.bf16 %v346_v44, %v345_v43 }
 0x105   : > { %v645_v53 = vld [vmem:[#allocation2 + $0x90] sm:$0xff] }
 0x106   : > { %610 = vst [vmem:[#allocation2 + $0x9a] sm:$0xff] %v532_v48  ;;  %v742_v34 = vpack.c.bf16 %v532_v48, %v532_v48  ;;  %v677_v57 = vpack.c.bf16 %v645_v53, %v645_v53  ;;  %v4297_v48 = vld [vmem:[#allocation6 + $0x178] sm:$0xff]  ;;  %3920 = vmatmul.msk.bf16.gmra.mxu3 %vm385_vm0, %v363_v46  ;;  %v4283_v46 = vld [vmem:[#allocation6 + $0x108] sm:$0xff] }
 0x107   : > { %3099 = vmatpush.bf16.msrb.mxu2 %v4297_v48 }
 0x108   : > { %v1351_v51 = vunpack.c.l.b16 %v742_v34  ;;  %v1254_v60 = vunpack.c.l.b16 %v677_v57 }
 0x109   : > { %v468_v52 = vpop.f32.mrf.mxu0 }
 0x10a   : > { %v469_v54 = vadd.f32 %v4815_v62, %v468_v52  ;;  %v1376_v55 = vpack.c.b16 %v1351_v51, %v1350_v50  ;;  %v4296_v52 = vld [vmem:[#allocation6 + $0x170] sm:$0xff] }
 0x10b   : > { %3100 = vmatpush.bf16.msrb.mxu2 %v4296_v52  ;;  %v4282_v52 = vld [vmem:[#allocation6 + $0x100] sm:$0xff] }
 0x10c   : > { %v533_v56 = vmax.f32 %v469_v54, 0.0  ;;  %2929 = vmatmul.bf16.vlgmr.msrb.gmra.mxu0 %v4828_v35  ;;  %2781 = vmatmul.bf16.gmra.mxu2 %v1376_v55 }
 0x10d   : > { %v646_v58 = vld [vmem:[#allocation2 + $0x98] sm:$0xff] }
 0x10e   : > { %611 = vst [vmem:[#allocation2 + $0xaa] sm:$0xff] %v533_v56  ;;  %v678_v59 = vpack.c.bf16 %v646_v58, %v646_v58  ;;  %v743_v14 = vpack.c.bf16 %v533_v56, %v533_v56 }
 0x110   : > { %v1255_v61 = vunpack.c.l.b16 %v678_v59  ;;  %v1352_v7 = vunpack.c.l.b16 %v743_v14  ;;  %v347_v14 = vld [vmem:[%s4702_s29 + $0xf0] sm:$0xff] }
 0x111   : > { %v470_v63 = vpop.f32.mrf.mxu0 }
 0x112   : > { %v471_v2 = vadd.f32 %v4815_v62, %v470_v63  ;;  %v4869_v3 = vpack.c.b16 %v1255_v61, %v1254_v60  ;;  %v4288_v61 = vld [vmem:[#allocation6 + $0x130] sm:$0xff]  ;;  %v4294_v63 = vld [vmem:[#allocation6 + $0x160] sm:$0xff] }
 0x113   : > { %3011 = vmatpush.bf16.msrb.mxu1 %v4288_v61 }
 0x114   : > { %v534_v5 = vmax.f32 %v471_v2, 0.0  ;;  %2692 = vmatmul.bf16.gmra.mxu1 %v4869_v3 }
 0x115   : > { %v647_v11 = vld [vmem:[#allocation2 + $0xa8] sm:$0xff] }
 0x116   : > { %612 = vst [vmem:[#allocation2 + $0xb2] sm:$0xff] %v534_v5  ;;  %v744_v35 = vpack.c.bf16 %v534_v5, %v534_v5  ;;  %v679_v18 = vpack.c.bf16 %v647_v11, %v647_v11  ;;  %v4293_v11 = vld [vmem:[#allocation6 + $0x158] sm:$0xff] }
 0x118   : > { %v1353_v8 = vunpack.c.l.b16 %v744_v35  ;;  %v1256_v21 = vunpack.c.l.b16 %v679_v18  ;;  %v348_v35 = vld [vmem:[%s4702_s29 + $0xf8] sm:$0xff] }
 0x119   : > { %v473_v10 = vpop.f32.mrf.mxu0  ;;  %v364_v9 = vpack.c.bf16 %v348_v35, %v347_v14 }
 0x11a   : > { %v474_v16 = vadd.f32 %v4815_v62, %v473_v10  ;;  %v1377_v12 = vpack.c.b16 %v1353_v8, %v1352_v7  ;;  %v4287_v10 = vld [vmem:[#allocation6 + $0x128] sm:$0xff] }
 0x11b   : > { %3921 = vmatmul.msk.bf16.gmra.mxu3 %vm385_vm0, %v364_v9  ;;  %3012 = vmatpush.bf16.msrb.mxu1 %v4287_v10 }
 0x11c   : > { %v535_v17 = vmax.f32 %v474_v16, 0.0  ;;  %2934 = vmatmul.bf16.gmra.mxu0 %v4840_v0  ;;  %2786 = vmatmul.bf16.gmra.mxu2 %v1377_v12 }
 0x11d   : > { %v648_v20 = vld [vmem:[#allocation2 + $0xb0] sm:$0xff] }
 0x11e   : > { %613 = vst [vmem:[#allocation2 + $0xc2] sm:$0xff] %v535_v17  ;;  %v680_v23 = vpack.c.bf16 %v648_v20, %v648_v20  ;;  %v745_v0 = vpack.c.bf16 %v535_v17, %v535_v17  ;;  %v4286_v20 = vld [vmem:[#allocation6 + $0x120] sm:$0xff] }
 0x11f   : > { %3013 = vmatpush.bf16.msrb.mxu1 %v4286_v20 }
 0x120   : > { %v1257_v28 = vunpack.c.l.b16 %v680_v23  ;;  %v1354_v39 = vunpack.c.l.b16 %v745_v0  ;;  %v4292_v23 = vld [vmem:[#allocation6 + $0x150] sm:$0xff] }
 0x121   : > { %v475_v30 = vpop.f32.mrf.mxu0 }
 0x122   : > { %v476_v31 = vadd.f32 %v4815_v62, %v475_v30  ;;  %v4887_v32 = vpack.c.b16 %v1257_v28, %v1256_v21 }
 0x124   : > { %v536_v24 = vmax.f32 %v476_v31, 0.0  ;;  %2697 = vmatmul.bf16.gmra.mxu1 %v4887_v32 }
 0x125   : > { %v649_v42 = vld [vmem:[#allocation2 + $0xc0] sm:$0xff] }
 0x126   : > { %614 = vst [vmem:[#allocation2 + $0xca] sm:$0xff] %v536_v24  ;;  %v746_v36 = vpack.c.bf16 %v536_v24, %v536_v24  ;;  %v681_v34 = vpack.c.bf16 %v649_v42, %v649_v42  ;;  %v4291_v24 = vld [vmem:[#allocation6 + $0x148] sm:$0xff] }
 0x128   : > { %v1355_v40 = vunpack.c.l.b16 %v746_v36  ;;  %v1258_v53 = vunpack.c.l.b16 %v681_v34  ;;  %v4911_v36 = vpop.f32.mrf.mxu2 }
 0x129   : > { %v478_v41 = vpop.f32.mrf.mxu0  ;;  %5955 = vst [vmem:[#allocation14_spill] sm:$0xff] %v4911_v36 }
 0x12a   : > { %v479_v29 = vadd.f32 %v4815_v62, %v478_v41  ;;  %v1378_v45 = vpack.c.b16 %v1355_v40, %v1354_v39  ;;  %v4284_v39 = vld [vmem:[#allocation6 + $0x110] sm:$0xff]  ;;  %v4290_v40 = vld [vmem:[#allocation6 + $0x140] sm:$0xff] }
 0x12c   : > { %v537_v49 = vmax.f32 %v479_v29, 0.0  ;;  %2939 = vmatmul.bf16.gmra.mxu0 %v4852_v27  ;;  %2791 = vmatmul.bf16.gmra.mxu2 %v1378_v45  ;;  %v4295_v27 = vld [vmem:[#allocation6 + $0x168] sm:$0xff] }
 0x12d   : > { %v650_v50 = vld [vmem:[#allocation2 + $0xc8] sm:$0xff]  ;;  %3101 = vmatpush.bf16.msrb.mxu2 %v4295_v27 }
 0x12e   : > { %615 = vst [vmem:[#allocation2 + $0xda] sm:$0xff] %v537_v49  ;;  %v682_v51 = vpack.c.bf16 %v650_v50, %v650_v50  ;;  %v747_v59 = vpack.c.bf16 %v537_v49, %v537_v49 }
 0x130   : > { %v1259_v54 = vunpack.c.l.b16 %v682_v51  ;;  %v1356_v1 = vunpack.c.l.b16 %v747_v59 }
 0x131   : > { %v480_v55 = vpop.f32.mrf.mxu0  ;;  %3102 = vmatpush.bf16.msrb.mxu2 %v4294_v63 }
 0x132   : > { %v481_v56 = vadd.f32 %v4815_v62, %v480_v55  ;;  %v4899_v57 = vpack.c.b16 %v1259_v54, %v1258_v53 }
 0x134   : > { %v538_v58 = vmax.f32 %v481_v56, 0.0  ;;  %2702 = vmatmul.bf16.gmra.mxu1 %v4899_v57 }
 0x135   : > { %v651_v5 = vld [vmem:[#allocation2 + $0xd8] sm:$0xff]  ;;  %3103 = vmatpush.bf16.msrb.mxu2 %v4293_v11 }
 0x136   : > { %616 = vst [vmem:[#allocation2 + $0xe2] sm:$0xff] %v538_v58  ;;  %v748_v60 = vpack.c.bf16 %v538_v58, %v538_v58  ;;  %v683_v12 = vpack.c.bf16 %v651_v5, %v651_v5 }
 0x138   : > { %v1357_v2 = vunpack.c.l.b16 %v748_v60  ;;  %v1260_v25 = vunpack.c.l.b16 %v683_v12 }
 0x139   : > { %v483_v4 = vpop.f32.mrf.mxu0  ;;  %3104 = vmatpush.bf16.msrb.mxu2 %v4292_v23  ;;  %v954_v23 = vld [vmem:[#allocation2 + $0x3c] sm:$0xff] }
 0x13a   : > { %v484_v7 = vadd.f32 %v4815_v62, %v483_v4  ;;  %v1379_v8 = vpack.c.b16 %v1357_v2, %v1356_v1 }
 0x13c   : > { %v539_v16 = vmax.f32 %v484_v7, 0.0  ;;  %2944 = vmatmul.bf16.gmra.mxu0 %v4863_v47  ;;  %2796 = vmatmul.bf16.gmra.mxu2 %v1379_v8  ;;  %v4285_v47 = vld [vmem:[#allocation6 + $0x118] sm:$0xff] }
 0x13d   : > { %v652_v17 = vld [vmem:[#allocation2 + $0xe0] sm:$0xff]  ;;  %3014 = vmatpush.bf16.msrb.mxu1 %v4285_v47  ;;  %3105 = vmatpush.bf16.msrb.mxu2 %v4291_v24 }
 0x13e   : > { %617 = vst [vmem:[#allocation2 + $0xf2] sm:$0xff] %v539_v16  ;;  %v684_v18 = vpack.c.bf16 %v652_v17, %v652_v17  ;;  %v749_v33 = vpack.c.bf16 %v539_v16, %v539_v16 }
 0x140   : > { %v1261_v21 = vunpack.c.l.b16 %v684_v18  ;;  %v1358_v41 = vunpack.c.l.b16 %v749_v33  ;;  %v953_v18 = vld [vmem:[#allocation2 + $0x34] sm:$0xff]  ;;  %v986_v33 = vpack.c.bf16 %v954_v23, %v954_v23 }
 0x141   : > { %v485_v28 = vpop.f32.mrf.mxu0  ;;  %3015 = vmatpush.bf16.msrb.mxu1 %v4284_v39  ;;  %3106 = vmatpush.bf16.msrb.mxu2 %v4290_v40  ;;  %v985_v47 = vpack.c.bf16 %v953_v18, %v953_v18 }
 0x142   : > { %v486_v30 = vadd.f32 %v4815_v62, %v485_v28  ;;  %v4908_v31 = vpack.c.b16 %v1261_v21, %v1260_v25 }
 0x144   : > { %v540_v0 = vmax.f32 %v486_v30, 0.0  ;;  %2707 = vmatmul.bf16.gmra.mxu1 %v4908_v31 }
 0x145   : > { %v653_v44 = vld [vmem:[#allocation2 + $0xf0] sm:$0xff]  ;;  %3016 = vmatpush.bf16.msrb.mxu1 %v4283_v46 }
 0x146   : > { %618 = vst [vmem:[#allocation2 + $0xfa] sm:$0xff] %v540_v0  ;;  %v750_v37 = vpack.c.bf16 %v540_v0, %v540_v0  ;;  %v685_v49 = vpack.c.bf16 %v653_v44, %v653_v44 }
 0x148   : > { %v1359_v42 = vunpack.c.l.b16 %v750_v37  ;;  %v1262_v53 = vunpack.c.l.b16 %v685_v49  ;;  %v508_v37 = vpop.f32.mrf.mxu3 }
 0x149   : > { %v488_v43 = vpop.f32.mrf.mxu0  ;;  %3017 = vmatpush.bf16.msrb.mxu1 %v4282_v52  ;;  %v509_v44 = vadd.f32 %v4815_v62, %v508_v37 }
 0x14a   : > { %v489_v29 = vadd.f32 %v4815_v62, %v488_v43  ;;  %v1380_v45 = vpack.c.b16 %v1359_v42, %v1358_v41  ;;  %v1722_v42 = vunpack.c.l.b16 %v985_v47  ;;  %v1723_v43 = vunpack.c.l.b16 %v986_v33 }
 0x14b   : > { %v549_v46 = vmax.f32 %v509_v44, 0.0 }
 0x14c   : > { %v541_v48 = vmax.f32 %v489_v29, 0.0  ;;  %2949 = vmatmul.bf16.gmra.mxu0 %v4869_v3  ;;  %2801 = vmatmul.bf16.gmra.mxu2 %v1380_v45 }
 0x14d   : > { %v654_v34 = vld [vmem:[#allocation2 + $0xf8] sm:$0xff]  ;;  %627 = vst [vmem:[#allocation2 + $0x16a] sm:$0xff] %v549_v46 }
 0x14e   : > { %619 = vst [vmem:[#allocation2 + $0x10a] sm:$0xff] %v541_v48  ;;  %v686_v50 = vpack.c.bf16 %v654_v34, %v654_v34  ;;  %v751_v61 = vpack.c.bf16 %v541_v48, %v541_v48  ;;  %v906_v38 = vld [vmem:[#allocation2 + $0xfa] sm:$0xff] }
 0x14f   : > { %v2762_v51 = vpop.f32.mrf.mxu2 }
 0x150   : > { %v1263_v54 = vunpack.c.l.b16 %v686_v50  ;;  %v1360_v2 = vunpack.c.l.b16 %v751_v61 }
 0x151   : > { %v490_v55 = vpop.f32.mrf.mxu0  ;;  %v2673_v56 = vpop.f32.mrf.mxu1 }
 0x152   : > { %v491_v27 = vadd.f32 %v4815_v62, %v490_v55  ;;  %v2674_v58 = vadd.f32 %v4875_v6, %v2673_v56  ;;  %v4919_v59 = vpack.c.b16 %v1263_v54, %v1262_v53  ;;  %v4943_v54 = vpack.c.b16 %v1723_v43, %v1722_v42  ;;  %v510_v55 = vpop.f32.mrf.mxu3 }
 0x154   : > { %v542_v3 = vmax.f32 %v491_v27, 0.0  ;;  %2712 = vmatmul.bf16.gmra.mxu1 %v4919_v59  ;;  %v4922_v60 = vadd.f32 %v2762_v51, %v2674_v58  ;;  %v511_v27 = vadd.f32 %v4815_v62, %v510_v55 }
 0x155   : > { %v655_v35 = vld [vmem:[#allocation2 + $0x108] sm:$0xff] }
 0x156   : > { %620 = vst [vmem:[#allocation2 + $0x112] sm:$0xff] %v542_v3  ;;  %v752_v63 = vpack.c.bf16 %v542_v3, %v542_v3  ;;  %v687_v16 = vpack.c.bf16 %v655_v35, %v655_v35  ;;  %v759_v35 = vpack.c.bf16 %v549_v46, %v549_v46 }
 0x157   : > { %v2764_v1 = vpop.f32.mrf.mxu2 }
 0x158   : > { %v1361_v4 = vunpack.c.l.b16 %v752_v63  ;;  %v1264_v25 = vunpack.c.l.b16 %v687_v16 }
 0x159   : > { %v493_v5 = vpop.f32.mrf.mxu0  ;;  %v2675_v14 = vpop.f32.mrf.mxu1 }
 0x15a   : > { %v494_v7 = vadd.f32 %v4815_v62, %v493_v5  ;;  %v2676_v8 = vadd.f32 %v4875_v6, %v2675_v14  ;;  %v1381_v9 = vpack.c.b16 %v1361_v4, %v1360_v2  ;;  %v955_v4 = vld [vmem:[#allocation2 + $0x4c] sm:$0xff]  ;;  %v956_v14 = vld [vmem:[#allocation2 + $0x54] sm:$0xff] }
 0x15c   : > { %v543_v10 = vmax.f32 %v494_v7, 0.0  ;;  %2954 = vmatmul.bf16.gmra.mxu0 %v4887_v32  ;;  %v4927_v11 = vadd.f32 %v2764_v1, %v2676_v8  ;;  %2806 = vmatmul.bf16.gmra.mxu2 %v1381_v9  ;;  %v550_v1 = vmax.f32 %v511_v27, 0.0 }
 0x15d   : > { %v656_v12 = vld [vmem:[#allocation2 + $0x110] sm:$0xff] }
 0x15e   : > { %621 = vst [vmem:[#allocation2 + $0x122] sm:$0xff] %v543_v10  ;;  %v688_v17 = vpack.c.bf16 %v656_v12, %v656_v12  ;;  %v753_v41 = vpack.c.bf16 %v543_v10, %v543_v10  ;;  %v760_v7 = vpack.c.bf16 %v550_v1, %v550_v1  ;;  %v4952_v12 = vunpack.c.l.b16 %v759_v35 }
 0x15f   : > { %v2767_v20 = vpop.f32.mrf.mxu2  ;;  %628 = vst [vmem:[#allocation2 + $0x172] sm:$0xff] %v550_v1  ;;  %v957_v1 = vld [vmem:[#allocation2 + $0x64] sm:$0xff] }
 0x160   : > { %v1265_v21 = vunpack.c.l.b16 %v688_v17  ;;  %v4937_v48 = vunpack.c.l.b16 %v753_v41  ;;  %v4954_v17 = vunpack.c.l.b16 %v760_v7  ;;  %v891_v41 = vld [vmem:[#allocation2 + $0x4a] sm:$0xff] }
 0x161   : > { %v495_v28 = vpop.f32.mrf.mxu0  ;;  %v2678_v30 = vpop.f32.mrf.mxu1 }
 0x162   : > { %v496_v24 = vadd.f32 %v4815_v62, %v495_v28  ;;  %v2679_v0 = vadd.f32 %v4875_v6, %v2678_v30  ;;  %v4931_v32 = vpack.c.b16 %v1265_v21, %v1264_v25  ;;  %v988_v25 = vpack.c.bf16 %v956_v14, %v956_v14 }
 0x164   : > { %v544_v39 = vmax.f32 %v496_v24, 0.0  ;;  %2717 = vmatmul.bf16.gmra.mxu1 %v4931_v32  ;;  %v4934_v40 = vadd.f32 %v2767_v20, %v2679_v0  ;;  %v892_v24 = vld [vmem:[#allocation2 + $0x52] sm:$0xff]  ;;  %v1725_v33 = vunpack.c.l.b16 %v988_v25 }
 0x165   : > { %v657_v51 = vld [vmem:[#allocation2 + $0x120] sm:$0xff]  ;;  %v924_v46 = vpack.c.bf16 %v892_v24, %v892_v24 }
 0x166   : > { %622 = vst [vmem:[#allocation2 + $0x12a] sm:$0xff] %v544_v39  ;;  %v754_v29 = vpack.c.bf16 %v544_v39, %v544_v39  ;;  %v689_v61 = vpack.c.bf16 %v657_v51, %v657_v51  ;;  %v965_v51 = vld [vmem:[#allocation2 + $0xc4] sm:$0xff] }
 0x167   : > { %v2769_v45 = vpop.f32.mrf.mxu2 }
 0x168   : > { %v4939_v49 = vunpack.c.l.b16 %v754_v29  ;;  %v1266_v8 = vunpack.c.l.b16 %v689_v61  ;;  %v1629_v61 = vunpack.c.l.b16 %v924_v46 }
 0x169   : > { %v498_v34 = vpop.f32.mrf.mxu0  ;;  %v2680_v50 = vpop.f32.mrf.mxu1 }
 0x16a   : > { %v499_v52 = vadd.f32 %v4815_v62, %v498_v34  ;;  %v2681_v53 = vadd.f32 %v4875_v6, %v2680_v50  ;;  %v1382_v56 = vpack.c.b16 %v4939_v49, %v4937_v48 }
 0x16c   : > { %v545_v58 = vmax.f32 %v499_v52, 0.0  ;;  %2959 = vmatmul.bf16.gmra.mxu0 %v4899_v57  ;;  %v4949_v3 = vadd.f32 %v2769_v45, %v2681_v53  ;;  %3107 = vmatmul.bf16.vlgmr.msrb.gmra.mxu2 %v4943_v54  ;;  %v987_v57 = vpack.c.bf16 %v955_v4, %v955_v4  ;;  %v923_v52 = vpack.c.bf16 %v891_v41, %v891_v41 }
 0x16d   : > { %v658_v63 = vld [vmem:[#allocation2 + $0x128] sm:$0xff] }
 0x16e   : > { %623 = vst [vmem:[#allocation2 + $0x13a] sm:$0xff] %v545_v58  ;;  %v690_v2 = vpack.c.bf16 %v658_v63, %v658_v63  ;;  %v755_v47 = vpack.c.bf16 %v545_v58, %v545_v58  ;;  %v1724_v0 = vunpack.c.l.b16 %v987_v57 }
 0x16f   : > { %v2772_v5 = vpop.f32.mrf.mxu2 }
 0x170   : > { %v1267_v9 = vunpack.c.l.b16 %v690_v2  ;;  %v4966_v42 = vunpack.c.l.b16 %v755_v47  ;;  %v4972_v50 = vpack.c.b16 %v1725_v33, %v1724_v0  ;;  %v1628_v2 = vunpack.c.l.b16 %v923_v52  ;;  %v894_v47 = vld [vmem:[#allocation2 + $0x6a] sm:$0xff] }
 0x171   : > { %v500_v10 = vpop.f32.mrf.mxu0  ;;  %v2683_v16 = vpop.f32.mrf.mxu1  ;;  %v926_v46 = vpack.c.bf16 %v894_v47, %v894_v47  ;;  %v896_v47 = vld [vmem:[#allocation2 + $0x82] sm:$0xff] }
 0x172   : > { %v501_v18 = vadd.f32 %v4815_v62, %v500_v10  ;;  %v2684_v20 = vadd.f32 %v4875_v6, %v2683_v16  ;;  %v4958_v23 = vpack.c.b16 %v1267_v9, %v1266_v8  ;;  %v1659_v9 = vpack.c.b16 %v1629_v61, %v1628_v2 }
 0x173   : > { %v989_v10 = vpack.c.bf16 %v957_v1, %v957_v1 }
 0x174   : > { %v546_v28 = vmax.f32 %v501_v18, 0.0  ;;  %2722 = vmatmul.bf16.vlgmr.msrb.gmra.mxu3 %v4958_v23  ;;  %3018 = vmatmul.bf16.vlgmr.msrb.gmra.mxu1 %v4823_v19  ;;  %v4964_v30 = vadd.f32 %v2772_v5, %v2684_v20  ;;  %v958_v5 = vld [vmem:[#allocation2 + $0x6c] sm:$0xff] }
 0x175   : > { %v659_v45 = vld [vmem:[#allocation2 + $0x138] sm:$0xff]  ;;  %v990_v18 = vpack.c.bf16 %v958_v5, %v958_v5  ;;  %v1726_v24 = vunpack.c.l.b16 %v989_v10 }
 0x176   : > { %624 = vst [vmem:[#allocation2 + $0x142] sm:$0xff] %v546_v28  ;;  %v756_v37 = vpack.c.bf16 %v546_v28, %v546_v28  ;;  %v691_v27 = vpack.c.bf16 %v659_v45, %v659_v45  ;;  %v959_v5 = vld [vmem:[#allocation2 + $0x7c] sm:$0xff] }
 0x177   : > { %v2774_v39 = vpop.f32.mrf.mxu2  ;;  %v1727_v0 = vunpack.c.l.b16 %v990_v18 }
 0x178   : > { %v4968_v43 = vunpack.c.l.b16 %v756_v37  ;;  %v1268_v14 = vunpack.c.l.b16 %v691_v27 }
 0x179   : > { %v503_v44 = vpop.f32.mrf.mxu0  ;;  %v2685_v29 = vpop.f32.mrf.mxu1 }
 0x17a   : > { %v504_v19 = vadd.f32 %v4815_v62, %v503_v44  ;;  %v2686_v34 = vadd.f32 %v4875_v6, %v2685_v29 }
 0x17c   : > { %v547_v53 = vmax.f32 %v504_v19, 0.0  ;;  %2964 = vmatmul.bf16.gmra.mxu0 %v4908_v31  ;;  %v4977_v55 = vadd.f32 %v2774_v39, %v2686_v34  ;;  %3112 = vmatmul.bf16.gmra.mxu2 %v4972_v50  ;;  %v893_v39 = vld [vmem:[#allocation2 + $0x62] sm:$0xff]  ;;  %v4994_v34 = vpack.c.b16 %v1727_v0, %v1726_v24 }
 0x17d   : > { %v660_v58 = vld [vmem:[#allocation2 + $0x140] sm:$0xff] }
 0x17e   : > { %625 = vst [vmem:[#allocation2 + $0x152] sm:$0xff] %v547_v53  ;;  %v692_v63 = vpack.c.bf16 %v660_v58, %v660_v58  ;;  %v757_v28 = vpack.c.bf16 %v547_v53, %v547_v53  ;;  %v925_v53 = vpack.c.bf16 %v893_v39, %v893_v39  ;;  %v664_v39 = vld [vmem:[#allocation2 + $0x170] sm:$0xff] }
 0x17f   : > { %v2777_v4 = vpop.f32.mrf.mxu2 }
 0x180   : > { %v1269_v35 = vunpack.c.l.b16 %v692_v63  ;;  %v1631_v63 = vunpack.c.l.b16 %v926_v46  ;;  %v1630_v2 = vunpack.c.l.b16 %v925_v53 }
 0x181   : > { %v505_v7 = vpop.f32.mrf.mxu0  ;;  %v2688_v8 = vpop.f32.mrf.mxu1 }
 0x182   : > { %v506_v31 = vadd.f32 %v4815_v62, %v505_v7  ;;  %v2689_v16 = vadd.f32 %v4875_v6, %v2688_v8  ;;  %v4982_v57 = vpack.c.b16 %v1269_v35, %v1268_v14  ;;  %v4987_v62 = vunpack.c.l.b16 %v757_v28  ;;  %v960_v14 = vld [vmem:[#allocation2 + $0x84] sm:$0xff]  ;;  %v4273_v28 = vld [vmem:[#allocation6 + $0xb8] sm:$0xff] }
 0x183   : > { %v5004_v10 = vpack.c.b16 %v1631_v63, %v1630_v2  ;;  %v992_v18 = vpack.c.bf16 %v960_v14, %v960_v14  ;;  %2832 = vmatpush.bf16.msrb.mxu3 %v4273_v28 }
 0x184   : > { %v548_v20 = vmax.f32 %v506_v31, 0.0  ;;  %2727 = vmatmul.bf16.gmra.mxu3 %v4982_v57  ;;  %3023 = vmatmul.bf16.gmra.mxu1 %v1659_v9  ;;  %v4985_v25 = vadd.f32 %v2777_v4, %v2689_v16  ;;  %v991_v16 = vpack.c.bf16 %v959_v5, %v959_v5 }
 0x185   : > { %v661_v45 = vld [vmem:[#allocation2 + $0x150] sm:$0xff]  ;;  %v1729_v0 = vunpack.c.l.b16 %v992_v18 }
 0x186   : > { %626 = vst [vmem:[#allocation2 + $0x15a] sm:$0xff] %v548_v20  ;;  %v758_v33 = vpack.c.bf16 %v548_v20, %v548_v20  ;;  %v693_v58 = vpack.c.bf16 %v661_v45, %v661_v45  ;;  %v1728_v24 = vunpack.c.l.b16 %v991_v16  ;;  %v962_v16 = vld [vmem:[#allocation2 + $0x9c] sm:$0xff] }
 0x187   : > { %v2779_v37 = vpop.f32.mrf.mxu2 }
 0x188   : > { %v4989_v41 = vunpack.c.l.b16 %v758_v33  ;;  %v1270_v35 = vunpack.c.l.b16 %v693_v58  ;;  %v5016_v63 = vpack.c.b16 %v1729_v0, %v1728_v24 }
 0x189   : > { %v2690_v44 = vpop.f32.mrf.mxu1  ;;  %v4991_v29 = vpop.f32.mrf.mxu0 }
 0x18a   : > { %5957 = vst [vmem:[#allocation16_spill] sm:$0xff] %v4991_v29  ;;  %v2691_v19 = vadd.f32 %v4875_v6, %v2690_v44  ;;  %v895_v44 = vld [vmem:[#allocation2 + $0x7a] sm:$0xff] }
 0x18b   : > { %v927_v2 = vpack.c.bf16 %v895_v44, %v895_v44 }
 0x18c   : > { %2969 = vmatmul.bf16.gmra.mxu0 %v4919_v59  ;;  %v4999_v27 = vadd.f32 %v2779_v37, %v2691_v19  ;;  %3117 = vmatmul.bf16.gmra.mxu2 %v4994_v34  ;;  %v663_v37 = vld [vmem:[#allocation2 + $0x168] sm:$0xff]  ;;  %v928_v19 = vpack.c.bf16 %v896_v47, %v896_v47 }
 0x18d   : > { %v662_v61 = vld [vmem:[#allocation2 + $0x158] sm:$0xff]  ;;  %v695_v58 = vpack.c.bf16 %v663_v37, %v663_v37 }
 0x18e   : > { %v694_v1 = vpack.c.bf16 %v662_v61, %v662_v61  ;;  %v696_v61 = vpack.c.bf16 %v664_v39, %v664_v39  ;;  %v1633_v5 = vunpack.c.l.b16 %v928_v19  ;;  %v4271_v39 = vld [vmem:[#allocation6 + $0xa8] sm:$0xff] }
 0x18f   : > { %v2782_v4 = vpop.f32.mrf.mxu2  ;;  %v1272_v14 = vunpack.c.l.b16 %v695_v58 }
 0x190   : > { %v1271_v7 = vunpack.c.l.b16 %v694_v1  ;;  %v4272_v1 = vld [vmem:[#allocation6 + $0xb0] sm:$0xff] }
 0x191   : > { %v2693_v8 = vpop.f32.mrf.mxu1  ;;  %v5002_v9 = vpop.f32.mrf.mxu0  ;;  %2833 = vmatpush.bf16.msrb.mxu3 %v4272_v1  ;;  %v897_v1 = vld [vmem:[#allocation2 + $0x92] sm:$0xff] }
 0x192   : > { %5958 = vst [vmem:[#allocation17_spill] sm:$0xff] %v5002_v9  ;;  %v2694_v59 = vadd.f32 %v4875_v6, %v2693_v8  ;;  %v5007_v31 = vpack.c.b16 %v1271_v7, %v1270_v35  ;;  %v1273_v35 = vunpack.c.l.b16 %v696_v61  ;;  %v1632_v7 = vunpack.c.l.b16 %v927_v2 }
 0x194   : > { %2732 = vmatmul.bf16.gmra.mxu3 %v5007_v31  ;;  %3028 = vmatmul.bf16.gmra.mxu1 %v5004_v10  ;;  %v5011_v20 = vadd.f32 %v2782_v4, %v2694_v59  ;;  %v961_v59 = vld [vmem:[#allocation2 + $0x94] sm:$0xff]  ;;  %v5024_v47 = vpack.c.b16 %v1633_v5, %v1632_v7 }
 0x195   : > { %v993_v0 = vpack.c.bf16 %v961_v59, %v961_v59  ;;  %2834 = vmatpush.bf16.msrb.mxu3 %v4271_v39 }
 0x197   : > { %v2784_v33 = vpop.f32.mrf.mxu2  ;;  %v1730_v44 = vunpack.c.l.b16 %v993_v0 }
 0x199   : > { %v2695_v45 = vpop.f32.mrf.mxu1  ;;  %v5013_v46 = vpop.f32.mrf.mxu0 }
 0x19a   : > { %5959 = vst [vmem:[#allocation18_spill] sm:$0xff] %v5013_v46  ;;  %v2696_v53 = vadd.f32 %v4875_v6, %v2695_v45 }
 0x19c   : > { %2974 = vmatmul.bf16.gmra.mxu0 %v4931_v32  ;;  %v5019_v4 = vadd.f32 %v2784_v33, %v2696_v53  ;;  %3122 = vmatmul.bf16.gmra.mxu2 %v5016_v63  ;;  %v5027_v32 = vpack.c.b16 %v1273_v35, %v1272_v14  ;;  %v994_v33 = vpack.c.bf16 %v962_v16, %v962_v16  ;;  %v898_v53 = vld [vmem:[#allocation2 + $0x9a] sm:$0xff] }
 0x19d   : > { %v930_v5 = vpack.c.bf16 %v898_v53, %v898_v53  ;;  %v4270_v35 = vld [vmem:[#allocation6 + $0xa0] sm:$0xff] }
 0x19e   : > { %v1731_v45 = vunpack.c.l.b16 %v994_v33  ;;  %2835 = vmatpush.bf16.msrb.mxu3 %v4270_v35  ;;  %v513_v33 = vpop.f32.mrf.mxu3  ;;  %v4269_v35 = vld [vmem:[#allocation6 + $0x98] sm:$0xff] }
 0x19f   : > { %v2787_v8 = vpop.f32.mrf.mxu2  ;;  %v1635_v59 = vunpack.c.l.b16 %v930_v5 }
 0x1a0   : > { %v5036_v14 = vpack.c.b16 %v1731_v45, %v1730_v44  ;;  %v5047_v44 = vld [vmem:[%s5942_s4] ss:$0 sm:$0xff] }
 0x1a1   : > { %v2698_v18 = vpop.f32.mrf.mxu1  ;;  %v5022_v28 = vpop.f32.mrf.mxu0 }
 0x1a2   : > { %5960 = vst [vmem:[#allocation19_spill] sm:$0xff] %v5022_v28  ;;  %v2699_v24 = vadd.f32 %v4875_v6, %v2698_v18  ;;  %v963_v18 = vld [vmem:[#allocation2 + $0xac] sm:$0xff]  ;;  %2836 = vmatpush.bf16.msrb.mxu3 %v4269_v35 }
 0x1a3   : > { %v995_v53 = vpack.c.bf16 %v963_v18, %v963_v18  ;;  %v899_v18 = vld [vmem:[#allocation2 + $0xaa] sm:$0xff] }
 0x1a4   : > { %2737 = vmatmul.bf16.gmra.mxu3 %v5027_v32  ;;  %3033 = vmatmul.bf16.gmra.mxu1 %v5024_v47  ;;  %v5031_v37 = vadd.f32 %v2787_v8, %v2699_v24  ;;  %v929_v8 = vpack.c.bf16 %v897_v1, %v897_v1  ;;  %v964_v24 = vld [vmem:[#allocation2 + $0xb4] sm:$0xff] }
 0x1a5   : > { %v996_v1 = vpack.c.bf16 %v964_v24, %v964_v24 }
 0x1a6   : > { %v1634_v0 = vunpack.c.l.b16 %v929_v8  ;;  %v1732_v8 = vunpack.c.l.b16 %v995_v53 }
 0x1a7   : > { %v2789_v19 = vpop.f32.mrf.mxu2  ;;  %v1733_v21 = vunpack.c.l.b16 %v996_v1  ;;  %v931_v1 = vpack.c.bf16 %v899_v18, %v899_v18 }
 0x1a9   : > { %v2700_v58 = vpop.f32.mrf.mxu1  ;;  %v5033_v61 = vpop.f32.mrf.mxu0 }
 0x1aa   : > { %5961 = vst [vmem:[#allocation20_spill] sm:$0xff] %v5033_v61  ;;  %v2701_v2 = vadd.f32 %v4875_v6, %v2700_v58 }
 0x1ac   : > { %2979 = vmatmul.bf16.gmra.mxu0 %v4958_v23  ;;  %v5039_v7 = vadd.f32 %v2789_v19, %v2701_v2  ;;  %3127 = vmatmul.bf16.gmra.mxu2 %v5036_v14  ;;  %v514_v23 = vadd.f32 %v5047_v44, %v513_v33  ;;  %v5051_v19 = vpack.c.b16 %v1635_v59, %v1634_v0  ;;  %v515_v59 = vpop.f32.mrf.mxu3 }
 0x1ad   : > { %v516_v24 = vadd.f32 %v5047_v44, %v515_v59 }
 0x1ae   : > { %v551_v2 = vmax.f32 %v514_v23, 0.0 }
 0x1af   : > { %v2792_v16 = vpop.f32.mrf.mxu2 }
 0x1b0   : > { %629 = vst [vmem:[#allocation2 + $0x182] sm:$0xff] %v551_v2  ;;  %v949_v35 = vpack.c.bf16 %v551_v2, %v551_v2 }
 0x1b1   : > { %v2703_v39 = vpop.f32.mrf.mxu1  ;;  %v5042_v58 = vpop.f32.mrf.mxu0 }
 0x1b2   : > { %5962 = vst [vmem:[#allocation21_spill] sm:$0xff] %v5042_v58  ;;  %v2704_v45 = vadd.f32 %v4875_v6, %v2703_v39  ;;  %v900_v39 = vld [vmem:[#allocation2 + $0xb2] sm:$0xff] }
 0x1b3   : > { %v932_v49 = vpack.c.bf16 %v900_v39, %v900_v39  ;;  %v5069_v39 = vunpack.c.l.b16 %v949_v35  ;;  %v5965_v35 = vpack.c.b16 %v4968_v43, %v4966_v42 }
 0x1b4   : > { %2811 = vmatmul.bf16.vlgmr.msra.gmra.mxu3 %v1382_v56  ;;  %3038 = vmatmul.bf16.gmra.mxu1 %v5051_v19  ;;  %v5057_v5 = vadd.f32 %v2792_v16, %v2704_v45  ;;  %v5063_v56 = vpack.c.b16 %v1733_v21, %v1732_v8  ;;  %v4268_v16 = vld [vmem:[#allocation6 + $0x90] sm:$0xff]  ;;  %v552_v45 = vmax.f32 %v516_v24, 0.0  ;;  %v1636_v8 = vunpack.c.l.b16 %v931_v1  ;;  %v518_v24 = vpop.f32.mrf.mxu3 }
 0x1b5   : > { %2837 = vmatpush.bf16.msrb.mxu3 %v4268_v16  ;;  %v1637_v52 = vunpack.c.l.b16 %v932_v49  ;;  %v997_v49 = vpack.c.bf16 %v965_v51, %v965_v51 }
 0x1b6   : > { %630 = vst [vmem:[#allocation2 + $0x18a] sm:$0xff] %v552_v45  ;;  %v950_v59 = vpack.c.bf16 %v552_v45, %v552_v45 }
 0x1b7   : > { %v2794_v33 = vpop.f32.mrf.mxu2  ;;  %v5077_v2 = vpack.c.b16 %v1637_v52, %v1636_v8  ;;  %v902_v8 = vld [vmem:[#allocation2 + $0xca] sm:$0xff] }
 0x1b8   : > { %v5071_v21 = vunpack.c.l.b16 %v950_v59  ;;  %v4267_v59 = vld [vmem:[#allocation6 + $0x88] sm:$0xff]  ;;  %v934_v42 = vpack.c.bf16 %v902_v8, %v902_v8 }
 0x1b9   : > { %v2705_v0 = vpop.f32.mrf.mxu1  ;;  %v5061_v48 = vpop.f32.mrf.mxu0  ;;  %2838 = vmatpush.bf16.msrb.mxu3 %v4267_v59  ;;  %v968_v8 = vld [vmem:[#allocation2 + $0xe4] sm:$0xff] }
 0x1ba   : > { %v2706_v23 = vadd.f32 %v4875_v6, %v2705_v0  ;;  %5963 = vst [vmem:[#allocation22_spill] sm:$0xff] %v5061_v48  ;;  %v966_v48 = vld [vmem:[#allocation2 + $0xcc] sm:$0xff] }
 0x1bb   : > { %v998_v16 = vpack.c.bf16 %v966_v48, %v966_v48 }
 0x1bc   : > { %2984 = vmatmul.bf16.gmra.mxu0 %v4982_v57  ;;  %v5066_v53 = vadd.f32 %v2794_v33, %v2706_v23  ;;  %3132 = vmatmul.bf16.gmra.mxu2 %v5063_v56  ;;  %v519_v33 = vadd.f32 %v5047_v44, %v518_v24  ;;  %v1734_v24 = vunpack.c.l.b16 %v997_v49  ;;  %v520_v51 = vpop.f32.mrf.mxu3 }
 0x1bd   : > { %v1735_v18 = vunpack.c.l.b16 %v998_v16  ;;  %v4313_v16 = vld [vmem:[#allocation6 + $0x1f8] sm:$0xff] }
 0x1be   : > { %v553_v45 = vmax.f32 %v519_v33, 0.0  ;;  %v521_v33 = vadd.f32 %v5047_v44, %v520_v51  ;;  %v1639_v51 = vunpack.c.l.b16 %v934_v42  ;;  %3277 = vmatpush.bf16.msra.mxu0 %v4313_v16  ;;  %v1000_v42 = vpack.c.bf16 %v968_v8, %v968_v8  ;;  %v4310_v8 = vld [vmem:[#allocation6 + $0x1e0] sm:$0xff] }
 0x1bf   : > { %v2797_v0 = vpop.f32.mrf.mxu2  ;;  %v5089_v43 = vpack.c.b16 %v1735_v18, %v1734_v24  ;;  %v967_v24 = vld [vmem:[#allocation2 + $0xdc] sm:$0xff]  ;;  %v5967_v16 = vpack.c.b16 %v4989_v41, %v4987_v62 }
 0x1c0   : > { %631 = vst [vmem:[#allocation2 + $0x19a] sm:$0xff] %v553_v45  ;;  %v951_v59 = vpack.c.bf16 %v553_v45, %v553_v45 }
 0x1c1   : > { %v2708_v57 = vpop.f32.mrf.mxu1  ;;  %v5079_v58 = vpop.f32.mrf.mxu0 }
 0x1c2   : > { %v2709_v23 = vadd.f32 %v4875_v6, %v2708_v57  ;;  %5964 = vst [vmem:[#allocation23_spill] sm:$0xff] %v5079_v58  ;;  %v901_v57 = vld [vmem:[#allocation2 + $0xc2] sm:$0xff] }
 0x1c3   : > { %v933_v49 = vpack.c.bf16 %v901_v57, %v901_v57 }
 0x1c4   : > { %2816 = vmatmul.bf16.gmra.mxu3 %v5965_v35  ;;  %3043 = vmatmul.bf16.gmra.mxu1 %v5077_v2  ;;  %v5085_v1 = vadd.f32 %v2797_v0, %v2709_v23  ;;  %v4266_v35 = vld [vmem:[#allocation6 + $0x80] sm:$0xff]  ;;  %v554_v0 = vmax.f32 %v521_v33, 0.0  ;;  %v1737_v33 = vunpack.c.l.b16 %v1000_v42  ;;  %v4321_v42 = vld [vmem:[#allocation6 + $0x238] sm:$0xff] }
 0x1c5   : > { %2839 = vmatpush.bf16.msrb.mxu3 %v4266_v35  ;;  %3366 = vmatpush.bf16.msra.mxu1 %v4321_v42  ;;  %v5972_v42 = vpack.c.b16 %v4954_v17, %v4952_v12  ;;  %v938_v12 = vpack.c.bf16 %v906_v38, %v906_v38 }
 0x1c6   : > { %632 = vst [vmem:[#allocation2 + $0x1a2] sm:$0xff] %v554_v0  ;;  %v952_v61 = vpack.c.bf16 %v554_v0, %v554_v0  ;;  %v999_v0 = vpack.c.bf16 %v967_v24, %v967_v24  ;;  %v903_v24 = vld [vmem:[#allocation2 + $0xda] sm:$0xff] }
 0x1c7   : > { %v2799_v52 = vpop.f32.mrf.mxu2 }
 0x1c8   : > { %v1736_v28 = vunpack.c.l.b16 %v999_v0  ;;  %v4309_v0 = vld [vmem:[#allocation6 + $0x1d8] sm:$0xff] }
 0x1c9   : > { %v2710_v48 = vpop.f32.mrf.mxu1  ;;  %v5095_v44 = vpop.f32.mrf.mxu0 }
 0x1ca   : > { %v2711_v58 = vadd.f32 %v4875_v6, %v2710_v48  ;;  %5966 = vst [vmem:[#allocation24_spill] sm:$0xff] %v5095_v44  ;;  %v5097_v48 = vunpack.c.l.b16 %v951_v59  ;;  %v4311_v59 = vld [vmem:[#allocation6 + $0x1e8] sm:$0xff]  ;;  %v5115_v41 = vpack.c.b16 %v1737_v33, %v1736_v28  ;;  %v4308_v28 = vld [vmem:[#allocation6 + $0x1d0] sm:$0xff] }
 0x1cb   : > { %v904_v44 = vld [vmem:[#allocation2 + $0xe2] sm:$0xff] }
 0x1cc   : > { %2989 = vmatmul.bf16.gmra.mxu0 %v5007_v31  ;;  %v5092_v23 = vadd.f32 %v2799_v52, %v2711_v58  ;;  %3137 = vmatmul.bf16.gmra.mxu2 %v5089_v43  ;;  %v5099_v31 = vunpack.c.l.b16 %v952_v61  ;;  %v1638_v58 = vunpack.c.l.b16 %v933_v49  ;;  %v4312_v52 = vld [vmem:[#allocation6 + $0x1f0] sm:$0xff]  ;;  %v4305_v49 = vld [vmem:[#allocation6 + $0x1b8] sm:$0xff] }
 0x1cd   : > { %3278 = vmatpush.bf16.msra.mxu0 %v4312_v52  ;;  %3188 = vmatpush.bf16.msra.mxu3 %v4305_v49  ;;  %v969_v49 = vld [vmem:[#allocation2 + $0xf4] sm:$0xff] }
 0x1ce   : > { %v5104_v35 = vpack.c.b16 %v1639_v51, %v1638_v58 }
 0x1cf   : > { %v2802_v18 = vpop.f32.mrf.mxu2 }
 0x1d1   : > { %v2713_v57 = vpop.f32.mrf.mxu1  ;;  %3279 = vmatpush.bf16.msra.mxu0 %v4311_v59  ;;  %v5112_v58 = vpop.f32.mrf.mxu0 }
 0x1d2   : > { %v2714_v45 = vadd.f32 %v4875_v6, %v2713_v57  ;;  %5969 = vst [vmem:[#allocation26_spill] sm:$0xff] %v5112_v58  ;;  %v936_v57 = vpack.c.bf16 %v904_v44, %v904_v44  ;;  %v853_v44 = vld [vmem:[#allocation2 + $0x180] sm:$0xff]  ;;  %v854_v58 = vld [vmem:[#allocation2 + $0x188] sm:$0xff] }
 0x1d4   : > { %2821 = vmatmul.bf16.gmra.mxu3 %v5967_v16  ;;  %3048 = vmatmul.bf16.gmra.mxu1 %v5104_v35  ;;  %v5110_v61 = vadd.f32 %v2802_v18, %v2714_v45  ;;  %v935_v18 = vpack.c.bf16 %v903_v24, %v903_v24  ;;  %v1641_v16 = vunpack.c.l.b16 %v936_v57 }
 0x1d5   : > { %3280 = vmatpush.bf16.msra.mxu0 %v4310_v8 }
 0x1d6   : > { %5968 = vst [vmem:[#allocation25_spill] sm:$0xff] %v5110_v61  ;;  %v1640_v59 = vunpack.c.l.b16 %v935_v18  ;;  %v886_v18 = vpack.c.bf16 %v854_v58, %v854_v58 }
 0x1d7   : > { %v2804_v51 = vpop.f32.mrf.mxu2 }
 0x1d8   : > { %v5121_v8 = vpack.c.b16 %v1641_v16, %v1640_v59  ;;  %v761_v59 = vld [vmem:[#allocation2 + $0x4] sm:$0xff]  ;;  %v1559_v36 = vunpack.c.l.b16 %v886_v18 }
 0x1d9   : > { %v2715_v52 = vpop.f32.mrf.mxu1  ;;  %3281 = vmatpush.bf16.msra.mxu0 %v4309_v0  ;;  %v793_v58 = vpack.c.bf16 %v761_v59, %v761_v59  ;;  %v855_v59 = vld [vmem:[#allocation2 + $0x198] sm:$0xff] }
 0x1da   : > { %v2716_v62 = vadd.f32 %v4875_v6, %v2715_v52  ;;  %v970_v6 = vld [vmem:[#allocation2 + $0xfc] sm:$0xff] }
 0x1db   : > { %v5128_v52 = vld [vmem:[%s5943_s5] ss:$0 sm:$0xff]  ;;  %v1002_v0 = vpack.c.bf16 %v970_v6, %v970_v6  ;;  %v905_v6 = vld [vmem:[#allocation2 + $0xf2] sm:$0xff]  ;;  %v1434_v18 = vunpack.c.l.b16 %v793_v58 }
 0x1dc   : > { %2994 = vmatmul.bf16.gmra.mxu0 %v5027_v32  ;;  %v5118_v45 = vadd.f32 %v2804_v51, %v2716_v62  ;;  %3142 = vmatmul.bf16.gmra.mxu2 %v5115_v41  ;;  %v1001_v32 = vpack.c.bf16 %v969_v49, %v969_v49  ;;  %v5123_v51 = vpop.f32.mrf.mxu0  ;;  %v885_v62 = vpack.c.bf16 %v853_v44, %v853_v44  ;;  %v4307_v49 = vld [vmem:[#allocation6 + $0x1c8] sm:$0xff]  ;;  %v4304_v58 = vld [vmem:[#allocation6 + $0x1b0] sm:$0xff] }
 0x1dd   : > { %5971 = vst [vmem:[#allocation28_spill] sm:$0xff] %v5123_v51  ;;  %3282 = vmatpush.bf16.msra.mxu0 %v4308_v28  ;;  %v762_v51 = vld [vmem:[#allocation2 + $0xc] sm:$0xff]  ;;  %v4306_v28 = vld [vmem:[#allocation6 + $0x1c0] sm:$0xff]  ;;  %v937_v22 = vpack.c.bf16 %v905_v6, %v905_v6  ;;  %v887_v6 = vpack.c.bf16 %v855_v59, %v855_v59  ;;  %3189 = vmatpush.bf16.msra.mxu3 %v4304_v58 }
 0x1de   : > { %5970 = vst [vmem:[#allocation27_spill] sm:$0xff] %v5118_v45  ;;  %v1558_v46 = vunpack.c.l.b16 %v885_v62  ;;  %v1738_v9 = vunpack.c.l.b16 %v1001_v32  ;;  %v794_v44 = vpack.c.bf16 %v762_v51, %v762_v51  ;;  %v1643_v51 = vunpack.c.l.b16 %v938_v12  ;;  %v764_v12 = vld [vmem:[#allocation2 + $0x24] sm:$0xff]  ;;  %v913_v45 = vld [vmem:[#allocation2 + $0x152] sm:$0xff] }
 0x1df   : > { %v2807_v24 = vpop.f32.mrf.mxu2  ;;  %v1642_v38 = vunpack.c.l.b16 %v937_v22  ;;  %v1560_v22 = vunpack.c.l.b16 %v887_v6  ;;  %v796_v59 = vpack.c.bf16 %v764_v12, %v764_v12  ;;  %v973_v58 = vld [vmem:[#allocation2 + $0x124] sm:$0xff] }
 0x1e1   : > { %v2718_v33 = vpop.f32.mrf.mxu1  ;;  %3283 = vmatpush.bf16.msra.mxu0 %v4307_v49  ;;  %v971_v49 = vld [vmem:[#allocation2 + $0x10c] sm:$0xff] }
 0x1e2   : > { %v2719_v57 = vadd.f32 %v5128_v52, %v2718_v33  ;;  %v1739_v33 = vunpack.c.l.b16 %v1002_v0  ;;  %v1435_v0 = vunpack.c.l.b16 %v794_v44  ;;  %v763_v44 = vld [vmem:[#allocation2 + $0x1c] sm:$0xff] }
 0x1e4   : > { %2826 = vmatmul.bf16.gmra.mxu3 %v5972_v42  ;;  %3053 = vmatmul.bf16.gmra.mxu1 %v5121_v8  ;;  %v5135_v16 = vadd.f32 %v2807_v24, %v2719_v57  ;;  %v1576_v42 = vpack.c.b16 %v1559_v36, %v1558_v46  ;;  %v5138_v24 = vpack.c.b16 %v1739_v33, %v1738_v9  ;;  %v5140_v62 = vpop.f32.mrf.mxu0  ;;  %v972_v36 = vld [vmem:[#allocation2 + $0x114] sm:$0xff] }
 0x1e5   : > { %3284 = vmatpush.bf16.msra.mxu0 %v4306_v28  ;;  %5974 = vst [vmem:[#allocation30_spill] sm:$0xff] %v5140_v62  ;;  %v1466_v9 = vpack.c.b16 %v1435_v0, %v1434_v18  ;;  %v5147_v33 = vpack.c.b16 %v1643_v51, %v1642_v38  ;;  %v908_v51 = vld [vmem:[#allocation2 + $0x112] sm:$0xff]  ;;  %v795_v38 = vpack.c.bf16 %v763_v44, %v763_v44 }
 0x1e6   : > { %5973 = vst [vmem:[#allocation29_spill] sm:$0xff] %v5135_v16  ;;  %v974_v44 = vld [vmem:[#allocation2 + $0x12c] sm:$0xff] }
 0x1e7   : > { %v2809_v57 = vpop.f32.mrf.mxu2 }
 0x1e9   : > { %v2720_v29 = vpop.f32.mrf.mxu1 }
 0x1ea   : > { %v2721_v17 = vadd.f32 %v5128_v52, %v2720_v29  ;;  %v856_v29 = vld [vmem:[#allocation2 + $0x1a0] sm:$0xff] }
 0x1eb   : > { %v888_v28 = vpack.c.bf16 %v856_v29, %v856_v29  ;;  %v907_v29 = vld [vmem:[#allocation2 + $0x10a] sm:$0xff] }
 0x1ec   : > { %2999 = vmatmul.bf16.gmra.mxu0 %v1576_v42  ;;  %v5142_v32 = vadd.f32 %v2809_v57, %v2721_v17  ;;  %3147 = vmatmul.bf16.gmra.mxu2 %v5138_v24  ;;  %v1003_v42 = vpack.c.bf16 %v971_v49, %v971_v49  ;;  %v1004_v17 = vpack.c.bf16 %v972_v36, %v972_v36  ;;  %v5150_v57 = vpop.f32.mrf.mxu0 }
 0x1ed   : > { %5977 = vst [vmem:[#allocation33_spill] sm:$0xff] %v5150_v57  ;;  %v1561_v62 = vunpack.c.l.b16 %v888_v28  ;;  %v1437_v57 = vunpack.c.l.b16 %v796_v59  ;;  %v939_v6 = vpack.c.bf16 %v907_v29, %v907_v29  ;;  %v4320_v28 = vld [vmem:[#allocation6 + $0x230] sm:$0xff] }
 0x1ee   : > { %5975 = vst [vmem:[#allocation31_spill] sm:$0xff] %v5142_v32  ;;  %v1740_v15 = vunpack.c.l.b16 %v1003_v42  ;;  %v1741_v18 = vunpack.c.l.b16 %v1004_v17  ;;  %v1436_v32 = vunpack.c.l.b16 %v795_v38  ;;  %3367 = vmatpush.bf16.msra.mxu1 %v4320_v28  ;;  %v909_v28 = vld [vmem:[#allocation2 + $0x122] sm:$0xff] }
 0x1ef   : > { %v1577_v36 = vpack.c.b16 %v1561_v62, %v1560_v22  ;;  %v1644_v62 = vunpack.c.l.b16 %v939_v6  ;;  %v941_v6 = vpack.c.bf16 %v909_v28, %v909_v28 }
 0x1f1   : > { %v5145_v46 = vpop.f32.mrf.mxu1 }
 0x1f2   : > { %5976 = vst [vmem:[#allocation32_spill] sm:$0xff] %v5145_v46  ;;  %v5156_v46 = vpack.c.b16 %v1741_v18, %v1740_v15  ;;  %v1005_v18 = vpack.c.bf16 %v973_v58, %v973_v58  ;;  %v975_v58 = vld [vmem:[#allocation2 + $0x13c] sm:$0xff] }
 0x1f4   : > { %2840 = vmatmul.bf16.vlgmr.msrb.gmra.mxu3 %v1466_v9  ;;  %3058 = vmatmul.bf16.gmra.mxu1 %v5147_v33  ;;  %v940_v9 = vpack.c.bf16 %v908_v51, %v908_v51  ;;  %v5161_v12 = vpop.f32.mrf.mxu0  ;;  %v1006_v51 = vpack.c.bf16 %v974_v44, %v974_v44  ;;  %v1742_v38 = vunpack.c.l.b16 %v1005_v18  ;;  %v976_v44 = vld [vmem:[#allocation2 + $0x144] sm:$0xff] }
 0x1f5   : > { %5979 = vst [vmem:[#allocation35_spill] sm:$0xff] %v5161_v12 }
 0x1f6   : > { %v1645_v42 = vunpack.c.l.b16 %v940_v9  ;;  %v1743_v59 = vunpack.c.l.b16 %v1006_v51 }
 0x1f7   : > { %v5152_v0 = vpop.f32.mrf.mxu3 }
 0x1f8   : > { %v5165_v15 = vpack.c.b16 %v1645_v42, %v1644_v62  ;;  %v1646_v62 = vunpack.c.l.b16 %v941_v6  ;;  %v912_v6 = vld [vmem:[#allocation2 + $0x142] sm:$0xff] }
 0x1f9   : > { %v5154_v49 = vpop.f32.mrf.mxu1 }
 0x1fa   : > { %5978 = vst [vmem:[#allocation34_spill] sm:$0xff] %v5154_v49  ;;  %v1467_v49 = vpack.c.b16 %v1437_v57, %v1436_v32  ;;  %v5174_v57 = vpack.c.b16 %v1743_v59, %v1742_v38  ;;  %v5188_v38 = vpop.f32.mrf.mxu2 }
 0x1fb   : > { %5985 = vst [vmem:[#allocation41_spill] sm:$0xff] %v5188_v38 }
 0x1fc   : > { %3004 = vmatmul.bf16.gmra.mxu0 %v1577_v36  ;;  %3152 = vmatmul.bf16.gmra.mxu2 %v5156_v46  ;;  %v910_v36 = vld [vmem:[#allocation2 + $0x12a] sm:$0xff]  ;;  %v5172_v12 = vpop.f32.mrf.mxu0 }
 0x1fd   : > { %5982 = vst [vmem:[#allocation38_spill] sm:$0xff] %v5172_v12  ;;  %v942_v32 = vpack.c.bf16 %v910_v36, %v910_v36  ;;  %v1008_v12 = vpack.c.bf16 %v976_v44, %v976_v44 }
 0x1ff   : > { %v5159_v17 = vpop.f32.mrf.mxu3  ;;  %v1745_v28 = vunpack.c.l.b16 %v1008_v12 }
 0x201   : > { %v5163_v22 = vpop.f32.mrf.mxu1 }
 0x202   : > { %5980 = vst [vmem:[#allocation36_spill] sm:$0xff] %v5163_v22  ;;  %v978_v22 = vld [vmem:[#allocation2 + $0x15c] sm:$0xff]  ;;  %v5202_v38 = vpop.f32.mrf.mxu2 }
 0x203   : > { %5988 = vst [vmem:[#allocation44_spill] sm:$0xff] %v5202_v38 }
 0x204   : > { %2845 = vmatmul.bf16.gmra.mxu3 %v1467_v49  ;;  %3063 = vmatmul.bf16.gmra.mxu1 %v5165_v15  ;;  %v1647_v49 = vunpack.c.l.b16 %v942_v32  ;;  %v5184_v36 = vpop.f32.mrf.mxu0 }
 0x205   : > { %5984 = vst [vmem:[#allocation40_spill] sm:$0xff] %v5184_v36 }
 0x206   : > { %v5182_v51 = vpack.c.b16 %v1647_v49, %v1646_v62  ;;  %v911_v49 = vld [vmem:[#allocation2 + $0x13a] sm:$0xff]  ;;  %v4319_v62 = vld [vmem:[#allocation6 + $0x228] sm:$0xff] }
 0x207   : > { %v5168_v29 = vpop.f32.mrf.mxu3  ;;  %3368 = vmatpush.bf16.msra.mxu1 %v4319_v62 }
 0x209   : > { %v5170_v9 = vpop.f32.mrf.mxu1 }
 0x20a   : > { %5981 = vst [vmem:[#allocation37_spill] sm:$0xff] %v5170_v9  ;;  %v1007_v9 = vpack.c.bf16 %v975_v58, %v975_v58  ;;  %v944_v58 = vpack.c.bf16 %v912_v6, %v912_v6  ;;  %v5214_v38 = vpop.f32.mrf.mxu2 }
 0x20b   : > { %5991 = vst [vmem:[#allocation47_spill] sm:$0xff] %v5214_v38 }
 0x20c   : > { %3285 = vmatmul.bf16.vlgmr.msra.gmra.mxu0 %v5004_v10  ;;  %3157 = vmatmul.bf16.gmra.mxu2 %v5174_v57  ;;  %v4303_v10 = vld [vmem:[#allocation6 + $0x1a8] sm:$0xff]  ;;  %v1744_v59 = vunpack.c.l.b16 %v1007_v9  ;;  %v5198_v36 = vpop.f32.mrf.mxu0  ;;  %v1649_v9 = vunpack.c.l.b16 %v944_v58 }
 0x20d   : > { %3190 = vmatpush.bf16.msra.mxu3 %v4303_v10  ;;  %5987 = vst [vmem:[#allocation43_spill] sm:$0xff] %v5198_v36  ;;  %v977_v10 = vld [vmem:[#allocation2 + $0x154] sm:$0xff] }
 0x20e   : > { %v5194_v44 = vpack.c.b16 %v1745_v28, %v1744_v59  ;;  %v1010_v28 = vpack.c.bf16 %v978_v22, %v978_v22  ;;  %v914_v36 = vld [vmem:[#allocation2 + $0x15a] sm:$0xff] }
 0x20f   : > { %v5178_v42 = vpop.f32.mrf.mxu3 }
 0x210   : > { %v1747_v58 = vunpack.c.l.b16 %v1010_v28 }
 0x211   : > { %v5180_v18 = vpop.f32.mrf.mxu1 }
 0x212   : > { %5983 = vst [vmem:[#allocation39_spill] sm:$0xff] %v5180_v18 }
 0x214   : > { %2850 = vmatmul.bf16.gmra.mxu3 %v4943_v54  ;;  %3068 = vmatmul.bf16.gmra.mxu1 %v5182_v51  ;;  %v943_v54 = vpack.c.bf16 %v911_v49, %v911_v49  ;;  %v5212_v16 = vpop.f32.mrf.mxu0 }
 0x215   : > { %5990 = vst [vmem:[#allocation46_spill] sm:$0xff] %v5212_v16 }
 0x217   : > { %v5190_v32 = vpop.f32.mrf.mxu3 }
 0x219   : > { %v5192_v18 = vpop.f32.mrf.mxu1 }
 0x21a   : > { %5986 = vst [vmem:[#allocation42_spill] sm:$0xff] %v5192_v18  ;;  %v1648_v18 = vunpack.c.l.b16 %v943_v54  ;;  %v946_v54 = vpack.c.bf16 %v914_v36, %v914_v36 }
 0x21c   : > { %3290 = vmatmul.bf16.gmra.mxu0 %v5024_v47  ;;  %3162 = vmatmul.bf16.gmra.mxu2 %v5194_v44  ;;  %v5206_v59 = vpack.c.b16 %v1649_v9, %v1648_v18  ;;  %v1009_v47 = vpack.c.bf16 %v977_v10, %v977_v10  ;;  %v1651_v22 = vunpack.c.l.b16 %v946_v54  ;;  %v979_v10 = vld [vmem:[#allocation2 + $0x16c] sm:$0xff]  ;;  %v5224_v16 = vpop.f32.mrf.mxu0 }
 0x21d   : > { %5993 = vst [vmem:[#allocation49_spill] sm:$0xff] %v5224_v16  ;;  %v1011_v36 = vpack.c.bf16 %v979_v10, %v979_v10 }
 0x21e   : > { %v1746_v49 = vunpack.c.l.b16 %v1009_v47  ;;  %v980_v47 = vld [vmem:[#allocation2 + $0x174] sm:$0xff] }
 0x21f   : > { %v5200_v12 = vpop.f32.mrf.mxu3 }
 0x221   : > { %v5204_v6 = vpop.f32.mrf.mxu1 }
 0x222   : > { %5989 = vst [vmem:[#allocation45_spill] sm:$0xff] %v5204_v6  ;;  %v5216_v6 = vpack.c.b16 %v1747_v58, %v1746_v49  ;;  %v1012_v49 = vpack.c.bf16 %v980_v47, %v980_v47  ;;  %v5228_v58 = vpop.f32.mrf.mxu2 }
 0x223   : > { %5994 = vst [vmem:[#allocation50_spill] sm:$0xff] %v5228_v58 }
 0x224   : > { %2855 = vmatmul.bf16.gmra.mxu3 %v4972_v50  ;;  %3073 = vmatmul.bf16.gmra.mxu1 %v5206_v59  ;;  %v945_v50 = vpack.c.bf16 %v913_v45, %v913_v45  ;;  %v2724_v45 = vadd.f32 %v5128_v52, %v5152_v0  ;;  %v4318_v0 = vld [vmem:[#allocation6 + $0x220] sm:$0xff] }
 0x225   : > { %3369 = vmatpush.bf16.msra.mxu1 %v4318_v0 }
 0x226   : > { %v1650_v28 = vunpack.c.l.b16 %v945_v50  ;;  %v1749_v50 = vunpack.c.l.b16 %v1012_v49 }
 0x227   : > { %v5210_v62 = vpop.f32.mrf.mxu3 }
 0x228   : > { %v5226_v61 = vpack.c.b16 %v1651_v22, %v1650_v28  ;;  %v915_v22 = vld [vmem:[#allocation2 + $0x16a] sm:$0xff]  ;;  %v916_v28 = vld [vmem:[#allocation2 + $0x172] sm:$0xff] }
 0x229   : > { %v5218_v18 = vpop.f32.mrf.mxu1  ;;  %v947_v47 = vpack.c.bf16 %v915_v22, %v915_v22  ;;  %v948_v58 = vpack.c.bf16 %v916_v28, %v916_v28  ;;  %v982_v22 = vld [vmem:[#allocation2 + $0x18c] sm:$0xff] }
 0x22a   : > { %5992 = vst [vmem:[#allocation48_spill] sm:$0xff] %v5218_v18  ;;  %v1748_v18 = vunpack.c.l.b16 %v1011_v36  ;;  %v2726_v36 = vadd.f32 %v5128_v52, %v5159_v17  ;;  %v5246_v49 = vpop.f32.mrf.mxu2  ;;  %v4317_v17 = vld [vmem:[#allocation6 + $0x218] sm:$0xff] }
 0x22b   : > { %5997 = vst [vmem:[#allocation53_spill] sm:$0xff] %v5246_v49  ;;  %3370 = vmatpush.bf16.msra.mxu1 %v4317_v17 }
 0x22c   : > { %3295 = vmatmul.bf16.gmra.mxu0 %v5051_v19  ;;  %3167 = vmatmul.bf16.gmra.mxu2 %v5216_v6  ;;  %v4302_v19 = vld [vmem:[#allocation6 + $0x1a0] sm:$0xff]  ;;  %v5238_v38 = vpack.c.b16 %v1749_v50, %v1748_v18 }
 0x22d   : > { %3191 = vmatpush.bf16.msra.mxu3 %v4302_v19  ;;  %v1652_v19 = vunpack.c.l.b16 %v947_v47 }
 0x22f   : > { %v5222_v9 = vpop.f32.mrf.mxu3 }
 0x231   : > { %v5234_v54 = vpop.f32.mrf.mxu1 }
 0x232   : > { %5995 = vst [vmem:[#allocation51_spill] sm:$0xff] %v5234_v54  ;;  %v1653_v54 = vunpack.c.l.b16 %v948_v58  ;;  %v2729_v58 = vadd.f32 %v5128_v52, %v5168_v29  ;;  %v2731_v29 = vadd.f32 %v5128_v52, %v5178_v42  ;;  %v6001_v42 = vpack.c.b16 %v5071_v21, %v5069_v39 }
 0x234   : > { %2860 = vmatmul.bf16.gmra.mxu3 %v4994_v34  ;;  %3078 = vmatmul.bf16.gmra.mxu1 %v5226_v61  ;;  %v5240_v34 = vpop.f32.mrf.mxu0  ;;  %v5252_v28 = vpack.c.b16 %v1653_v54, %v1652_v19  ;;  %v4316_v19 = vld [vmem:[#allocation6 + $0x210] sm:$0xff] }
 0x235   : > { %5996 = vst [vmem:[#allocation52_spill] sm:$0xff] %v5240_v34  ;;  %v1014_v34 = vpack.c.bf16 %v982_v22, %v982_v22  ;;  %3371 = vmatpush.bf16.msra.mxu1 %v4316_v19  ;;  %v983_v22 = vld [vmem:[#allocation2 + $0x19c] sm:$0xff] }
 0x236   : > { %v4301_v19 = vld [vmem:[#allocation6 + $0x198] sm:$0xff] }
 0x237   : > { %v2812_v16 = vpop.f32.mrf.mxu3  ;;  %v1751_v49 = vunpack.c.l.b16 %v1014_v34  ;;  %3192 = vmatpush.bf16.msra.mxu3 %v4301_v19  ;;  %v1146_v19 = vld [vmem:[#allocation2 + $0x64] sm:$0xff] }
 0x238   : > { %v5236_v10 = vadd.f32 %v2812_v16, %v2724_v45  ;;  %v981_v45 = vld [vmem:[#allocation2 + $0x184] sm:$0xff] }
 0x239   : > { %v5248_v18 = vpop.f32.mrf.mxu1 }
 0x23a   : > { %5998 = vst [vmem:[#allocation54_spill] sm:$0xff] %v5248_v18 }
 0x23c   : > { %3300 = vmatmul.bf16.gmra.mxu0 %v5077_v2  ;;  %3172 = vmatmul.bf16.gmra.mxu2 %v5238_v38  ;;  %v1013_v2 = vpack.c.bf16 %v981_v45, %v981_v45  ;;  %v5258_v47 = vpop.f32.mrf.mxu0  ;;  %v4315_v45 = vld [vmem:[#allocation6 + $0x208] sm:$0xff] }
 0x23d   : > { %5999 = vst [vmem:[#allocation55_spill] sm:$0xff] %v5258_v47  ;;  %3372 = vmatpush.bf16.msra.mxu1 %v4315_v45 }
 0x23e   : > { %v1750_v0 = vunpack.c.l.b16 %v1013_v2  ;;  %v984_v2 = vld [vmem:[#allocation2 + $0x1a4] sm:$0xff] }
 0x23f   : > { %v2814_v16 = vpop.f32.mrf.mxu3 }
 0x240   : > { %v5250_v50 = vadd.f32 %v2814_v16, %v2726_v36  ;;  %v5260_v36 = vpop.f32.mrf.mxu2 }
 0x241   : > { %v5264_v16 = vpop.f32.mrf.mxu1 }
 0x244   : > { %2865 = vmatmul.bf16.gmra.mxu3 %v5016_v63  ;;  %3083 = vmatmul.bf16.gmra.mxu1 %v5252_v28  ;;  %v1768_v63 = vpack.c.b16 %v1751_v49, %v1750_v0  ;;  %v5269_v17 = vpop.f32.mrf.mxu0  ;;  %v1015_v49 = vpack.c.bf16 %v983_v22, %v983_v22  ;;  %v1016_v0 = vpack.c.bf16 %v984_v2, %v984_v2 }
 0x245   : > { %6000 = vst [vmem:[#allocation56_spill] sm:$0xff] %v5269_v17 }
 0x246   : > { %v1752_v45 = vunpack.c.l.b16 %v1015_v49 }
 0x247   : > { %v2817_v18 = vpop.f32.mrf.mxu3 }
 0x248   : > { %v5262_v54 = vadd.f32 %v2817_v18, %v2729_v58  ;;  %v4314_v58 = vld [vmem:[#allocation6 + $0x200] sm:$0xff]  ;;  %v5273_v47 = vpop.f32.mrf.mxu2 }
 0x249   : > { %3373 = vmatpush.bf16.msra.mxu1 %v4314_v58 }
 0x24c   : > { %3305 = vmatmul.bf16.gmra.mxu0 %v5104_v35  ;;  %3177 = vmatmul.bf16.gmra.mxu2 %v1768_v63  ;;  %v5275_v35 = vpop.f32.mrf.mxu1  ;;  %v2734_v63 = vadd.f32 %v5128_v52, %v5190_v32  ;;  %v5285_v22 = vpop.f32.mrf.mxu0 }
 0x24d   : > { %6002 = vst [vmem:[#allocation57_spill] sm:$0xff] %v5285_v22 }
 0x24f   : > { %v2819_v34 = vpop.f32.mrf.mxu3 }
 0x250   : > { %v5271_v18 = vadd.f32 %v2819_v34, %v2731_v29  ;;  %v1753_v29 = vunpack.c.l.b16 %v1016_v0  ;;  %v5289_v58 = vpop.f32.mrf.mxu2  ;;  %v6004_v0 = vpack.c.b16 %v5099_v31, %v5097_v48  ;;  %v2741_v48 = vadd.f32 %v5128_v52, %v5222_v9 }
 0x252   : > { %v5287_v2 = vpack.c.b16 %v1753_v29, %v1752_v45  ;;  %v1178_v29 = vpack.c.bf16 %v1146_v19, %v1146_v19  ;;  %v4300_v19 = vld [vmem:[#allocation6 + $0x190] sm:$0xff] }
 0x253   : > { %3193 = vmatpush.bf16.msra.mxu3 %v4300_v19  ;;  %v1150_v19 = vld [vmem:[#allocation2 + $0x94] sm:$0xff] }
 0x254   : > { %2870 = vmatmul.bf16.gmra.mxu3 %v5036_v14  ;;  %3088 = vmatmul.bf16.gmra.mxu1 %v6001_v42  ;;  %v2736_v14 = vadd.f32 %v5128_v52, %v5200_v12  ;;  %v5295_v39 = vpop.f32.mrf.mxu1  ;;  %v5299_v49 = vpop.f32.mrf.mxu0 }
 0x255   : > { %6003 = vst [vmem:[#allocation58_spill] sm:$0xff] %v5299_v49 }
 0x257   : > { %v2822_v34 = vpop.f32.mrf.mxu3 }
 0x258   : > { %v5283_v17 = vadd.f32 %v2822_v34, %v2734_v63  ;;  %v1147_v63 = vld [vmem:[#allocation2 + $0x6c] sm:$0xff] }
 0x259   : > { %v1179_v34 = vpack.c.bf16 %v1147_v63, %v1147_v63  ;;  %v1148_v63 = vld [vmem:[#allocation2 + $0x7c] sm:$0xff] }
 0x25a   : > { %v1180_v9 = vpack.c.bf16 %v1148_v63, %v1148_v63 }
 0x25c   : > { %3310 = vmatmul.bf16.gmra.mxu0 %v5121_v8  ;;  %3182 = vmatmul.bf16.gmra.mxu2 %v5287_v2  ;;  %v2739_v8 = vadd.f32 %v5128_v52, %v5210_v62  ;;  %v5307_v12 = vpop.f32.mrf.mxu1  ;;  %v5317_v31 = vpop.f32.mrf.mxu0  ;;  %v2010_v62 = vunpack.c.l.b16 %v1178_v29 }
 0x25d   : > { %6005 = vst [vmem:[#allocation59_spill] sm:$0xff] %v5317_v31 }
 0x25f   : > { %v2824_v21 = vpop.f32.mrf.mxu3 }
 0x260   : > { %v5297_v32 = vadd.f32 %v2824_v21, %v2736_v14  ;;  %v2011_v14 = vunpack.c.l.b16 %v1179_v34 }
 0x264   : > { %2875 = vmatmul.bf16.gmra.mxu3 %v5063_v56  ;;  %3093 = vmatmul.bf16.gmra.mxu1 %v6004_v0  ;;  %v4329_v56 = vld [vmem:[%s5941_s3 + $0x38] sm:$0xff]  ;;  %v5324_v49 = vpop.f32.mrf.mxu0 }
 0x265   : > { %3571 = vmatpush.bf16.msra.mxu2 %v4329_v56  ;;  %v1149_v56 = vld [vmem:[#allocation2 + $0x84] sm:$0xff]  ;;  %6006 = vst [vmem:[#allocation60_spill] sm:$0xff] %v5324_v49 }
 0x266   : > { %v1181_v29 = vpack.c.bf16 %v1149_v56, %v1149_v56  ;;  %v1182_v56 = vpack.c.bf16 %v1150_v19, %v1150_v19 }
 0x267   : > { %v2827_v42 = vpop.f32.mrf.mxu3 }
 0x268   : > { %v5309_v45 = vadd.f32 %v2827_v42, %v2739_v8  ;;  %v5321_v8 = vpop.f32.mrf.mxu1  ;;  %v2042_v42 = vpack.c.b16 %v2011_v14, %v2010_v62  ;;  %v2013_v62 = vunpack.c.l.b16 %v1181_v29 }
 0x26c   : > { %3315 = vmatmul.bf16.gmra.mxu0 %v5147_v33  ;;  %v5334_v14 = vpop.f32.mrf.mxu0 }
 0x26d   : > { %6008 = vst [vmem:[#allocation62_spill] sm:$0xff] %v5334_v14 }
 0x26f   : > { %v2829_v21 = vpop.f32.mrf.mxu3 }
 0x270   : > { %v5319_v0 = vadd.f32 %v2829_v21, %v2741_v48  ;;  %v5329_v34 = vpop.f32.mrf.mxu1  ;;  %v2012_v48 = vunpack.c.l.b16 %v1180_v9  ;;  %v4328_v9 = vld [vmem:[%s5941_s3 + $0x30] sm:$0xff] }
 0x271   : > { %6007 = vst [vmem:[#allocation61_spill] sm:$0xff] %v5329_v34  ;;  %3572 = vmatpush.bf16.msra.mxu2 %v4328_v9 }
 0x272   : > { %v2043_v21 = vpack.c.b16 %v2013_v62, %v2012_v48 }
 0x274   : > { %2880 = vmatmul.bf16.gmra.mxu3 %v5089_v43  ;;  %3374 = vmatmul.bf16.vlgmr.msra.gmra.mxu1 %v2042_v42  ;;  %v5345_v29 = vpop.f32.mrf.mxu0 }
 0x275   : > { %6010 = vst [vmem:[#allocation64_spill] sm:$0xff] %v5345_v29  ;;  %v1153_v29 = vld [vmem:[#allocation2 + $0xb4] sm:$0xff] }
 0x276   : > { %v1185_v9 = vpack.c.bf16 %v1153_v29, %v1153_v29 }
 0x277   : > { %v2841_v33 = vpop.f32.mrf.mxu3 }
 0x278   : > { %v5327_v52 = vadd.f32 %v2841_v33, %v4879_v13  ;;  %v5337_v42 = vpop.f32.mrf.mxu1  ;;  %v1151_v33 = vld [vmem:[#allocation2 + $0x9c] sm:$0xff] }
 0x279   : > { %6009 = vst [vmem:[#allocation63_spill] sm:$0xff] %v5337_v42 }
 0x27c   : > { %3320 = vmatmul.bf16.gmra.mxu0 %v5165_v15  ;;  %v1183_v15 = vpack.c.bf16 %v1151_v33, %v1151_v33  ;;  %v1152_v33 = vld [vmem:[#allocation2 + $0xac] sm:$0xff] }
 0x27e   : > { %v2015_v48 = vunpack.c.l.b16 %v1183_v15  ;;  %v1184_v15 = vpack.c.bf16 %v1152_v33, %v1152_v33  ;;  %v1155_v33 = vld [vmem:[#allocation2 + $0xcc] sm:$0xff] }
 0x27f   : > { %v5332_v43 = vpop.f32.mrf.mxu3 }
 0x284   : > { %2885 = vmatmul.bf16.gmra.mxu3 %v5115_v41  ;;  %3379 = vmatmul.bf16.gmra.mxu1 %v2043_v21  ;;  %v2014_v41 = vunpack.c.l.b16 %v1182_v56  ;;  %v5350_v21 = vpop.f32.mrf.mxu1 }
 0x285   : > { %6011 = vst [vmem:[#allocation65_spill] sm:$0xff] %v5350_v21 }
 0x286   : > { %v2044_v14 = vpack.c.b16 %v2015_v48, %v2014_v41  ;;  %v2016_v41 = vunpack.c.l.b16 %v1184_v15  ;;  %v2017_v48 = vunpack.c.l.b16 %v1185_v9  ;;  %v1187_v9 = vpack.c.bf16 %v1155_v33, %v1155_v33 }
 0x287   : > { %v2846_v13 = vpop.f32.mrf.mxu3 }
 0x288   : > { %v5340_v63 = vadd.f32 %v2846_v13, %v4891_v26  ;;  %v4299_v26 = vld [vmem:[#allocation6 + $0x188] sm:$0xff]  ;;  %v5353_v13 = vpop.f32.mrf.mxu0 }
 0x289   : > { %6012 = vst [vmem:[#allocation66_spill] sm:$0xff] %v5353_v13  ;;  %3194 = vmatpush.bf16.msra.mxu3 %v4299_v26  ;;  %v2045_v26 = vpack.c.b16 %v2017_v48, %v2016_v41  ;;  %v2019_v48 = vunpack.c.l.b16 %v1187_v9 }
 0x28c   : > { %3325 = vmatmul.bf16.gmra.mxu0 %v5182_v51  ;;  %v5358_v56 = vpop.f32.mrf.mxu1 }
 0x28d   : > { %6013 = vst [vmem:[#allocation67_spill] sm:$0xff] %v5358_v56 }
 0x28f   : > { %v5348_v62 = vpop.f32.mrf.mxu3 }
 0x294   : > { %2890 = vmatmul.bf16.gmra.mxu3 %v5138_v24  ;;  %3384 = vmatmul.bf16.gmra.mxu1 %v2044_v14  ;;  %v5361_v14 = vpop.f32.mrf.mxu0  ;;  %v5366_v49 = vpop.f32.mrf.mxu1 }
 0x295   : > { %6014 = vst [vmem:[#allocation68_spill] sm:$0xff] %v5361_v14 }
 0x296   : > { %6015 = vst [vmem:[#allocation69_spill] sm:$0xff] %v5366_v49 }
 0x297   : > { %v2851_v19 = vpop.f32.mrf.mxu3 }
 0x298   : > { %v5356_v51 = vadd.f32 %v2851_v19, %v4922_v60  ;;  %v1154_v19 = vld [vmem:[#allocation2 + $0xc4] sm:$0xff] }
 0x299   : > { %v1186_v15 = vpack.c.bf16 %v1154_v19, %v1154_v19  ;;  %v4298_v19 = vld [vmem:[#allocation6 + $0x180] sm:$0xff] }
 0x29a   : > { %3195 = vmatpush.bf16.msra.mxu3 %v4298_v19 }
 0x29c   : > { %3330 = vmatmul.bf16.gmra.mxu0 %v5206_v59  ;;  %v5372_v59 = vpop.f32.mrf.mxu0  ;;  %v5378_v41 = vpop.f32.mrf.mxu1 }
 0x29d   : > { %6016 = vst [vmem:[#allocation70_spill] sm:$0xff] %v5372_v59  ;;  %v1156_v59 = vld [vmem:[#allocation2 + $0xdc] sm:$0xff] }
 0x29e   : > { %6017 = vst [vmem:[#allocation71_spill] sm:$0xff] %v5378_v41  ;;  %v1188_v9 = vpack.c.bf16 %v1156_v59, %v1156_v59 }
 0x29f   : > { %v2853_v24 = vpop.f32.mrf.mxu3 }
 0x2a0   : > { %v5364_v13 = vadd.f32 %v2853_v24, %v4927_v11  ;;  %v4327_v11 = vld [vmem:[%s5941_s3 + $0x28] sm:$0xff] }
 0x2a1   : > { %3573 = vmatpush.bf16.msra.mxu2 %v4327_v11 }
 0x2a4   : > { %2895 = vmatmul.bf16.gmra.mxu3 %v5156_v46  ;;  %3389 = vmatmul.bf16.gmra.mxu1 %v2045_v26  ;;  %v2018_v46 = vunpack.c.l.b16 %v1186_v15  ;;  %v5386_v11 = vpop.f32.mrf.mxu1 }
 0x2a5   : > { %6019 = vst [vmem:[#allocation73_spill] sm:$0xff] %v5386_v11 }
 0x2a7   : > { %v2856_v60 = vpop.f32.mrf.mxu3 }
 0x2a8   : > { %v5370_v29 = vadd.f32 %v2856_v60, %v4934_v40  ;;  %v2046_v40 = vpack.c.b16 %v2019_v48, %v2018_v46  ;;  %v5383_v60 = vpop.f32.mrf.mxu0  ;;  %v2020_v46 = vunpack.c.l.b16 %v1188_v9  ;;  %v1159_v9 = vld [vmem:[#allocation2 + $0xfc] sm:$0xff] }
 0x2a9   : > { %6018 = vst [vmem:[#allocation72_spill] sm:$0xff] %v5383_v60  ;;  %v1191_v41 = vpack.c.bf16 %v1159_v9, %v1159_v9 }
 0x2ac   : > { %3335 = vmatmul.bf16.gmra.mxu0 %v5226_v61  ;;  %v1157_v61 = vld [vmem:[#allocation2 + $0xe4] sm:$0xff]  ;;  %v5397_v60 = vpop.f32.mrf.mxu1 }
 0x2ad   : > { %v1189_v14 = vpack.c.bf16 %v1157_v61, %v1157_v61  ;;  %6020 = vst [vmem:[#allocation74_spill] sm:$0xff] %v5397_v60  ;;  %v1158_v61 = vld [vmem:[#allocation2 + $0xf4] sm:$0xff] }
 0x2af   : > { %v2858_v24 = vpop.f32.mrf.mxu3  ;;  %v2021_v48 = vunpack.c.l.b16 %v1189_v14 }
 0x2b0   : > { %v5381_v26 = vadd.f32 %v2858_v24, %v4949_v3  ;;  %v5392_v3 = vpop.f32.mrf.mxu0  ;;  %v1106_v24 = vld [vmem:[#allocation2 + $0x182] sm:$0xff] }
 0x2b1   : > { %v2047_v31 = vpack.c.b16 %v2021_v48, %v2020_v46  ;;  %v1138_v22 = vpack.c.bf16 %v1106_v24, %v1106_v24  ;;  %v4326_v46 = vld [vmem:[%s5941_s3 + $0x20] sm:$0xff] }
 0x2b2   : > { %3574 = vmatpush.bf16.msra.mxu2 %v4326_v46  ;;  %v1108_v24 = vld [vmem:[#allocation2 + $0x19a] sm:$0xff] }
 0x2b3   : > { %v1938_v59 = vunpack.c.l.b16 %v1138_v22  ;;  %v2023_v22 = vunpack.c.l.b16 %v1191_v41  ;;  %v1160_v41 = vld [vmem:[#allocation2 + $0x10c] sm:$0xff]  ;;  %v1161_v46 = vld [vmem:[#allocation2 + $0x114] sm:$0xff] }
 0x2b4   : > { %2900 = vmatmul.bf16.gmra.mxu3 %v5174_v57  ;;  %3394 = vmatmul.bf16.gmra.mxu1 %v2046_v40  ;;  %v1107_v40 = vld [vmem:[#allocation2 + $0x18a] sm:$0xff]  ;;  %v5408_v48 = vpop.f32.mrf.mxu1  ;;  %v1193_v60 = vpack.c.bf16 %v1161_v46, %v1161_v46 }
 0x2b5   : > { %6021 = vst [vmem:[#allocation75_spill] sm:$0xff] %v5408_v48 }
 0x2b7   : > { %v2861_v33 = vpop.f32.mrf.mxu3 }
 0x2b8   : > { %v5389_v15 = vadd.f32 %v2861_v33, %v4964_v30  ;;  %v1139_v30 = vpack.c.bf16 %v1107_v40, %v1107_v40  ;;  %v5400_v14 = vpop.f32.mrf.mxu0  ;;  %v1109_v40 = vld [vmem:[#allocation2 + $0x1a2] sm:$0xff] }
 0x2bc   : > { %3340 = vmatmul.bf16.gmra.mxu0 %v5252_v28  ;;  %v1939_v28 = vunpack.c.l.b16 %v1139_v30 }
 0x2bf   : > { %v2863_v57 = vpop.f32.mrf.mxu3 }
 0x2c0   : > { %v5395_v19 = vadd.f32 %v2863_v57, %v4977_v55  ;;  %v1958_v55 = vpack.c.b16 %v1939_v28, %v1938_v59  ;;  %v1190_v57 = vpack.c.bf16 %v1158_v61, %v1158_v61  ;;  %v1140_v28 = vpack.c.bf16 %v1108_v24, %v1108_v24  ;;  %v5416_v61 = vpop.f32.mrf.mxu1 }
 0x2c1   : > { %6022 = vst [vmem:[#allocation76_spill] sm:$0xff] %v5416_v61  ;;  %v1165_v61 = vld [vmem:[#allocation2 + $0x144] sm:$0xff] }
 0x2c2   : > { %v1940_v9 = vunpack.c.l.b16 %v1140_v28  ;;  %v1019_v28 = vld [vmem:[#allocation2 + $0x68] sm:$0xff] }
 0x2c4   : > { %2905 = vmatmul.bf16.gmra.mxu3 %v5194_v44  ;;  %3399 = vmatmul.bf16.gmra.mxu1 %v2047_v31  ;;  %v2022_v44 = vunpack.c.l.b16 %v1190_v57 }
 0x2c6   : > { %v2048_v59 = vpack.c.b16 %v2023_v22, %v2022_v44  ;;  %v2025_v22 = vunpack.c.l.b16 %v1193_v60  ;;  %v1051_v60 = vpack.c.bf16 %v1019_v28, %v1019_v28 }
 0x2c7   : > { %v2866_v33 = vpop.f32.mrf.mxu3 }
 0x2c8   : > { %v5403_v11 = vadd.f32 %v2866_v33, %v4985_v25  ;;  %v5413_v25 = vpop.f32.mrf.mxu0  ;;  %v1141_v33 = vpack.c.bf16 %v1109_v40, %v1109_v40  ;;  %v5423_v24 = vpop.f32.mrf.mxu1 }
 0x2c9   : > { %6023 = vst [vmem:[#allocation77_spill] sm:$0xff] %v5423_v24 }
 0x2cc   : > { %3345 = vmatmul.bf16.gmra.mxu0 %v1958_v55  ;;  %v1941_v55 = vunpack.c.l.b16 %v1141_v33  ;;  %v1162_v33 = vld [vmem:[#allocation2 + $0x124] sm:$0xff] }
 0x2cd   : > { %v1194_v46 = vpack.c.bf16 %v1162_v33, %v1162_v33  ;;  %v1021_v33 = vld [vmem:[#allocation2 + $0x80] sm:$0xff] }
 0x2cf   : > { %v2868_v31 = vpop.f32.mrf.mxu3 }
 0x2d0   : > { %v5411_v30 = vadd.f32 %v2868_v31, %v4999_v27  ;;  %v1959_v27 = vpack.c.b16 %v1941_v55, %v1940_v9  ;;  %v1192_v31 = vpack.c.bf16 %v1160_v41, %v1160_v41  ;;  %v5421_v49 = vpop.f32.mrf.mxu0  ;;  %v1163_v9 = vld [vmem:[#allocation2 + $0x12c] sm:$0xff]  ;;  %v5432_v41 = vpop.f32.mrf.mxu1 }
 0x2d1   : > { %6024 = vst [vmem:[#allocation78_spill] sm:$0xff] %v5432_v41 }
 0x2d2   : > { %v2024_v44 = vunpack.c.l.b16 %v1192_v31 }
 0x2d4   : > { %2910 = vmatmul.bf16.gmra.mxu3 %v5216_v6  ;;  %3404 = vmatmul.bf16.gmra.mxu1 %v2048_v59  ;;  %v2049_v59 = vpack.c.b16 %v2025_v22, %v2024_v44  ;;  %v2026_v44 = vunpack.c.l.b16 %v1194_v46  ;;  %v1053_v46 = vpack.c.bf16 %v1021_v33, %v1021_v33  ;;  %v1166_v33 = vld [vmem:[#allocation2 + $0x154] sm:$0xff] }
 0x2d7   : > { %v2871_v57 = vpop.f32.mrf.mxu3 }
 0x2d8   : > { %v5419_v48 = vadd.f32 %v2871_v57, %v5011_v20  ;;  %v1018_v57 = vld [vmem:[#allocation2 + $0x60] sm:$0xff]  ;;  %v5440_v41 = vpop.f32.mrf.mxu1 }
 0x2d9   : > { %v1050_v31 = vpack.c.bf16 %v1018_v57, %v1018_v57  ;;  %6025 = vst [vmem:[#allocation79_spill] sm:$0xff] %v5440_v41 }
 0x2dc   : > { %3350 = vmatmul.bf16.gmra.mxu0 %v1959_v27  ;;  %v1195_v27 = vpack.c.bf16 %v1163_v9, %v1163_v9  ;;  %v1164_v9 = vld [vmem:[#allocation2 + $0x13c] sm:$0xff] }
 0x2de   : > { %v2027_v22 = vunpack.c.l.b16 %v1195_v27  ;;  %v1196_v27 = vpack.c.bf16 %v1164_v9, %v1164_v9  ;;  %v1167_v9 = vld [vmem:[#allocation2 + $0x15c] sm:$0xff] }
 0x2df   : > { %v2873_v6 = vpop.f32.mrf.mxu3 }
 0x2e0   : > { %v5426_v40 = vadd.f32 %v2873_v6, %v5019_v4  ;;  %v4325_v4 = vld [vmem:[%s5941_s3 + $0x18] sm:$0xff]  ;;  %v2050_v24 = vpack.c.b16 %v2027_v22, %v2026_v44 }
 0x2e1   : > { %3575 = vmatpush.bf16.msra.mxu2 %v4325_v4  ;;  %v1197_v4 = vpack.c.bf16 %v1165_v61, %v1165_v61 }
 0x2e3   : > { %v2029_v44 = vunpack.c.l.b16 %v1197_v4  ;;  %v1198_v4 = vpack.c.bf16 %v1166_v33, %v1166_v33  ;;  %v1025_v33 = vld [vmem:[#allocation2 + $0xb0] sm:$0xff] }
 0x2e4   : > { %2915 = vmatmul.bf16.gmra.mxu3 %v5238_v38  ;;  %3409 = vmatmul.bf16.gmra.mxu1 %v2049_v59  ;;  %v1819_v38 = vunpack.c.l.b16 %v1051_v60  ;;  %v1020_v60 = vld [vmem:[#allocation2 + $0x78] sm:$0xff] }
 0x2e7   : > { %v2876_v20 = vpop.f32.mrf.mxu3 }
 0x2e8   : > { %v5430_v55 = vadd.f32 %v2876_v20, %v5031_v37  ;;  %v1818_v37 = vunpack.c.l.b16 %v1050_v31  ;;  %v1821_v31 = vunpack.c.l.b16 %v1053_v46  ;;  %v1022_v46 = vld [vmem:[#allocation2 + $0x90] sm:$0xff] }
 0x2ea   : > { %v1850_v20 = vpack.c.b16 %v1819_v38, %v1818_v37  ;;  %v2028_v38 = vunpack.c.l.b16 %v1196_v27 }
 0x2ec   : > { %v2051_v41 = vpack.c.b16 %v2029_v44, %v2028_v38 }
 0x2ef   : > { %v2878_v6 = vpop.f32.mrf.mxu3 }
 0x2f0   : > { %v5438_v59 = vadd.f32 %v2878_v6, %v5039_v7  ;;  %v1052_v7 = vpack.c.bf16 %v1020_v60, %v1020_v60  ;;  %v5445_v6 = vpop.f32.mrf.mxu1 }
 0x2f1   : > { %6027 = vst [vmem:[#allocation81_spill] sm:$0xff] %v5445_v6  ;;  %v1199_v6 = vpack.c.bf16 %v1167_v9, %v1167_v9  ;;  %v1168_v9 = vld [vmem:[#allocation2 + $0x16c] sm:$0xff] }
 0x2f2   : > { %v1820_v37 = vunpack.c.l.b16 %v1052_v7  ;;  %v1054_v7 = vpack.c.bf16 %v1022_v46, %v1022_v46  ;;  %v6033_v46 = vld [vmem:[#allocation25_spill] sm:$0xff] }
 0x2f3   : > { %v2031_v38 = vunpack.c.l.b16 %v1199_v6  ;;  %v1057_v6 = vpack.c.bf16 %v1025_v33, %v1025_v33 }
 0x2f4   : > { %3196 = vmatmul.bf16.vlgmr.msra.gmra.mxu3 %v1850_v20  ;;  %3414 = vmatmul.bf16.gmra.mxu1 %v2050_v24  ;;  %v1851_v20 = vpack.c.b16 %v1821_v31, %v1820_v37  ;;  %v2030_v31 = vunpack.c.l.b16 %v1198_v4  ;;  %v1822_v37 = vunpack.c.l.b16 %v1054_v7  ;;  %v1200_v4 = vpack.c.bf16 %v1168_v9, %v1168_v9  ;;  %v1027_v9 = vld [vmem:[#allocation2 + $0xc8] sm:$0xff] }
 0x2f7   : > { %v2881_v28 = vpop.f32.mrf.mxu3 }
 0x2f8   : > { %v5443_v57 = vadd.f32 %v2881_v28, %v5057_v5  ;;  %v1023_v28 = vld [vmem:[#allocation2 + $0x98] sm:$0xff]  ;;  %v5450_v61 = vpop.f32.mrf.mxu1 }
 0x2f9   : > { %6029 = vst [vmem:[#allocation83_spill] sm:$0xff] %v5450_v61  ;;  %v1055_v27 = vpack.c.bf16 %v1023_v28, %v1023_v28  ;;  %v1169_v61 = vld [vmem:[#allocation2 + $0x174] sm:$0xff] }
 0x2fa   : > { %6026 = vst [vmem:[#allocation80_spill] sm:$0xff] %v5443_v57  ;;  %v1201_v56 = vpack.c.bf16 %v1169_v61, %v1169_v61 }
 0x2ff   : > { %v2883_v22 = vpop.f32.mrf.mxu3 }
 0x300   : > { %v5448_v24 = vadd.f32 %v2883_v22, %v5066_v53  ;;  %v4324_v53 = vld [vmem:[%s5941_s3 + $0x10] sm:$0xff] }
 0x301   : > { %3576 = vmatpush.bf16.msra.mxu2 %v4324_v53 }
 0x302   : > { %6028 = vst [vmem:[#allocation82_spill] sm:$0xff] %v5448_v24  ;;  %v6057_v24 = vld [vmem:[#allocation17_spill] sm:$0xff] }
 0x304   : > { %3201 = vmatmul.bf16.gmra.mxu3 %v1851_v20  ;;  %3419 = vmatmul.bf16.gmra.mxu1 %v2051_v41  ;;  %v1823_v41 = vunpack.c.l.b16 %v1055_v27  ;;  %v1024_v27 = vld [vmem:[#allocation2 + $0xa8] sm:$0xff] }
 0x305   : > { %v1056_v7 = vpack.c.bf16 %v1024_v27, %v1024_v27  ;;  %v1171_v27 = vld [vmem:[#allocation2 + $0x18c] sm:$0xff] }
 0x306   : > { %v1852_v20 = vpack.c.b16 %v1823_v41, %v1822_v37  ;;  %v1825_v41 = vunpack.c.l.b16 %v1057_v6  ;;  %v6038_v6 = vld [vmem:[#allocation29_spill] sm:$0xff] }
 0x307   : > { %v2886_v5 = vpop.f32.mrf.mxu3 }
 0x308   : > { %v5453_v60 = vadd.f32 %v2886_v5, %v5085_v1  ;;  %v5461_v1 = vpop.f32.mrf.mxu1  ;;  %v2052_v5 = vpack.c.b16 %v2031_v38, %v2030_v31  ;;  %v2032_v31 = vunpack.c.l.b16 %v1200_v4  ;;  %v2033_v38 = vunpack.c.l.b16 %v1201_v56  ;;  %v1026_v56 = vld [vmem:[#allocation2 + $0xc0] sm:$0xff] }
 0x309   : > { %6032 = vst [vmem:[#allocation86_spill] sm:$0xff] %v5461_v1  ;;  %v1824_v1 = vunpack.c.l.b16 %v1056_v7 }
 0x30a   : > { %6030 = vst [vmem:[#allocation84_spill] sm:$0xff] %v5453_v60 }
 0x30f   : > { %v2888_v44 = vpop.f32.mrf.mxu3 }
 0x310   : > { %v5459_v22 = vadd.f32 %v2888_v44, %v5092_v23  ;;  %v5466_v23 = vpop.f32.mrf.mxu1  ;;  %v5468_v44 = vpop.f32.mrf.mxu2 }
 0x311   : > { %6035 = vst [vmem:[#allocation87_spill] sm:$0xff] %v5466_v23 }
 0x312   : > { %6031 = vst [vmem:[#allocation85_spill] sm:$0xff] %v5459_v22  ;;  %v1853_v22 = vpack.c.b16 %v1825_v41, %v1824_v1  ;;  %v1058_v1 = vpack.c.bf16 %v1026_v56, %v1026_v56 }
 0x314   : > { %3206 = vmatmul.bf16.gmra.mxu3 %v1852_v20  ;;  %3424 = vmatmul.bf16.gmra.mxu1 %v2052_v5  ;;  %v6036_v20 = vld [vmem:[#allocation27_spill] sm:$0xff] }
 0x317   : > { %v2891_v28 = vpop.f32.mrf.mxu3 }
 0x318   : > { %v5464_v53 = vadd.f32 %v2891_v28, %v6033_v46  ;;  %v2053_v28 = vpack.c.b16 %v2033_v38, %v2032_v31  ;;  %v5473_v33 = vpop.f32.mrf.mxu1  ;;  %v1170_v46 = vld [vmem:[#allocation2 + $0x184] sm:$0xff]  ;;  %v5475_v23 = vpop.f32.mrf.mxu2 }
 0x31a   : > { %6034 = vst [vmem:[#allocation25_spill] sm:$0xff] %v5464_v53  ;;  %v1059_v53 = vpack.c.bf16 %v1027_v9, %v1027_v9 }
 0x31c   : > { %v1827_v7 = vunpack.c.l.b16 %v1059_v53  ;;  %v1028_v53 = vld [vmem:[#allocation2 + $0xd8] sm:$0xff] }
 0x31f   : > { %v2893_v37 = vpop.f32.mrf.mxu3 }
 0x320   : > { %v5471_v5 = vadd.f32 %v2893_v37, %v6036_v20  ;;  %v1202_v37 = vpack.c.bf16 %v1170_v46, %v1170_v46  ;;  %v1203_v20 = vpack.c.bf16 %v1171_v27, %v1171_v27 }
 0x322   : > { %6037 = vst [vmem:[#allocation27_spill] sm:$0xff] %v5471_v5  ;;  %v2034_v41 = vunpack.c.l.b16 %v1202_v37  ;;  %v2035_v31 = vunpack.c.l.b16 %v1203_v20  ;;  %v6040_v5 = vld [vmem:[#allocation31_spill] sm:$0xff] }
 0x324   : > { %3211 = vmatmul.bf16.gmra.mxu3 %v1853_v22  ;;  %3429 = vmatmul.bf16.gmra.mxu1 %v2053_v28  ;;  %v4323_v22 = vld [vmem:[%s5941_s3 + $0x8] sm:$0xff]  ;;  %v5483_v28 = vpop.f32.mrf.mxu1  ;;  %v2054_v46 = vpack.c.b16 %v2035_v31, %v2034_v41 }
 0x325   : > { %3577 = vmatpush.bf16.msra.mxu2 %v4323_v22 }
 0x327   : > { %v2896_v61 = vpop.f32.mrf.mxu3 }
 0x328   : > { %v5478_v4 = vadd.f32 %v2896_v61, %v6038_v6  ;;  %v1826_v61 = vunpack.c.l.b16 %v1058_v1  ;;  %v5488_v6 = vpop.f32.mrf.mxu2 }
 0x32a   : > { %6039 = vst [vmem:[#allocation29_spill] sm:$0xff] %v5478_v4  ;;  %v1854_v9 = vpack.c.b16 %v1827_v7, %v1826_v61  ;;  %v1029_v4 = vld [vmem:[#allocation2 + $0xe0] sm:$0xff] }
 0x32b   : > { %v1061_v20 = vpack.c.bf16 %v1029_v4, %v1029_v4 }
 0x32c   : > { %v5493_v37 = vpop.f32.mrf.mxu1 }
 0x32f   : > { %v2898_v38 = vpop.f32.mrf.mxu3 }
 0x330   : > { %v5486_v60 = vadd.f32 %v2898_v38, %v6040_v5  ;;  %v5495_v22 = vpop.f32.mrf.mxu2  ;;  %v1060_v5 = vpack.c.bf16 %v1028_v53, %v1028_v53  ;;  %v1829_v38 = vunpack.c.l.b16 %v1061_v20 }
 0x332   : > { %6041 = vst [vmem:[#allocation31_spill] sm:$0xff] %v5486_v60  ;;  %v1828_v7 = vunpack.c.l.b16 %v1060_v5 }
 0x334   : > { %3216 = vmatmul.bf16.gmra.mxu3 %v1854_v9  ;;  %3434 = vmatmul.bf16.gmra.mxu1 %v2054_v46  ;;  %v1855_v41 = vpack.c.b16 %v1829_v38, %v1828_v7  ;;  %v5500_v31 = vpop.f32.mrf.mxu1  ;;  %v1031_v9 = vld [vmem:[#allocation2 + $0xf8] sm:$0xff]  ;;  %v1030_v46 = vld [vmem:[#allocation2 + $0xf0] sm:$0xff] }
 0x335   : > { %v1062_v53 = vpack.c.bf16 %v1030_v46, %v1030_v46 }
 0x337   : > { %v2901_v27 = vpop.f32.mrf.mxu3 }
 0x338   : > { %v5491_v56 = vadd.f32 %v2901_v27, %v5236_v10  ;;  %v5503_v10 = vpop.f32.mrf.mxu2  ;;  %v1063_v27 = vpack.c.bf16 %v1031_v9, %v1031_v9  ;;  %v1032_v9 = vld [vmem:[#allocation2 + $0x108] sm:$0xff] }
 0x33a   : > { %6042 = vst [vmem:[#allocation88_spill] sm:$0xff] %v5491_v56  ;;  %v1831_v20 = vunpack.c.l.b16 %v1063_v27 }
 0x33f   : > { %v2903_v1 = vpop.f32.mrf.mxu3 }
 0x340   : > { %v5498_v60 = vadd.f32 %v2903_v1, %v5250_v50  ;;  %v4322_v50 = vld [vmem:[%s5941_s3] sm:$0xff]  ;;  %v5511_v38 = vpop.f32.mrf.mxu2  ;;  %v1830_v1 = vunpack.c.l.b16 %v1062_v53 }
 0x341   : > { %3578 = vmatpush.bf16.msra.mxu2 %v4322_v50  ;;  %v1064_v50 = vpack.c.bf16 %v1032_v9, %v1032_v9 }
 0x342   : > { %6043 = vst [vmem:[#allocation89_spill] sm:$0xff] %v5498_v60  ;;  %v1856_v7 = vpack.c.b16 %v1831_v20, %v1830_v1  ;;  %v5526_v20 = vpop.f32.mrf.mxu0  ;;  %v5528_v1 = vpop.f32.mrf.mxu1 }
 0x344   : > { %3221 = vmatmul.bf16.gmra.mxu3 %v1855_v41  ;;  %3439 = vmatmul.bf16.gmra.mxu1 %v5287_v2  ;;  %v1033_v41 = vld [vmem:[#allocation2 + $0x110] sm:$0xff] }
 0x345   : > { %v1065_v46 = vpack.c.bf16 %v1033_v41, %v1033_v41  ;;  %v1034_v41 = vld [vmem:[#allocation2 + $0x120] sm:$0xff] }
 0x347   : > { %v2906_v61 = vpop.f32.mrf.mxu3  ;;  %v1833_v27 = vunpack.c.l.b16 %v1065_v46 }
 0x348   : > { %v5506_v4 = vadd.f32 %v2906_v61, %v5262_v54 }
 0x34a   : > { %6044 = vst [vmem:[#allocation90_spill] sm:$0xff] %v5506_v4  ;;  %v5519_v4 = vpop.f32.mrf.mxu2  ;;  %v5547_v21 = vpop.f32.mrf.mxu1 }
 0x34b   : > { %6047 = vst [vmem:[#allocation93_spill] sm:$0xff] %v5519_v4 }
 0x34f   : > { %v2908_v5 = vpop.f32.mrf.mxu3 }
 0x350   : > { %v5514_v2 = vadd.f32 %v2908_v5, %v5271_v18  ;;  %v1832_v18 = vunpack.c.l.b16 %v1064_v50  ;;  %v1066_v50 = vpack.c.bf16 %v1034_v41, %v1034_v41 }
 0x352   : > { %6045 = vst [vmem:[#allocation91_spill] sm:$0xff] %v5514_v2  ;;  %v1857_v5 = vpack.c.b16 %v1833_v27, %v1832_v18  ;;  %v5524_v53 = vpop.f32.mrf.mxu2 }
 0x353   : > { %6049 = vst [vmem:[#allocation95_spill] sm:$0xff] %v5524_v53  ;;  %v1037_v53 = vld [vmem:[#allocation2 + $0x140] sm:$0xff] }
 0x354   : > { %3226 = vmatmul.bf16.gmra.mxu3 %v1856_v7  ;;  %v1035_v7 = vld [vmem:[#allocation2 + $0x128] sm:$0xff]  ;;  %v1069_v34 = vpack.c.bf16 %v1037_v53, %v1037_v53 }
 0x355   : > { %v1067_v9 = vpack.c.bf16 %v1035_v7, %v1035_v7 }
 0x357   : > { %v2911_v54 = vpop.f32.mrf.mxu3  ;;  %v1835_v18 = vunpack.c.l.b16 %v1067_v9 }
 0x358   : > { %v5517_v61 = vadd.f32 %v2911_v54, %v5283_v17 }
 0x35a   : > { %6046 = vst [vmem:[#allocation92_spill] sm:$0xff] %v5517_v61  ;;  %v5537_v27 = vpop.f32.mrf.mxu2  ;;  %v6053_v61 = vld [vmem:[#allocation13_spill] sm:$0xff] }
 0x35f   : > { %v2913_v60 = vpop.f32.mrf.mxu3 }
 0x360   : > { %v5522_v56 = vadd.f32 %v2913_v60, %v5297_v32  ;;  %v4418_v32 = vld [vmem:[%s5943_s5] ss:$0 sm:$0xff] }
 0x361   : > { %v6051_v60 = vld [vmem:[#allocation12_spill] sm:$0xff] }
 0x362   : > { %6048 = vst [vmem:[#allocation94_spill] sm:$0xff] %v5522_v56  ;;  %v2666_v46 = vadd.f32 %v4418_v32, %v6051_v60 }
 0x363   : > { %6052 = vst [vmem:[#allocation12_spill] sm:$0xff] %v5537_v27  ;;  %v6056_v27 = vld [vmem:[#allocation32_spill] sm:$0xff] }
 0x364   : > { %3231 = vmatmul.bf16.gmra.mxu3 %v1857_v5  ;;  %v5539_v5 = vpop.f32.mrf.mxu0  ;;  %v2755_v2 = vadd.f32 %v6053_v61, %v2666_v46  ;;  %v5552_v61 = vpop.f32.mrf.mxu2  ;;  %v6059_v46 = vld [vmem:[#allocation41_spill] sm:$0xff] }
 0x366   : > { %v2844_v60 = vadd.f32 %v5332_v43, %v2755_v2  ;;  %v5558_v43 = vpop.f32.mrf.mxu1  ;;  %v6061_v2 = vld [vmem:[#allocation15_spill] sm:$0xff] }
 0x367   : > { %v2916_v17 = vpop.f32.mrf.mxu3 }
 0x368   : > { %v5531_v54 = vadd.f32 %v2916_v17, %v5309_v45  ;;  %v6054_v45 = vld [vmem:[#allocation16_spill] sm:$0xff]  ;;  %v2933_v42 = vadd.f32 %v6057_v24, %v2844_v60  ;;  %v1837_v60 = vunpack.c.l.b16 %v1069_v34 }
 0x369   : > { %v2931_v17 = vadd.f32 %v6054_v45, %v5327_v52  ;;  %6058 = vst [vmem:[#allocation16_spill] sm:$0xff] %v5552_v61  ;;  %v6063_v61 = vld [vmem:[#allocation14_spill] sm:$0xff] }
 0x36a   : > { %6050 = vst [vmem:[#allocation96_spill] sm:$0xff] %v5531_v54  ;;  %v1834_v54 = vunpack.c.l.b16 %v1066_v50  ;;  %v6060_v50 = vld [vmem:[#allocation34_spill] sm:$0xff] }
 0x36b   : > { %v3020_v9 = vadd.f32 %v6056_v27, %v2931_v17 }
 0x36c   : > { %v1858_v41 = vpack.c.b16 %v1835_v18, %v1834_v54  ;;  %v5555_v45 = vpop.f32.mrf.mxu0  ;;  %v2671_v54 = vadd.f32 %v4418_v32, %v6061_v2  ;;  %v6062_v18 = vld [vmem:[#allocation44_spill] sm:$0xff] }
 0x36d   : > { %v3109_v52 = vadd.f32 %v6059_v46, %v3020_v9  ;;  %v6064_v46 = vld [vmem:[#allocation18_spill] sm:$0xff] }
 0x36e   : > { %v2760_v9 = vadd.f32 %v6063_v61, %v2671_v54  ;;  %v2936_v4 = vadd.f32 %v6064_v46, %v5340_v63  ;;  %v6066_v63 = vld [vmem:[#allocation19_spill] sm:$0xff] }
 0x36f   : > { %v2918_v56 = vpop.f32.mrf.mxu3 }
 0x370   : > { %v5545_v7 = vadd.f32 %v2918_v56, %v5319_v0  ;;  %v1036_v0 = vld [vmem:[#allocation2 + $0x138] sm:$0xff]  ;;  %v2849_v53 = vadd.f32 %v5348_v62, %v2760_v9 }
 0x371   : > { %v1068_v27 = vpack.c.bf16 %v1036_v0, %v1036_v0  ;;  %v1039_v62 = vld [vmem:[#allocation2 + $0x158] sm:$0xff] }
 0x372   : > { %6055 = vst [vmem:[#allocation13_spill] sm:$0xff] %v5545_v7  ;;  %v3022_v7 = vadd.f32 %v6060_v50, %v2933_v42  ;;  %v5566_v42 = vpop.f32.mrf.mxu2  ;;  %v5575_v50 = vpop.f32.mrf.mxu1  ;;  %v2938_v2 = vadd.f32 %v6066_v63, %v2849_v53  ;;  %v6069_v53 = vld [vmem:[#allocation50_spill] sm:$0xff] }
 0x374   : > { %3236 = vmatmul.bf16.gmra.mxu3 %v1858_v41  ;;  %v3111_v17 = vadd.f32 %v6062_v18, %v3022_v7  ;;  %v6065_v7 = vld [vmem:[#allocation36_spill] sm:$0xff] }
 0x375   : > { %v3025_v61 = vadd.f32 %v6065_v7, %v2936_v4  ;;  %v6070_v7 = vld [vmem:[#allocation20_spill] sm:$0xff] }
 0x377   : > { %v3197_v57 = vpop.f32.mrf.mxu3 }
 0x378   : > { %v3198_v56 = vadd.f32 %v3197_v57, %v3109_v52  ;;  %v1836_v52 = vunpack.c.l.b16 %v1068_v27 }
 0x37a   : > { %v3287_v24 = vadd.f32 %v5392_v3, %v3198_v56  ;;  %v1859_v3 = vpack.c.b16 %v1837_v60, %v1836_v52  ;;  %v5571_v56 = vpop.f32.mrf.mxu0  ;;  %v5580_v46 = vpop.f32.mrf.mxu2 }
 0x37c   : > { %v3376_v32 = vadd.f32 %v5473_v33, %v3287_v24  ;;  %v6067_v33 = vld [vmem:[#allocation47_spill] sm:$0xff] }
 0x37d   : > { %v3114_v24 = vadd.f32 %v6067_v33, %v3025_v61  ;;  %v2941_v61 = vadd.f32 %v6070_v7, %v5356_v51 }
 0x37e   : > { %v3455_v54 = vmax.f32 %v3376_v32, 0.0 }
 0x37f   : > { %v3199_v41 = vpop.f32.mrf.mxu3 }
 0x380   : > { %v3200_v57 = vadd.f32 %v3199_v41, %v3111_v17  ;;  %v6068_v41 = vld [vmem:[#allocation37_spill] sm:$0xff] }
 0x381   : > { %v3027_v9 = vadd.f32 %v6068_v41, %v2938_v2 }
 0x382   : > { %v3289_v0 = vadd.f32 %v5400_v14, %v3200_v57  ;;  %v1038_v14 = vld [vmem:[#allocation2 + $0x150] sm:$0xff]  ;;  %v5582_v57 = vpop.f32.mrf.mxu0  ;;  %v5594_v33 = vpop.f32.mrf.mxu2 }
 0x383   : > { %v1070_v4 = vpack.c.bf16 %v1038_v14, %v1038_v14  ;;  %v3116_v32 = vadd.f32 %v6069_v53, %v3027_v9 }
 0x384   : > { %v3378_v34 = vadd.f32 %v5483_v28, %v3289_v0  ;;  %3241 = vmatmul.bf16.gmra.mxu3 %v1859_v3  ;;  %v1071_v28 = vpack.c.bf16 %v1039_v62, %v1039_v62  ;;  %v5586_v3 = vpop.f32.mrf.mxu1 }
 0x386   : > { %v3456_v27 = vmax.f32 %v3378_v34, 0.0  ;;  %v1839_v0 = vunpack.c.l.b16 %v1071_v28  ;;  %v1040_v28 = vld [vmem:[#allocation2 + $0x168] sm:$0xff] }
 0x387   : > { %v3202_v18 = vpop.f32.mrf.mxu3 }
 0x388   : > { %v3487_v17 = vpack.c.bf16 %v3456_v27, %v3455_v54  ;;  %v3203_v60 = vadd.f32 %v3202_v18, %v3114_v24  ;;  %v1838_v54 = vunpack.c.l.b16 %v1070_v4  ;;  %v6072_v24 = vld [vmem:[#allocation21_spill] sm:$0xff] }
 0x389   : > { %v2943_v14 = vadd.f32 %v6072_v24, %v5364_v13  ;;  %v6073_v4 = vld [vmem:[#allocation53_spill] sm:$0xff] }
 0x38a   : > { %3579 = vmatmul.bf16.vlgmr.msra.gmra.mxu2 %v3487_v17  ;;  %v3292_v52 = vadd.f32 %v5413_v25, %v3203_v60  ;;  %v1860_v18 = vpack.c.b16 %v1839_v0, %v1838_v54  ;;  %v6071_v25 = vld [vmem:[#allocation39_spill] sm:$0xff]  ;;  %v5598_v51 = vpop.f32.mrf.mxu0 }
 0x38b   : > { %v3030_v17 = vadd.f32 %v6071_v25, %v2941_v61 }
 0x38c   : > { %v3381_v2 = vadd.f32 %v5493_v37, %v3292_v52  ;;  %v1041_v37 = vld [vmem:[#allocation2 + $0x170] sm:$0xff]  ;;  %v5601_v53 = vpop.f32.mrf.mxu1 }
 0x38d   : > { %v1073_v7 = vpack.c.bf16 %v1041_v37, %v1041_v37 }
 0x38e   : > { %v3457_v60 = vmax.f32 %v3381_v2, 0.0 }
 0x38f   : > { %v3204_v34 = vpop.f32.mrf.mxu3  ;;  %v1841_v54 = vunpack.c.l.b16 %v1073_v7 }
 0x390   : > { %v3205_v63 = vadd.f32 %v3204_v34, %v3116_v32  ;;  %v6074_v32 = vld [vmem:[#allocation42_spill] sm:$0xff]  ;;  %v1072_v34 = vpack.c.bf16 %v1040_v28, %v1040_v28  ;;  %v6077_v28 = vld [vmem:[#allocation23_spill] sm:$0xff] }
 0x391   : > { %v3032_v0 = vadd.f32 %v6074_v32, %v2943_v14  ;;  %v2948_v37 = vadd.f32 %v6077_v28, %v5381_v26 }
 0x392   : > { %v3294_v27 = vadd.f32 %v5421_v49, %v3205_v63  ;;  %v3119_v49 = vadd.f32 %v6073_v4, %v3030_v17  ;;  %v1840_v63 = vunpack.c.l.b16 %v1072_v34  ;;  %v5610_v17 = vpop.f32.mrf.mxu0  ;;  %v6078_v34 = vld [vmem:[#allocation48_spill] sm:$0xff] }
 0x393   : > { %v3121_v61 = vadd.f32 %v5260_v36, %v3032_v0 }
 0x394   : > { %v3383_v62 = vadd.f32 %v5500_v31, %v3294_v27  ;;  %3246 = vmatmul.bf16.gmra.mxu3 %v1860_v18  ;;  %v5606_v27 = vpop.f32.mrf.mxu2  ;;  %v6075_v18 = vld [vmem:[#allocation22_spill] sm:$0xff] }
 0x396   : > { %v3458_v41 = vmax.f32 %v3383_v62, 0.0  ;;  %v2946_v62 = vadd.f32 %v6075_v18, %v5370_v29 }
 0x397   : > { %v3207_v9 = vpop.f32.mrf.mxu3 }
 0x398   : > { %v3488_v52 = vpack.c.bf16 %v3458_v41, %v3457_v60  ;;  %v3208_v31 = vadd.f32 %v3207_v9, %v3119_v49  ;;  %v1861_v60 = vpack.c.b16 %v1841_v54, %v1840_v63  ;;  %v5614_v41 = vpop.f32.mrf.mxu1 }
 0x39a   : > { %3584 = vmatmul.bf16.gmra.mxu2 %v3488_v52  ;;  %v3297_v13 = vadd.f32 %v5526_v20, %v3208_v31  ;;  %v6076_v20 = vld [vmem:[#allocation45_spill] sm:$0xff]  ;;  %v1042_v52 = vld [vmem:[#allocation2 + $0x180] sm:$0xff] }
 0x39b   : > { %v3035_v9 = vadd.f32 %v6076_v20, %v2946_v62  ;;  %v1043_v31 = vld [vmem:[#allocation2 + $0x188] sm:$0xff]  ;;  %v1074_v7 = vpack.c.bf16 %v1042_v52, %v1042_v52  ;;  %v6079_v62 = vld [vmem:[#allocation24_spill] sm:$0xff]  ;;  %v1110_v52 = vld [vmem:[#allocation2 + $0x1b2] sm:$0xff] }
 0x39c   : > { %v3386_v24 = vadd.f32 %v5528_v1, %v3297_v13  ;;  %v1075_v13 = vpack.c.bf16 %v1043_v31, %v1043_v31  ;;  %v1174_v31 = vld [vmem:[#allocation2 + $0x1b4] sm:$0xff] }
 0x39d   : > { %v3124_v1 = vadd.f32 %v5273_v47, %v3035_v9 }
 0x39e   : > { %v3459_v4 = vmax.f32 %v3386_v24, 0.0  ;;  %v1843_v18 = vunpack.c.l.b16 %v1075_v13 }
 0x39f   : > { %v3209_v2 = vpop.f32.mrf.mxu3 }
 0x3a0   : > { %v3210_v25 = vadd.f32 %v3209_v2, %v3121_v61  ;;  %v5624_v61 = vpop.f32.mrf.mxu0  ;;  %v5626_v63 = vpop.f32.mrf.mxu1  ;;  %v1842_v2 = vunpack.c.l.b16 %v1074_v7 }
 0x3a2   : > { %v3299_v14 = vadd.f32 %v5539_v5, %v3210_v25  ;;  %v5621_v5 = vpop.f32.mrf.mxu2  ;;  %v2951_v25 = vadd.f32 %v6079_v62, %v5389_v15  ;;  %v6082_v62 = vld [vmem:[#allocation54_spill] sm:$0xff] }
 0x3a4   : > { %v3388_v36 = vadd.f32 %v5547_v21, %v3299_v14  ;;  %3251 = vmatmul.bf16.gmra.mxu3 %v1861_v60  ;;  %v3037_v21 = vadd.f32 %v6078_v34, %v2948_v37  ;;  %v1044_v37 = vld [vmem:[#allocation2 + $0x198] sm:$0xff] }
 0x3a5   : > { %v1175_v34 = vld [vmem:[#allocation2 + $0x1bc] sm:$0xff] }
 0x3a6   : > { %v3460_v29 = vmax.f32 %v3388_v36, 0.0  ;;  %v3126_v54 = vadd.f32 %v5289_v58, %v3037_v21  ;;  %v1862_v36 = vpack.c.b16 %v1843_v18, %v1842_v2  ;;  %v1206_v21 = vpack.c.bf16 %v1174_v31, %v1174_v31 }
 0x3a7   : > { %v3212_v49 = vpop.f32.mrf.mxu3 }
 0x3a8   : > { %v3489_v32 = vpack.c.bf16 %v3460_v29, %v3459_v4  ;;  %v3213_v0 = vadd.f32 %v3212_v49, %v3124_v1  ;;  %v5638_v58 = vpop.f32.mrf.mxu0  ;;  %v6081_v4 = vld [vmem:[#allocation26_spill] sm:$0xff]  ;;  %v2038_v18 = vunpack.c.l.b16 %v1206_v21 }
 0x3a9   : > { %v2953_v29 = vadd.f32 %v6081_v4, %v5395_v19 }
 0x3aa   : > { %3589 = vmatmul.bf16.gmra.mxu2 %v3489_v32  ;;  %v3302_v26 = vadd.f32 %v5555_v45, %v3213_v0  ;;  %v5634_v20 = vpop.f32.mrf.mxu2  ;;  %v6080_v45 = vld [vmem:[#allocation51_spill] sm:$0xff]  ;;  %v1045_v32 = vld [vmem:[#allocation2 + $0x1a0] sm:$0xff]  ;;  %v1142_v0 = vpack.c.bf16 %v1110_v52, %v1110_v52 }
 0x3ab   : > { %v3040_v28 = vadd.f32 %v6080_v45, %v2951_v25  ;;  %v3042_v25 = vadd.f32 %v6082_v62, %v2953_v29 }
 0x3ac   : > { %v3391_v14 = vadd.f32 %v5558_v43, %v3302_v26  ;;  %v1111_v43 = vld [vmem:[#allocation2 + $0x1ba] sm:$0xff]  ;;  %v1207_v26 = vpack.c.bf16 %v1175_v34, %v1175_v34  ;;  %v1942_v2 = vunpack.c.l.b16 %v1142_v0  ;;  %v6084_v0 = vld [vmem:[#allocation30_spill] sm:$0xff] }
 0x3ad   : > { %v3129_v7 = vadd.f32 %v5468_v44, %v3040_v28  ;;  %v3131_v44 = vadd.f32 %v5475_v23, %v3042_v25 }
 0x3ae   : > { %v3461_v15 = vmax.f32 %v3391_v14, 0.0  ;;  %v2039_v14 = vunpack.c.l.b16 %v1207_v26 }
 0x3af   : > { %v3214_v47 = vpop.f32.mrf.mxu3 }
 0x3b0   : > { %v3215_v24 = vadd.f32 %v3214_v47, %v3126_v54  ;;  %v1076_v54 = vpack.c.bf16 %v1044_v37, %v1044_v37  ;;  %v5650_v4 = vpop.f32.mrf.mxu0 }
 0x3b2   : > { %v3304_v60 = vadd.f32 %v5571_v56, %v3215_v24  ;;  %v5642_v56 = vpop.f32.mrf.mxu1  ;;  %v1077_v24 = vpack.c.bf16 %v1045_v32, %v1045_v32  ;;  %v1844_v28 = vunpack.c.l.b16 %v1076_v54 }
 0x3b4   : > { %v3393_v9 = vadd.f32 %v5575_v50, %v3304_v60  ;;  %3256 = vmatmul.bf16.gmra.mxu3 %v1862_v36  ;;  %v1143_v50 = vpack.c.bf16 %v1111_v43, %v1111_v43  ;;  %v2056_v36 = vpack.c.b16 %v2039_v14, %v2038_v18  ;;  %v1845_v37 = vunpack.c.l.b16 %v1077_v24 }
 0x3b6   : > { %v3462_v49 = vmax.f32 %v3393_v9, 0.0  ;;  %v1943_v19 = vunpack.c.l.b16 %v1143_v50  ;;  %v5646_v9 = vpop.f32.mrf.mxu2  ;;  %3444 = vmatmul.bf16.gmra.mxu1 %v2056_v36  ;;  %v1863_v32 = vpack.c.b16 %v1845_v37, %v1844_v28  ;;  %v2958_v50 = vadd.f32 %v6084_v0, %v5411_v30 }
 0x3b7   : > { %v3217_v1 = vpop.f32.mrf.mxu3 }
 0x3b8   : > { %v3490_v13 = vpack.c.bf16 %v3462_v49, %v3461_v15  ;;  %v3218_v47 = vadd.f32 %v3217_v1, %v3129_v7  ;;  %v1960_v60 = vpack.c.b16 %v1943_v19, %v1942_v2  ;;  %v6083_v49 = vld [vmem:[#allocation28_spill] sm:$0xff]  ;;  %v1112_v7 = vld [vmem:[#allocation2 + $0x1ca] sm:$0xff]  ;;  %v3321_v25 = vpop.f32.mrf.mxu0  ;;  %v3047_v36 = vadd.f32 %v5275_v35, %v2958_v50 }
 0x3b9   : > { %v2956_v29 = vadd.f32 %v6083_v49, %v5403_v11  ;;  %v1113_v11 = vld [vmem:[#allocation2 + $0x1d2] sm:$0xff]  ;;  %v1144_v54 = vpack.c.bf16 %v1112_v7, %v1112_v7 }
 0x3ba   : > { %3594 = vmatmul.bf16.gmra.mxu2 %v3490_v13  ;;  %3355 = vmatmul.bf16.gmra.mxu0 %v1960_v60  ;;  %v3307_v45 = vadd.f32 %v5582_v57, %v3218_v47  ;;  %v5654_v43 = vpop.f32.mrf.mxu1  ;;  %v1176_v13 = vld [vmem:[#allocation2 + $0x1cc] sm:$0xff]  ;;  %v1145_v2 = vpack.c.bf16 %v1113_v11, %v1113_v11  ;;  %v4419_v47 = vld [vmem:[#allocation2] sm:$0xff]  ;;  %v3136_v49 = vadd.f32 %v5495_v22, %v3047_v36 }
 0x3bb   : > { %v3045_v23 = vadd.f32 %v5264_v16, %v2956_v29  ;;  %v1208_v19 = vpack.c.bf16 %v1176_v13, %v1176_v13  ;;  %v1078_v16 = vpack.c.bf16 %v4419_v47, %v4419_v47  ;;  %v1944_v30 = vunpack.c.l.b16 %v1144_v54 }
 0x3bc   : > { %v3396_v31 = vadd.f32 %v5586_v3, %v3307_v45  ;;  %v1177_v3 = vld [vmem:[#allocation2 + $0x1d4] sm:$0xff]  ;;  %v1945_v24 = vunpack.c.l.b16 %v1145_v2 }
 0x3bd   : > { %v1209_v62 = vpack.c.bf16 %v1177_v3, %v1177_v3  ;;  %v2040_v14 = vunpack.c.l.b16 %v1208_v19  ;;  %v1846_v37 = vunpack.c.l.b16 %v1078_v16 }
 0x3be   : > { %v3463_v34 = vmax.f32 %v3396_v31, 0.0  ;;  %v1961_v28 = vpack.c.b16 %v1945_v24, %v1944_v30 }
 0x3bf   : > { %v3219_v15 = vpop.f32.mrf.mxu3  ;;  %v2041_v45 = vunpack.c.l.b16 %v1209_v62 }
 0x3c0   : > { %v3220_v52 = vadd.f32 %v3219_v15, %v3131_v44  ;;  %v3323_v0 = vpop.f32.mrf.mxu0 }
 0x3c1   : > { %v2057_v15 = vpack.c.b16 %v2041_v45, %v2040_v14 }
 0x3c2   : > { %v3309_v1 = vadd.f32 %v5598_v51, %v3220_v52  ;;  %v5662_v51 = vpop.f32.mrf.mxu2  ;;  %v3410_v44 = vpop.f32.mrf.mxu1  ;;  %v6085_v52 = vld [vmem:[#allocation33_spill] sm:$0xff] }
 0x3c3   : > { %v2961_v31 = vadd.f32 %v6085_v52, %v5419_v48 }
 0x3c4   : > { %v3398_v57 = vadd.f32 %v5601_v53, %v3309_v1  ;;  %3261 = vmatmul.bf16.gmra.mxu3 %v1863_v32  ;;  %v3134_v53 = vadd.f32 %v5488_v6, %v3045_v23  ;;  %v1864_v32 = vpack.c.b16 %v1846_v37, %v1846_v37 }
 0x3c6   : > { %v3464_v21 = vmax.f32 %v3398_v57, 0.0  ;;  %3449 = vmatmul.bf16.gmra.mxu1 %v2057_v15  ;;  %v6091_v15 = vld [vmem:[#allocation95_spill] sm:$0xff] }
 0x3c7   : > { %v3222_v26 = vpop.f32.mrf.mxu3 }
 0x3c8   : > { %v3491_v18 = vpack.c.bf16 %v3464_v21, %v3463_v34  ;;  %v3223_v60 = vadd.f32 %v3222_v26, %v3134_v53  ;;  %v6086_v34 = vld [vmem:[#allocation35_spill] sm:$0xff] }
 0x3c9   : > { %v2963_v21 = vadd.f32 %v6086_v34, %v5426_v40  ;;  %v6087_v40 = vld [vmem:[#allocation38_spill] sm:$0xff] }
 0x3ca   : > { %3599 = vmatmul.bf16.gmra.mxu2 %v3491_v18  ;;  %3360 = vmatmul.bf16.gmra.mxu0 %v1961_v28  ;;  %v3312_v6 = vadd.f32 %v5610_v17, %v3223_v60  ;;  %v5670_v57 = vpop.f32.mrf.mxu2  ;;  %v3050_v17 = vadd.f32 %v5295_v39, %v2961_v31  ;;  %v3412_v22 = vpop.f32.mrf.mxu1  ;;  %v2966_v53 = vadd.f32 %v6087_v40, %v5430_v55  ;;  %v6089_v55 = vld [vmem:[#allocation93_spill] sm:$0xff] }
 0x3cc   : > { %v3401_v35 = vadd.f32 %v5614_v41, %v3312_v6  ;;  %v3139_v13 = vadd.f32 %v5503_v10, %v3050_v17  ;;  %v3052_v41 = vadd.f32 %v5307_v12, %v2963_v21  ;;  %v3055_v12 = vadd.f32 %v5321_v8, %v2966_v53  ;;  %v6094_v17 = vld [vmem:[#allocation63_spill] sm:$0xff]  ;;  %v6095_v21 = vld [vmem:[#allocation82_spill] sm:$0xff]  ;;  %v6099_v53 = vld [vmem:[#allocation16_spill] sm:$0xff] }
 0x3ce   : > { %v3465_v7 = vmax.f32 %v3401_v35, 0.0  ;;  %v3141_v39 = vadd.f32 %v5511_v38, %v3052_v41  ;;  %v3144_v36 = vadd.f32 %v6089_v55, %v3055_v12 }
 0x3cf   : > { %v3224_v29 = vpop.f32.mrf.mxu3 }
 0x3d0   : > { %v3225_v1 = vadd.f32 %v3224_v29, %v3136_v49  ;;  %v6092_v49 = vld [vmem:[#allocation80_spill] sm:$0xff]  ;;  %v6093_v29 = vld [vmem:[#allocation43_spill] sm:$0xff] }
 0x3d1   : > { %v2971_v52 = vadd.f32 %v6093_v29, %v6092_v49 }
 0x3d2   : > { %v3314_v23 = vadd.f32 %v5624_v61, %v3225_v1  ;;  %v5680_v61 = vpop.f32.mrf.mxu2  ;;  %v3415_v3 = vpop.f32.mrf.mxu1 }
 0x3d3   : > { %v3060_v34 = vadd.f32 %v6094_v17, %v2971_v52 }
 0x3d4   : > { %v3403_v50 = vadd.f32 %v5626_v63, %v3314_v23  ;;  %3266 = vmatmul.bf16.gmra.mxu3 %v1864_v32  ;;  %v3326_v63 = vpop.f32.mrf.mxu0 }
 0x3d6   : > { %v3466_v48 = vmax.f32 %v3403_v50, 0.0 }
 0x3d7   : > { %v3227_v11 = vpop.f32.mrf.mxu3 }
 0x3d8   : > { %v3492_v26 = vpack.c.bf16 %v3466_v48, %v3465_v7  ;;  %v3228_v54 = vadd.f32 %v3227_v11, %v3139_v13  ;;  %v6096_v7 = vld [vmem:[#allocation46_spill] sm:$0xff] }
 0x3d9   : > { %v2973_v48 = vadd.f32 %v6096_v7, %v6095_v21  ;;  %v6107_v21 = vld [vmem:[#allocation55_spill] sm:$0xff] }
 0x3da   : > { %3604 = vmatmul.bf16.gmra.mxu2 %v3492_v26  ;;  %v3317_v2 = vadd.f32 %v5638_v58, %v3228_v54  ;;  %v5690_v62 = vpop.f32.mrf.mxu2  ;;  %v6088_v58 = vld [vmem:[#allocation40_spill] sm:$0xff] }
 0x3db   : > { %v2968_v38 = vadd.f32 %v6088_v58, %v5438_v59  ;;  %v6097_v26 = vld [vmem:[#allocation12_spill] sm:$0xff] }
 0x3dc   : > { %v3406_v10 = vadd.f32 %v5642_v56, %v3317_v2  ;;  %v3328_v14 = vpop.f32.mrf.mxu0  ;;  %v3417_v56 = vpop.f32.mrf.mxu1  ;;  %v3149_v54 = vadd.f32 %v6097_v26, %v3060_v34  ;;  %v6106_v34 = vld [vmem:[#allocation25_spill] sm:$0xff] }
 0x3dd   : > { %v2981_v7 = vadd.f32 %v6107_v21, %v6106_v34  ;;  %v3663_v34 = vld [vmem:[%s4702_s29 + $0x18] sm:$0xff]  ;;  %v6116_v21 = vld [vmem:[#allocation58_spill] sm:$0xff] }
 0x3de   : > { %v3467_v30 = vmax.f32 %v3406_v10, 0.0 }
 0x3df   : > { %v3229_v19 = vpop.f32.mrf.mxu3 }
 0x3e0   : > { %v3230_v18 = vadd.f32 %v3229_v19, %v3141_v39  ;;  %v6098_v39 = vld [vmem:[#allocation65_spill] sm:$0xff] }
 0x3e1   : > { %v3062_v19 = vadd.f32 %v6098_v39, %v2973_v48  ;;  %v3661_v39 = vld [vmem:[%s4702_s29 + $0x8] sm:$0xff] }
 0x3e2   : > { %v3319_v47 = vadd.f32 %v5650_v4, %v3230_v18  ;;  %v6090_v4 = vld [vmem:[#allocation61_spill] sm:$0xff]  ;;  %v5699_v31 = vpop.f32.mrf.mxu2 }
 0x3e3   : > { %v3151_v18 = vadd.f32 %v6099_v53, %v3062_v19  ;;  %v6109_v19 = vld [vmem:[#allocation27_spill] sm:$0xff] }
 0x3e4   : > { %v3408_v16 = vadd.f32 %v5654_v43, %v3319_v47  ;;  %3271 = vmatmul.bf16.gmra.mxu3 %v1864_v32  ;;  %v3057_v43 = vadd.f32 %v6090_v4, %v2968_v38  ;;  %v3331_v1 = vpop.f32.mrf.mxu0  ;;  %v3420_v23 = vpop.f32.mrf.mxu1  ;;  %v6100_v47 = vld [vmem:[#allocation84_spill] sm:$0xff] }
 0x3e5   : > { %v6104_v4 = vld [vmem:[#allocation52_spill] sm:$0xff] }
 0x3e6   : > { %v3468_v24 = vmax.f32 %v3408_v16, 0.0  ;;  %v3146_v8 = vadd.f32 %v6091_v15, %v3057_v43  ;;  %v6101_v16 = vld [vmem:[#allocation49_spill] sm:$0xff] }
 0x3e7   : > { %v3232_v60 = vpop.f32.mrf.mxu3  ;;  %v2976_v12 = vadd.f32 %v6101_v16, %v6100_v47 }
 0x3e8   : > { %v3493_v45 = vpack.c.bf16 %v3468_v24, %v3467_v30  ;;  %v3233_v28 = vadd.f32 %v3232_v60, %v3144_v36  ;;  %v6102_v60 = vld [vmem:[#allocation67_spill] sm:$0xff] }
 0x3e9   : > { %v3065_v55 = vadd.f32 %v6102_v60, %v2976_v12 }
 0x3ea   : > { %3609 = vmatmul.bf16.gmra.mxu2 %v3493_v45  ;;  %v3322_v37 = vadd.f32 %v3321_v25, %v3233_v28  ;;  %v5706_v40 = vpop.f32.mrf.mxu2  ;;  %v6103_v28 = vld [vmem:[#allocation85_spill] sm:$0xff] }
 0x3eb   : > { %v2978_v43 = vadd.f32 %v6104_v4, %v6103_v28  ;;  %v3662_v28 = vld [vmem:[%s4702_s29 + $0x10] sm:$0xff] }
 0x3ec   : > { %v3411_v32 = vadd.f32 %v3410_v44, %v3322_v37  ;;  %v3333_v44 = vpop.f32.mrf.mxu0 }
 0x3ee   : > { %v3469_v25 = vmax.f32 %v3411_v32, 0.0 }
 0x3ef   : > { %v3234_v6 = vpop.f32.mrf.mxu3 }
 0x3f0   : > { %v3235_v59 = vadd.f32 %v3234_v6, %v3146_v8  ;;  %v3154_v6 = vadd.f32 %v5566_v42, %v3065_v55 }
 0x3f2   : > { %v3324_v35 = vadd.f32 %v3323_v0, %v3235_v59  ;;  %v3422_v0 = vpop.f32.mrf.mxu1  ;;  %v5712_v36 = vpop.f32.mrf.mxu2  ;;  %v3660_v59 = vld [vmem:[%s4702_s29] sm:$0xff] }
 0x3f4   : > { %v3413_v50 = vadd.f32 %v3412_v22, %v3324_v35  ;;  %v3336_v45 = vpop.f32.mrf.mxu0 }
 0x3f6   : > { %v3470_v11 = vmax.f32 %v3413_v50, 0.0 }
 0x3f7   : > { %v3237_v13 = vpop.f32.mrf.mxu3 }
 0x3f8   : > { %v3494_v41 = vpack.c.bf16 %v3470_v11, %v3469_v25  ;;  %v3238_v2 = vadd.f32 %v3237_v13, %v3149_v54 }
 0x3fa   : > { %3614 = vmatmul.bf16.gmra.mxu2 %v3494_v41  ;;  %v3327_v22 = vadd.f32 %v3326_v63, %v3238_v2  ;;  %v3425_v15 = vpop.f32.mrf.mxu1  ;;  %v6108_v41 = vld [vmem:[#allocation71_spill] sm:$0xff] }
 0x3fc   : > { %v3416_v38 = vadd.f32 %v3415_v3, %v3327_v22  ;;  %v5720_v3 = vld [vmem:[%s5944_s6] ss:$0 sm:$0xff]  ;;  %v3338_v42 = vpop.f32.mrf.mxu0 }
 0x3fd   : > { %v6110_v22 = vld [vmem:[#allocation56_spill] sm:$0xff] }
 0x3fe   : > { %v3471_v63 = vmax.f32 %v3416_v38, 0.0  ;;  %v2983_v53 = vadd.f32 %v6110_v22, %v6109_v19  ;;  %v3664_v19 = vld [vmem:[%s4702_s29 + $0x20] sm:$0xff] }
 0x3ff   : > { %v3239_v10 = vpop.f32.mrf.mxu3 }
 0x400   : > { %v3240_v58 = vadd.f32 %v3239_v10, %v3151_v18 }
 0x402   : > { %v3329_v30 = vadd.f32 %v3328_v14, %v3240_v58  ;;  %v6105_v14 = vld [vmem:[#allocation69_spill] sm:$0xff]  ;;  %v3427_v11 = vpop.f32.mrf.mxu1 }
 0x404   : > { %v3418_v24 = vadd.f32 %v3417_v56, %v3329_v30  ;;  %v3067_v56 = vadd.f32 %v6105_v14, %v2978_v43  ;;  %v3341_v58 = vpop.f32.mrf.mxu0  ;;  %v6111_v30 = vld [vmem:[#allocation73_spill] sm:$0xff] }
 0x406   : > { %v3472_v37 = vmax.f32 %v3418_v24, 0.0  ;;  %v3156_v50 = vadd.f32 %v5580_v46, %v3067_v56  ;;  %v3070_v46 = vadd.f32 %v6108_v41, %v2981_v7  ;;  %v3072_v24 = vadd.f32 %v6111_v30, %v2983_v53  ;;  %v6117_v41 = vld [vmem:[#allocation75_spill] sm:$0xff] }
 0x407   : > { %v3242_v8 = vpop.f32.mrf.mxu3 }
 0x408   : > { %v3495_v49 = vpack.c.bf16 %v3472_v37, %v3471_v63  ;;  %v3243_v29 = vadd.f32 %v3242_v8, %v3154_v6  ;;  %v3159_v16 = vadd.f32 %v5594_v33, %v3070_v46  ;;  %v3161_v63 = vadd.f32 %v5606_v27, %v3072_v24  ;;  %v6112_v37 = vld [vmem:[#allocation29_spill] sm:$0xff]  ;;  %v6115_v27 = vld [vmem:[#allocation31_spill] sm:$0xff] }
 0x409   : > { %v6113_v8 = vld [vmem:[#allocation57_spill] sm:$0xff]  ;;  %v2988_v7 = vadd.f32 %v6116_v21, %v6115_v27 }
 0x40a   : > { %3619 = vmatmul.bf16.gmra.mxu2 %v3495_v49  ;;  %v3332_v32 = vadd.f32 %v3331_v1, %v3243_v29  ;;  %v3430_v60 = vpop.f32.mrf.mxu1  ;;  %v2986_v6 = vadd.f32 %v6113_v8, %v6112_v37 }
 0x40b   : > { %v3077_v46 = vadd.f32 %v6117_v41, %v2988_v7  ;;  %v6125_v7 = vld [vmem:[#allocation62_spill] sm:$0xff] }
 0x40c   : > { %v3421_v13 = vadd.f32 %v3420_v23, %v3332_v32  ;;  %v6126_v41 = vld [vmem:[#allocation78_spill] sm:$0xff] }
 0x40d   : > { %v3580_v52 = vpop.f32.mrf.mxu2 }
 0x40e   : > { %v3581_v35 = vadd.f32 %v5720_v3, %v3580_v52  ;;  %v3473_v18 = vmax.f32 %v3421_v13, 0.0 }
 0x40f   : > { %v3244_v17 = vpop.f32.mrf.mxu3 }
 0x410   : > { %v3692_v48 = vadd.f32 %v3660_v59, %v3581_v35  ;;  %v3245_v25 = vadd.f32 %v3244_v17, %v3156_v50  ;;  %v3343_v59 = vpop.f32.mrf.mxu0  ;;  %v6114_v35 = vld [vmem:[#allocation74_spill] sm:$0xff] }
 0x412   : > { %v3724_v26 = vmax.f32 %v3692_v48, 0.0  ;;  %v3334_v54 = vadd.f32 %v3333_v44, %v3245_v25  ;;  %v3432_v50 = vpop.f32.mrf.mxu1 }
 0x414   : > { %3756 = vst.msk [vmem:[%s5730_s11] sm:$0xff] %vm385_vm0, %v3724_v26  ;;  %v3423_v1 = vadd.f32 %v3422_v0, %v3334_v54 }
 0x415   : > { %v3582_v2 = vpop.f32.mrf.mxu2 }
 0x416   : > { %v3474_v23 = vmax.f32 %v3423_v1, 0.0  ;;  %v3583_v44 = vadd.f32 %v5720_v3, %v3582_v2 }
 0x417   : > { %v3247_v10 = vpop.f32.mrf.mxu3 }
 0x418   : > { %v3693_v47 = vadd.f32 %v3661_v39, %v3583_v44  ;;  %v3496_v12 = vpack.c.bf16 %v3474_v23, %v3473_v18  ;;  %v3248_v38 = vadd.f32 %v3247_v10, %v3159_v16  ;;  %v3346_v2 = vpop.f32.mrf.mxu0  ;;  %v3166_v18 = vadd.f32 %v5634_v20, %v3077_v46  ;;  %v6118_v44 = vld [vmem:[#allocation88_spill] sm:$0xff]  ;;  %v6119_v10 = vld [vmem:[#allocation59_spill] sm:$0xff] }
 0x419   : > { %v6122_v20 = vld [vmem:[#allocation60_spill] sm:$0xff] }
 0x41a   : > { %v3725_v0 = vmax.f32 %v3693_v47, 0.0  ;;  %3624 = vmatmul.bf16.gmra.mxu2 %v3496_v12  ;;  %v3337_v4 = vadd.f32 %v3336_v45, %v3248_v38  ;;  %v3075_v45 = vadd.f32 %v6114_v35, %v2986_v6  ;;  %v3435_v23 = vpop.f32.mrf.mxu1  ;;  %v2991_v47 = vadd.f32 %v6119_v10, %v6118_v44 }
 0x41c   : > { %3757 = vst.msk [vmem:[%s5730_s11 + $0x8] sm:$0xff] %vm385_vm0, %v3725_v0  ;;  %v3426_v14 = vadd.f32 %v3425_v15, %v3337_v4  ;;  %v3164_v26 = vadd.f32 %v5621_v5, %v3075_v45  ;;  %v3665_v4 = vld [vmem:[%s4702_s29 + $0x28] sm:$0xff] }
 0x41d   : > { %v3585_v55 = vpop.f32.mrf.mxu2 }
 0x41e   : > { %v3586_v43 = vadd.f32 %v5720_v3, %v3585_v55  ;;  %v3475_v48 = vmax.f32 %v3426_v14, 0.0  ;;  %v6120_v55 = vld [vmem:[#allocation76_spill] sm:$0xff] }
 0x41f   : > { %v3249_v33 = vpop.f32.mrf.mxu3 }
 0x420   : > { %v3694_v49 = vadd.f32 %v3662_v28, %v3586_v43  ;;  %v3250_v29 = vadd.f32 %v3249_v33, %v3161_v63  ;;  %v3080_v28 = vadd.f32 %v6120_v55, %v2991_v47  ;;  %v6121_v43 = vld [vmem:[#allocation89_spill] sm:$0xff]  ;;  %v3348_v6 = vpop.f32.mrf.mxu0 }
 0x421   : > { %v2993_v63 = vadd.f32 %v6122_v20, %v6121_v43  ;;  %v6130_v20 = vld [vmem:[#allocation92_spill] sm:$0xff] }
 0x422   : > { %v3726_v56 = vmax.f32 %v3694_v49, 0.0  ;;  %v3339_v52 = vadd.f32 %v3338_v42, %v3250_v29  ;;  %v3169_v29 = vadd.f32 %v5646_v9, %v3080_v28  ;;  %v6124_v9 = vld [vmem:[#allocation90_spill] sm:$0xff]  ;;  %v3668_v28 = vld [vmem:[%s4702_s29 + $0x40] sm:$0xff] }
 0x424   : > { %3758 = vst.msk [vmem:[%s5730_s11 + $0x10] sm:$0xff] %vm385_vm0, %v3726_v56  ;;  %v3428_v32 = vadd.f32 %v3427_v11, %v3339_v52  ;;  %v3437_v56 = vpop.f32.mrf.mxu1 }
 0x425   : > { %v3587_v17 = vpop.f32.mrf.mxu2 }
 0x426   : > { %v3476_v25 = vmax.f32 %v3428_v32, 0.0  ;;  %v3588_v15 = vadd.f32 %v5720_v3, %v3587_v17  ;;  %v6123_v32 = vld [vmem:[#allocation77_spill] sm:$0xff] }
 0x427   : > { %v3252_v13 = vpop.f32.mrf.mxu3  ;;  %v3082_v35 = vadd.f32 %v6123_v32, %v2993_v63  ;;  %v6131_v63 = vld [vmem:[#allocation66_spill] sm:$0xff] }
 0x428   : > { %v3695_v42 = vadd.f32 %v3663_v34, %v3588_v15  ;;  %v3497_v54 = vpack.c.bf16 %v3476_v25, %v3475_v48  ;;  %v3253_v1 = vadd.f32 %v3252_v13, %v3164_v26  ;;  %v2996_v48 = vadd.f32 %v6125_v7, %v6124_v9  ;;  %v3351_v13 = vpop.f32.mrf.mxu0 }
 0x429   : > { %v3171_v27 = vadd.f32 %v5662_v51, %v3082_v35  ;;  %v6127_v51 = vld [vmem:[#allocation91_spill] sm:$0xff]  ;;  %v3669_v35 = vld [vmem:[%s4702_s29 + $0x48] sm:$0xff] }
 0x42a   : > { %v3727_v11 = vmax.f32 %v3695_v42, 0.0  ;;  %3629 = vmatmul.bf16.gmra.mxu2 %v3497_v54  ;;  %v3342_v22 = vadd.f32 %v3341_v58, %v3253_v1  ;;  %v3085_v46 = vadd.f32 %v6126_v41, %v2996_v48 }
 0x42c   : > { %3759 = vst.msk [vmem:[%s5730_s11 + $0x18] sm:$0xff] %vm385_vm0, %v3727_v11  ;;  %v3431_v0 = vadd.f32 %v3430_v60, %v3342_v22  ;;  %v3440_v11 = vpop.f32.mrf.mxu1  ;;  %v3174_v10 = vadd.f32 %v5670_v57, %v3085_v46 }
 0x42d   : > { %v3590_v39 = vpop.f32.mrf.mxu2 }
 0x42e   : > { %v3591_v53 = vadd.f32 %v5720_v3, %v3590_v39  ;;  %v3477_v33 = vmax.f32 %v3431_v0, 0.0  ;;  %v3667_v39 = vld [vmem:[%s4702_s29 + $0x38] sm:$0xff] }
 0x42f   : > { %v3254_v5 = vpop.f32.mrf.mxu3  ;;  %v6129_v0 = vld [vmem:[#allocation79_spill] sm:$0xff] }
 0x430   : > { %v3696_v16 = vadd.f32 %v3664_v19, %v3591_v53  ;;  %v3255_v12 = vadd.f32 %v3254_v5, %v3166_v18  ;;  %v6128_v19 = vld [vmem:[#allocation64_spill] sm:$0xff] }
 0x431   : > { %v2998_v22 = vadd.f32 %v6128_v19, %v6127_v51  ;;  %v6137_v51 = vld [vmem:[#allocation70_spill] sm:$0xff] }
 0x432   : > { %v3728_v38 = vmax.f32 %v3696_v16, 0.0  ;;  %v3344_v30 = vadd.f32 %v3343_v59, %v3255_v12 }
 0x434   : > { %3760 = vst.msk [vmem:[%s5730_s11 + $0x20] sm:$0xff] %vm385_vm0, %v3728_v38  ;;  %v3433_v24 = vadd.f32 %v3432_v50, %v3344_v30  ;;  %v3666_v50 = vld [vmem:[%s4702_s29 + $0x30] sm:$0xff]  ;;  %v3087_v38 = vadd.f32 %v6129_v0, %v2998_v22  ;;  %v3353_v30 = vpop.f32.mrf.mxu0  ;;  %v6139_v0 = vld [vmem:[#allocation13_spill] sm:$0xff] }
 0x435   : > { %v3592_v58 = vpop.f32.mrf.mxu2 }
 0x436   : > { %v3478_v37 = vmax.f32 %v3433_v24, 0.0  ;;  %v3593_v8 = vadd.f32 %v5720_v3, %v3592_v58  ;;  %v3442_v24 = vpop.f32.mrf.mxu1  ;;  %v3176_v43 = vadd.f32 %v5680_v61, %v3087_v38  ;;  %v6133_v61 = vld [vmem:[#allocation94_spill] sm:$0xff] }
 0x437   : > { %v3257_v60 = vpop.f32.mrf.mxu3 }
 0x438   : > { %v3697_v49 = vadd.f32 %v3665_v4, %v3593_v8  ;;  %v3498_v14 = vpack.c.bf16 %v3478_v37, %v3477_v33  ;;  %v3258_v59 = vadd.f32 %v3257_v60, %v3169_v29  ;;  %v3001_v33 = vadd.f32 %v6131_v63, %v6130_v20 }
 0x43a   : > { %v3729_v52 = vmax.f32 %v3697_v49, 0.0  ;;  %3634 = vmatmul.bf16.gmra.mxu2 %v3498_v14  ;;  %v3347_v17 = vadd.f32 %v3346_v2, %v3258_v59 }
 0x43c   : > { %3761 = vst.msk [vmem:[%s5730_s11 + $0x28] sm:$0xff] %vm385_vm0, %v3729_v52  ;;  %v3436_v42 = vadd.f32 %v3435_v23, %v3347_v17  ;;  %v3356_v29 = vpop.f32.mrf.mxu0 }
 0x43d   : > { %v3595_v45 = vpop.f32.mrf.mxu2 }
 0x43e   : > { %v3596_v34 = vadd.f32 %v5720_v3, %v3595_v45  ;;  %v3479_v53 = vmax.f32 %v3436_v42, 0.0  ;;  %v3445_v59 = vpop.f32.mrf.mxu1  ;;  %v6134_v45 = vld [vmem:[#allocation68_spill] sm:$0xff] }
 0x43f   : > { %v3259_v21 = vpop.f32.mrf.mxu3 }
 0x440   : > { %v3698_v25 = vadd.f32 %v3666_v50, %v3596_v34  ;;  %v3260_v15 = vadd.f32 %v3259_v21, %v3171_v27  ;;  %v3003_v50 = vadd.f32 %v6134_v45, %v6133_v61 }
 0x442   : > { %v3730_v26 = vmax.f32 %v3698_v25, 0.0  ;;  %v3349_v54 = vadd.f32 %v3348_v6, %v3260_v15 }
 0x444   : > { %3762 = vst.msk [vmem:[%s5730_s11 + $0x30] sm:$0xff] %vm385_vm0, %v3730_v26  ;;  %v3438_v1 = vadd.f32 %v3437_v56, %v3349_v54  ;;  %v6132_v56 = vld [vmem:[#allocation81_spill] sm:$0xff]  ;;  %v3358_v26 = vpop.f32.mrf.mxu0 }
 0x445   : > { %v3597_v2 = vpop.f32.mrf.mxu2  ;;  %v3090_v52 = vadd.f32 %v6132_v56, %v3001_v33 }
 0x446   : > { %v3480_v18 = vmax.f32 %v3438_v1, 0.0  ;;  %v3598_v5 = vadd.f32 %v5720_v3, %v3597_v2  ;;  %v3447_v2 = vpop.f32.mrf.mxu1 }
 0x447   : > { %v3262_v23 = vpop.f32.mrf.mxu3  ;;  %v3179_v7 = vadd.f32 %v5690_v62, %v3090_v52 }
 0x448   : > { %v3699_v44 = vadd.f32 %v3667_v39, %v3598_v5  ;;  %v3499_v47 = vpack.c.bf16 %v3480_v18, %v3479_v53  ;;  %v3263_v12 = vadd.f32 %v3262_v23, %v3174_v10  ;;  %v6136_v39 = vld [vmem:[#allocation96_spill] sm:$0xff]  ;;  %v6138_v10 = vld [vmem:[#allocation86_spill] sm:$0xff] }
 0x449   : > { %v3006_v19 = vadd.f32 %v6137_v51, %v6136_v39 }
 0x44a   : > { %v3731_v16 = vmax.f32 %v3699_v44, 0.0  ;;  %3639 = vmatmul.bf16.gmra.mxu2 %v3499_v47  ;;  %v3352_v58 = vadd.f32 %v3351_v13, %v3263_v12  ;;  %v6135_v13 = vld [vmem:[#allocation83_spill] sm:$0xff] }
 0x44b   : > { %v3092_v42 = vadd.f32 %v6135_v13, %v3003_v50  ;;  %v3095_v47 = vadd.f32 %v6138_v10, %v3006_v19  ;;  %v3671_v12 = vld [vmem:[%s4702_s29 + $0x58] sm:$0xff]  ;;  %v3678_v10 = vld [vmem:[%s4702_s29 + $0x90] sm:$0xff] }
 0x44c   : > { %3763 = vst.msk [vmem:[%s5730_s11 + $0x38] sm:$0xff] %vm385_vm0, %v3731_v16  ;;  %v3441_v6 = vadd.f32 %v3440_v11, %v3352_v58  ;;  %v3670_v11 = vld [vmem:[%s4702_s29 + $0x50] sm:$0xff] }
 0x44d   : > { %v3600_v55 = vpop.f32.mrf.mxu2  ;;  %v3181_v46 = vadd.f32 %v5699_v31, %v3092_v42  ;;  %v6140_v31 = vld [vmem:[#allocation72_spill] sm:$0xff] }
 0x44e   : > { %v3601_v4 = vadd.f32 %v5720_v3, %v3600_v55  ;;  %v3481_v17 = vmax.f32 %v3441_v6, 0.0  ;;  %v3008_v38 = vadd.f32 %v6140_v31, %v6139_v0  ;;  %v3450_v20 = vpop.f32.mrf.mxu1  ;;  %v3679_v31 = vld [vmem:[%s4702_s29 + $0x98] sm:$0xff] }
 0x44f   : > { %v3264_v57 = vpop.f32.mrf.mxu3 }
 0x450   : > { %v3700_v37 = vadd.f32 %v3668_v28, %v3601_v4  ;;  %v3265_v8 = vadd.f32 %v3264_v57, %v3176_v43  ;;  %v3361_v28 = vpop.f32.mrf.mxu0  ;;  %v3184_v43 = vadd.f32 %v5706_v40, %v3095_v47 }
 0x452   : > { %v3732_v60 = vmax.f32 %v3700_v37, 0.0  ;;  %v3354_v49 = vadd.f32 %v3353_v30, %v3265_v8  ;;  %v6141_v37 = vld [vmem:[#allocation87_spill] sm:$0xff] }
 0x453   : > { %v3097_v8 = vadd.f32 %v6141_v37, %v3008_v38 }
 0x454   : > { %3764 = vst.msk [vmem:[%s5730_s11 + $0x40] sm:$0xff] %vm385_vm0, %v3732_v60  ;;  %v3443_v14 = vadd.f32 %v3442_v24, %v3354_v49  ;;  %v3672_v60 = vld [vmem:[%s4702_s29 + $0x60] sm:$0xff] }
 0x455   : > { %v3602_v32 = vpop.f32.mrf.mxu2 }
 0x456   : > { %v3482_v34 = vmax.f32 %v3443_v14, 0.0  ;;  %v3603_v27 = vadd.f32 %v5720_v3, %v3602_v32  ;;  %v3186_v14 = vadd.f32 %v5712_v36, %v3097_v8  ;;  %v3452_v45 = vpop.f32.mrf.mxu1 }
 0x457   : > { %v3267_v21 = vpop.f32.mrf.mxu3 }
 0x458   : > { %v3701_v9 = vadd.f32 %v3669_v35, %v3603_v27  ;;  %v3500_v48 = vpack.c.bf16 %v3482_v34, %v3481_v17  ;;  %v3268_v15 = vadd.f32 %v3267_v21, %v3179_v7  ;;  %v3673_v34 = vld [vmem:[%s4702_s29 + $0x68] sm:$0xff] }
 0x45a   : > { %v3733_v25 = vmax.f32 %v3701_v9, 0.0  ;;  %3644 = vmatmul.bf16.gmra.mxu2 %v3500_v48  ;;  %v3357_v1 = vadd.f32 %v3356_v29, %v3268_v15  ;;  %v3674_v15 = vld [vmem:[%s4702_s29 + $0x70] sm:$0xff] }
 0x45c   : > { %3765 = vst.msk [vmem:[%s5730_s11 + $0x48] sm:$0xff] %vm385_vm0, %v3733_v25  ;;  %v3446_v18 = vadd.f32 %v3445_v59, %v3357_v1  ;;  %v3363_v59 = vpop.f32.mrf.mxu0 }
 0x45d   : > { %v3605_v54 = vpop.f32.mrf.mxu2 }
 0x45e   : > { %v3606_v41 = vadd.f32 %v5720_v3, %v3605_v54  ;;  %v3483_v30 = vmax.f32 %v3446_v18, 0.0 }
 0x45f   : > { %v3269_v62 = vpop.f32.mrf.mxu3 }
 0x460   : > { %v3702_v22 = vadd.f32 %v3670_v11, %v3606_v41  ;;  %v3270_v53 = vadd.f32 %v3269_v62, %v3181_v46  ;;  %v3675_v11 = vld [vmem:[%s4702_s29 + $0x78] sm:$0xff]  ;;  %v3676_v62 = vld [vmem:[%s4702_s29 + $0x80] sm:$0xff] }
 0x462   : > { %v3734_v5 = vmax.f32 %v3702_v22, 0.0  ;;  %v3359_v23 = vadd.f32 %v3358_v26, %v3270_v53  ;;  %v3677_v53 = vld [vmem:[%s4702_s29 + $0x88] sm:$0xff] }
 0x464   : > { %3766 = vst.msk [vmem:[%s5730_s11 + $0x50] sm:$0xff] %vm385_vm0, %v3734_v5  ;;  %v3448_v44 = vadd.f32 %v3447_v2, %v3359_v23 }
 0x465   : > { %v3607_v16 = vpop.f32.mrf.mxu2 }
 0x466   : > { %v3484_v24 = vmax.f32 %v3448_v44, 0.0  ;;  %v3608_v55 = vadd.f32 %v5720_v3, %v3607_v16 }
 0x467   : > { %v3272_v58 = vpop.f32.mrf.mxu3 }
 0x468   : > { %v3703_v4 = vadd.f32 %v3671_v12, %v3608_v55  ;;  %v3501_v57 = vpack.c.bf16 %v3484_v24, %v3483_v30  ;;  %v3273_v33 = vadd.f32 %v3272_v58, %v3184_v43 }
 0x46a   : > { %v3735_v63 = vmax.f32 %v3703_v4, 0.0  ;;  %3649 = vmatmul.bf16.gmra.mxu2 %v3501_v57  ;;  %v3362_v49 = vadd.f32 %v3361_v28, %v3273_v33  ;;  %v3680_v28 = vld [vmem:[%s4702_s29 + $0xa0] sm:$0xff] }
 0x46c   : > { %3767 = vst.msk [vmem:[%s5730_s11 + $0x58] sm:$0xff] %vm385_vm0, %v3735_v63  ;;  %v3451_v32 = vadd.f32 %v3450_v20, %v3362_v49  ;;  %v3681_v20 = vld [vmem:[%s4702_s29 + $0xa8] sm:$0xff] }
 0x46d   : > { %v3610_v6 = vpop.f32.mrf.mxu2 }
 0x46e   : > { %v3611_v29 = vadd.f32 %v5720_v3, %v3610_v6  ;;  %v3485_v27 = vmax.f32 %v3451_v32, 0.0  ;;  %v3682_v6 = vld [vmem:[%s4702_s29 + $0xb0] sm:$0xff] }
 0x46f   : > { %v3274_v56 = vpop.f32.mrf.mxu3 }
 0x470   : > { %v3704_v40 = vadd.f32 %v3672_v60, %v3611_v29  ;;  %v3275_v52 = vadd.f32 %v3274_v56, %v3186_v14  ;;  %v3683_v56 = vld [vmem:[%s4702_s29 + $0xb8] sm:$0xff] }
 0x472   : > { %v3736_v35 = vmax.f32 %v3704_v40, 0.0  ;;  %v3364_v61 = vadd.f32 %v3363_v59, %v3275_v52 }
 0x474   : > { %3768 = vst.msk [vmem:[%s5730_s11 + $0x60] sm:$0xff] %vm385_vm0, %v3736_v35  ;;  %v3453_v50 = vadd.f32 %v3452_v45, %v3364_v61  ;;  %v3684_v35 = vld [vmem:[%s4702_s29 + $0xc0] sm:$0xff] }
 0x475   : > { %v3612_v17 = vpop.f32.mrf.mxu2 }
 0x476   : > { %v3486_v21 = vmax.f32 %v3453_v50, 0.0  ;;  %v3613_v36 = vadd.f32 %v5720_v3, %v3612_v17 }
 0x478   : > { %v3705_v9 = vadd.f32 %v3673_v34, %v3613_v36  ;;  %v3502_v7 = vpack.c.bf16 %v3486_v21, %v3485_v27  ;;  %v3685_v34 = vld [vmem:[%s4702_s29 + $0xc8] sm:$0xff] }
 0x47a   : > { %v3737_v48 = vmax.f32 %v3705_v9, 0.0  ;;  %3654 = vmatmul.bf16.gmra.mxu2 %v3502_v7  ;;  %v3686_v7 = vld [vmem:[%s4702_s29 + $0xd0] sm:$0xff] }
 0x47c   : > { %3769 = vst.msk [vmem:[%s5730_s11 + $0x68] sm:$0xff] %vm385_vm0, %v3737_v48 }
 0x47d   : > { %v3615_v25 = vpop.f32.mrf.mxu2 }
 0x47e   : > { %v3616_v13 = vadd.f32 %v5720_v3, %v3615_v25 }
 0x480   : > { %v3706_v42 = vadd.f32 %v3674_v15, %v3616_v13 }
 0x482   : > { %v3738_v26 = vmax.f32 %v3706_v42, 0.0  ;;  %v3687_v42 = vld [vmem:[%s4702_s29 + $0xd8] sm:$0xff] }
 0x484   : > { %3770 = vst.msk [vmem:[%s5730_s11 + $0x70] sm:$0xff] %vm385_vm0, %v3738_v26 }
 0x485   : > { %v3617_v54 = vpop.f32.mrf.mxu2 }
 0x486   : > { %v3618_v1 = vadd.f32 %v5720_v3, %v3617_v54 }
 0x488   : > { %v3707_v41 = vadd.f32 %v3675_v11, %v3618_v1 }
 0x48a   : > { %v3739_v46 = vmax.f32 %v3707_v41, 0.0  ;;  %v3688_v41 = vld [vmem:[%s4702_s29 + $0xe0] sm:$0xff] }
 0x48c   : > { %3771 = vst.msk [vmem:[%s5730_s11 + $0x78] sm:$0xff] %vm385_vm0, %v3739_v46 }
 0x48d   : > { %v3620_v2 = vpop.f32.mrf.mxu2 }
 0x48e   : > { %v3621_v39 = vadd.f32 %v5720_v3, %v3620_v2 }
 0x490   : > { %v3708_v51 = vadd.f32 %v3676_v62, %v3621_v39 }
 0x492   : > { %v3740_v19 = vmax.f32 %v3708_v51, 0.0  ;;  %v3689_v51 = vld [vmem:[%s4702_s29 + $0xe8] sm:$0xff] }
 0x494   : > { %3772 = vst.msk [vmem:[%s5730_s11 + $0x80] sm:$0xff] %vm385_vm0, %v3740_v19 }
 0x495   : > { %v3622_v22 = vpop.f32.mrf.mxu2 }
 0x496   : > { %v3623_v18 = vadd.f32 %v5720_v3, %v3622_v22 }
 0x498   : > { %v3709_v5 = vadd.f32 %v3677_v53, %v3623_v18 }
 0x49a   : > { %v3741_v23 = vmax.f32 %v3709_v5, 0.0  ;;  %v3690_v5 = vld [vmem:[%s4702_s29 + $0xf0] sm:$0xff] }
 0x49c   : > { %3773 = vst.msk [vmem:[%s5730_s11 + $0x88] sm:$0xff] %vm385_vm0, %v3741_v23 }
 0x49d   : > { %v3625_v44 = vpop.f32.mrf.mxu2 }
 0x49e   : > { %v3626_v47 = vadd.f32 %v5720_v3, %v3625_v44 }
 0x4a0   : > { %v3710_v16 = vadd.f32 %v3678_v10, %v3626_v47 }
 0x4a2   : > { %v3742_v12 = vmax.f32 %v3710_v16, 0.0  ;;  %v3691_v16 = vld [vmem:[%s4702_s29 + $0xf8] sm:$0xff] }
 0x4a4   : > { %3774 = vst.msk [vmem:[%s5730_s11 + $0x90] sm:$0xff] %vm385_vm0, %v3742_v12 }
 0x4a5   : > { %v3627_v0 = vpop.f32.mrf.mxu2 }
 0x4a6   : > { %v3628_v38 = vadd.f32 %v5720_v3, %v3627_v0 }
 0x4a8   : > { %v3711_v30 = vadd.f32 %v3679_v31, %v3628_v38 }
 0x4aa   : > { %v3743_v24 = vmax.f32 %v3711_v30, 0.0 }
 0x4ac   : > { %3775 = vst.msk [vmem:[%s5730_s11 + $0x98] sm:$0xff] %vm385_vm0, %v3743_v24 }
 0x4ad   : > { %v3630_v55 = vpop.f32.mrf.mxu2 }
 0x4ae   : > { %v3631_v58 = vadd.f32 %v5720_v3, %v3630_v55 }
 0x4b0   : > { %v3712_v4 = vadd.f32 %v3680_v28, %v3631_v58 }
 0x4b2   : > { %v3744_v43 = vmax.f32 %v3712_v4, 0.0 }
 0x4b4   : > { %3776 = vst.msk [vmem:[%s5730_s11 + $0xa0] sm:$0xff] %vm385_vm0, %v3744_v43 }
 0x4b5   : > { %v3632_v57 = vpop.f32.mrf.mxu2 }
 0x4b6   : > { %v3633_v63 = vadd.f32 %v5720_v3, %v3632_v57 }
 0x4b8   : > { %v3713_v33 = vadd.f32 %v3681_v20, %v3633_v63 }
 0x4ba   : > { %v3745_v37 = vmax.f32 %v3713_v33, 0.0 }
 0x4bc   : > { %3777 = vst.msk [vmem:[%s5730_s11 + $0xa8] sm:$0xff] %vm385_vm0, %v3745_v37 }
 0x4bd   : > { %v3635_v8 = vpop.f32.mrf.mxu2 }
 0x4be   : > { %v3636_v60 = vadd.f32 %v5720_v3, %v3635_v8 }
 0x4c0   : > { %v3714_v49 = vadd.f32 %v3682_v6, %v3636_v60 }
 0x4c2   : > { %v3746_v29 = vmax.f32 %v3714_v49, 0.0 }
 0x4c4   : > { %3778 = vst.msk [vmem:[%s5730_s11 + $0xb0] sm:$0xff] %vm385_vm0, %v3746_v29 }
 0x4c5   : > { %v3637_v14 = vpop.f32.mrf.mxu2 }
 0x4c6   : > { %v3638_v40 = vadd.f32 %v5720_v3, %v3637_v14 }
 0x4c8   : > { %v3715_v52 = vadd.f32 %v3683_v56, %v3638_v40 }
 0x4ca   : > { %v3747_v59 = vmax.f32 %v3715_v52, 0.0 }
 0x4cc   : > { %3779 = vst.msk [vmem:[%s5730_s11 + $0xb8] sm:$0xff] %vm385_vm0, %v3747_v59 }
 0x4cd   : > { %v3640_v32 = vpop.f32.mrf.mxu2 }
 0x4ce   : > { %v3641_v61 = vadd.f32 %v5720_v3, %v3640_v32 }
 0x4d0   : > { %v3716_v45 = vadd.f32 %v3684_v35, %v3641_v61 }
 0x4d2   : > { %v3748_v50 = vmax.f32 %v3716_v45, 0.0 }
 0x4d4   : > { %3780 = vst.msk [vmem:[%s5730_s11 + $0xc0] sm:$0xff] %vm385_vm0, %v3748_v50 }
 0x4d5   : > { %v3642_v17 = vpop.f32.mrf.mxu2 }
 0x4d6   : > { %v3643_v27 = vadd.f32 %v5720_v3, %v3642_v17 }
 0x4d8   : > { %v3717_v21 = vadd.f32 %v3685_v34, %v3643_v27 }
 0x4da   : > { %v3749_v36 = vmax.f32 %v3717_v21, 0.0 }
 0x4dc   : > { %3781 = vst.msk [vmem:[%s5730_s11 + $0xc8] sm:$0xff] %vm385_vm0, %v3749_v36 }
 0x4dd   : > { %v3645_v9 = vpop.f32.mrf.mxu2 }
 0x4de   : > { %v3646_v48 = vadd.f32 %v5720_v3, %v3645_v9 }
 0x4e0   : > { %v3718_v25 = vadd.f32 %v3686_v7, %v3646_v48 }
 0x4e2   : > { %v3750_v15 = vmax.f32 %v3718_v25, 0.0 }
 0x4e4   : > { %3782 = vst.msk [vmem:[%s5730_s11 + $0xd0] sm:$0xff] %vm385_vm0, %v3750_v15 }
 0x4e5   : > { %v3647_v13 = vpop.f32.mrf.mxu2 }
 0x4e6   : > { %v3648_v26 = vadd.f32 %v5720_v3, %v3647_v13 }
 0x4e8   : > { %v3719_v54 = vadd.f32 %v3687_v42, %v3648_v26 }
 0x4ea   : > { %v3751_v11 = vmax.f32 %v3719_v54, 0.0 }
 0x4ec   : > { %3783 = vst.msk [vmem:[%s5730_s11 + $0xd8] sm:$0xff] %vm385_vm0, %v3751_v11 }
 0x4ed   : > { %v3650_v1 = vpop.f32.mrf.mxu2 }
 0x4ee   : > { %v3651_v46 = vadd.f32 %v5720_v3, %v3650_v1 }
 0x4f0   : > { %v3720_v2 = vadd.f32 %v3688_v41, %v3651_v46 }
 0x4f2   : > { %v3752_v62 = vmax.f32 %v3720_v2, 0.0 }
 0x4f4   : > { %3784 = vst.msk [vmem:[%s5730_s11 + $0xe0] sm:$0xff] %vm385_vm0, %v3752_v62 }
 0x4f5   : > { %v3652_v39 = vpop.f32.mrf.mxu2 }
 0x4f6   : > { %v3653_v19 = vadd.f32 %v5720_v3, %v3652_v39 }
 0x4f8   : > { %v3721_v22 = vadd.f32 %v3689_v51, %v3653_v19 }
 0x4fa   : > { %v3753_v53 = vmax.f32 %v3721_v22, 0.0 }
 0x4fc   : > { %3785 = vst.msk [vmem:[%s5730_s11 + $0xe8] sm:$0xff] %vm385_vm0, %v3753_v53 }
 0x4fd   : > { %v3655_v18 = vpop.f32.mrf.mxu2 }
 0x4fe   : > { %v3656_v23 = vadd.f32 %v5720_v3, %v3655_v18 }
 0x500   : > { %v3722_v44 = vadd.f32 %v3690_v5, %v3656_v23 }
 0x502   : > { %v3754_v10 = vmax.f32 %v3722_v44, 0.0 }
 0x504   : > { %3786 = vst.msk [vmem:[%s5730_s11 + $0xf0] sm:$0xff] %vm385_vm0, %v3754_v10 }
 0x505   : > { %v3657_v47 = vpop.f32.mrf.mxu2 }
 0x506   : > { %v3658_v12 = vadd.f32 %v5720_v3, %v3657_v47 }
 0x508   : > { %v3723_v0 = vadd.f32 %v3691_v16, %v3658_v12 }
 0x50a   : > { %v3755_v31 = vmax.f32 %v3723_v0, 0.0 }
 0x50c   : > { %3787 = vst.msk [vmem:[%s5730_s11 + $0xf8] sm:$0xff] %vm385_vm0, %v3755_v31 }
 0x50d   : > { %4507 = shalt.err (!%p4504_p10)
}
 0x50e   : > { %s4559_s23 = smov 128   ;;  %s4560_s11 = smov 8  }
 0x50f   : > { %4355 = dma.vmem_to_hbm [thread:$0]  (%p4668_p7), %s3802_s12, 4096, %s3804_s13, %s3789_s28, %s4559_s23, %s4559_s23, %s4560_s11  }
 0x510 PF: > { %s3818_s19 = sand.u32 1, %s4538_s24   ;;  %p6142_p12 = scmp.ge.s32.totalorder %s4550_s27, 2 }
 0x511   : > { %s3819_s22 = scalar_lea.sflag [#allocation5], %s3818_s19 }
 0x512   : > { %p4366_p13 = pnand %p6142_p12, %p4636_p6 }
 0x514   : > { %p4367_p0 = pneg %p4366_p13 }
 0x516   : > { %4533 = dma.done.wait (%p4367_p0), %s3819_s22, 4096  }
 0x517   : > { %4535 = vsyncadd (%p4367_p0), %s3819_s22, 4294963200  ;;  %p21_p3 = scmp.ge.s32.totalorder %s4654_s15, 4   ;;  %s6143_s24 = smov %s4542_s25 }
 0x518   : > { %s6144_s25 = smov %s4546_s26  ;;  %s6145_s26 = smov %s4664_s20 }
 0x519   : > { %s6146_s27 = smov %s4654_s15  ;;  %23 = sbr.rel (!%p21_p3) target bundleno = 8 (0x8), region = 100 }
 0x51e   :  { %3825 = vsyncpa [#allocation4], 1 }
 0x51f   :  { %3827 = vsyncpa [#allocation4 + $0x1], 1 }
 0x520   :  { %3828 = vsyncpa [#allocation7], 1 }
 0x521   :  { %3829 = vsyncpa [#allocation5], 1 }
 0x522   :  { %3831 = vsyncpa [#allocation5 + $0x1], 1 }

</bundles_post_ra>
